<compile_context>
chip_gen: v7x
topology: tpu7x:2x2x1
jax: 0.10.0
libtpu: 0.0.40
codegen_flags: <defaults>
</compile_context>

<pallas_src>
import functools

import jax
import jax.numpy as jnp
from jax.experimental import pallas as pl
from jax.experimental.pallas import tpu as pltpu


# ----------------------------------------------------------------------------
# Fused forward kernel (one batch tile per grid step)
# ----------------------------------------------------------------------------
def _vae_fwd_kernel(x_ref, eps_ref, *refs, latent_dim):
    """refs = (w1,b1,...,w8,b8, x_reconst_ref, mu_logvar_ref).

    Weights are (in, out) bf16 (enc layer 4 zero-padded to a 128-wide out);
    biases are (1, out) f32.  Computes, for the current TM-row batch tile:
      h = enc(x); mu, log_var = split(h); z = mu + eps*exp(0.5*log_var);
      x_reconst = dec(z).
    """
    wb = refs[:16]
    xrec_ref, mulv_ref = refs[16], refs[17]

    def linear(h, w_ref, b_ref):
        # bf16 x bf16 -> f32 accumulate on the MXU, then f32 bias add.
        return jnp.dot(h.astype(w_ref.dtype), w_ref[...],
                       preferred_element_type=jnp.float32) + b_ref[...]

    def sigmoid(y, approx):
        # Numerically stable: exp argument is always <= 0, never overflows.
        #   y >= 0 : 1 / (1 + exp(-y))
        #   y <  0 : exp(y) / (1 + exp(y))
        e = jnp.exp(-jnp.abs(y))                       # EUP, in (0, 1]
        num = jnp.where(y >= 0, 1.0, e)
        return num * pl.reciprocal(1.0 + e, approx=approx)

    def silu(y):
        return y * sigmoid(y, approx=True)             # hidden layers: approx ok

    # ---------------- encoder ----------------
    h = x_ref[...].astype(jnp.float32)
    h = silu(linear(h, wb[0], wb[1]))       # D    -> 512
    h = silu(linear(h, wb[2], wb[3]))       # 512  -> 256
    h = silu(linear(h, wb[4], wb[5]))       # 256  -> 128
    h = linear(h, wb[6], wb[7])             # 128  -> 128 (2*latent zero-padded)
    mulv_ref[...] = h.astype(mulv_ref.dtype)           # lane-dense (TM, 128) store

    # ---------------- reparameterize ----------------
    mu = h[:, :latent_dim]
    log_var = h[:, latent_dim:2 * latent_dim]
    z = mu + eps_ref[...] * jnp.exp(0.5 * log_var)

    # ---------------- decoder ----------------
    d = silu(linear(z, wb[8], wb[9]))       # latent -> 128
    d = silu(linear(d, wb[10], wb[11]))     # 128    -> 256
    d = silu(linear(d, wb[12], wb[13]))     # 256    -> 512
    d = sigmoid(linear(d, wb[14], wb[15]), approx=False)  # 512 -> D, exact Sigmoid
    xrec_ref[...] = d.astype(xrec_ref.dtype)


def _round_up(n, m):
    return -(-n // m) * m


def vae_forward(params, x, eps_key, latent_dim, *, tm=None):
    """Mirrors VAE.forward: returns (x_reconst, mu, log_var)."""
    enc, dec = params
    B = x.shape[0]
    xf = x.reshape(B, -1).astype(jnp.float32)            # x.view(B, -1)
    D = xf.shape[1]

    # torch.randn_like(std) — eps drawn in plain JAX (glue), fed to the kernel.
    eps = jax.random.normal(eps_key, (B, latent_dim), jnp.float32)

    # ----- batch tile: 256 saturates v6e/v7x MXU; tiny B rounds to sublanes ---
    if tm is None:
        tm = 256 if B >= 256 else min(256, max(8, _round_up(B, 8)))
    b_pad = _round_up(B, tm)
    if b_pad != B:
        xf = jnp.pad(xf, ((0, b_pad - B), (0, 0)))
        eps = jnp.pad(eps, ((0, b_pad - B), (0, 0)))

    # ----- pad encoder layer 4 to a full 128-lane output (lane-dense store) ---
    mulv_w = _round_up(2 * latent_dim, 128)
    enc = list(enc)
    w4, b4 = enc[3]
    pad_n = mulv_w - w4.shape[1]
    if pad_n:
        w4 = jnp.pad(w4, ((0, 0), (0, pad_n)))
        b4 = jnp.pad(b4, ((0, 0), (0, pad_n)))
    enc[3] = (w4, b4)

    layers = list(enc) + list(dec)
    flat_wb = []
    wb_specs = []
    for w, b in layers:
        flat_wb += [w, b]
        # Constant index_map: weights/biases DMA'd once, resident across steps.
        wb_specs.append(pl.BlockSpec(tuple(w.shape), lambda i: (0, 0)))
        wb_specs.append(pl.BlockSpec(tuple(b.shape), lambda i: (0, 0)))

    kernel = functools.partial(_vae_fwd_kernel, latent_dim=latent_dim)
    x_reconst, mu_logvar = pl.pallas_call(
        kernel,
        out_shape=(
            jax.ShapeDtypeStruct((b_pad, D), jnp.float32),
            jax.ShapeDtypeStruct((b_pad, mulv_w), jnp.float32),
        ),
        grid=(b_pad // tm,),
        in_specs=[pl.BlockSpec((tm, D), lambda i: (i, 0)),
                  pl.BlockSpec((tm, latent_dim), lambda i: (i, 0))] + wb_specs,
        out_specs=(pl.BlockSpec((tm, D), lambda i: (i, 0)),
                   pl.BlockSpec((tm, mulv_w), lambda i: (i, 0))),
        compiler_params=pltpu.CompilerParams(
            dimension_semantics=("parallel",),          # megacore on v7x
            vmem_limit_bytes=32 * 1024 * 1024),         # safe on v5e/v6e/v7x
    )(xf, eps, *flat_wb)

    mu = mu_logvar[:B, :latent_dim]                     # h.chunk(2, dim=-1)
    log_var = mu_logvar[:B, latent_dim:2 * latent_dim]
    return x_reconst[:B], mu, log_var


# ----------------------------------------------------------------------------
# Parameter construction (deterministic, PyTorch-style uniform init)
# ----------------------------------------------------------------------------
def init_linear(key, in_features, out_features, w_dtype=jnp.bfloat16):
    kw, kb = jax.random.split(key)
    bound = 1.0 / (in_features ** 0.5)
    # Stored as (in, out) so the kernel does x @ W directly (== x @ W_torch.T).
    w = jax.random.uniform(kw, (in_features, out_features), jnp.float32,
                           -bound, bound).astype(w_dtype)
    b = jax.random.uniform(kb, (1, out_features), jnp.float32, -bound, bound)
    return w, b


def init_vae_params(key, input_shape, latent_dim):
    enc_dims = [(input_shape, 512), (512, 256), (256, 128),
                (128, latent_dim * 2)]
    dec_dims = [(latent_dim, 128), (128, 256), (256, 512),
                (512, input_shape)]
    keys = jax.random.split(key, len(enc_dims) + len(dec_dims))
    enc = [init_linear(k, i, o) for k, (i, o) in zip(keys[:4], enc_dims)]
    dec = [init_linear(k, i, o) for k, (i, o) in zip(keys[4:], dec_dims)]
    return enc, dec


# ----------------------------------------------------------------------------
# Pure-JAX reference (same bf16 weights, f32 math) for a sanity check
# ----------------------------------------------------------------------------
def vae_forward_ref(params, x, eps_key, latent_dim):
    enc, dec = params
    B = x.shape[0]
    h = x.reshape(B, -1).astype(jnp.float32)
    eps = jax.random.normal(eps_key, (B, latent_dim), jnp.float32)

    def lin(h, w, b):
        return h @ w.astype(jnp.float32) + b

    def silu(y):
        return y * jax.nn.sigmoid(y)

    h = silu(lin(h, *enc[0]))
    h = silu(lin(h, *enc[1]))
    h = silu(lin(h, *enc[2]))
    h = lin(h, *enc[3])
    mu, log_var = h[:, :latent_dim], h[:, latent_dim:]
    z = mu + eps * jnp.exp(0.5 * log_var)
    d = silu(lin(z, *dec[0]))
    d = silu(lin(d, *dec[1]))
    d = silu(lin(d, *dec[2]))
    d = jax.nn.sigmoid(lin(d, *dec[3]))
    return d, mu, log_var


# ----------------------------------------------------------------------------
if __name__ == "__main__":
    B, C, H, W = 2, 4, 16, 16
    input_shape = C * H * W          # 1024
    latent_dim = 32

    root = jax.random.PRNGKey(0)
    k_params, k_x, k_eps = jax.random.split(root, 3)

    params = init_vae_params(k_params, input_shape, latent_dim)
    x = jax.random.normal(k_x, (B, C, H, W), jnp.float32)

    fwd = jax.jit(functools.partial(vae_forward, latent_dim=latent_dim))
    x_reconst, mu, log_var = fwd(params, x, k_eps)
    jax.block_until_ready((x_reconst, mu, log_var))

    assert x_reconst.shape == (B, input_shape)
    assert mu.shape == (B, latent_dim)
    assert log_var.shape == (B, latent_dim)
    assert bool(jnp.all(jnp.isfinite(x_reconst)))
    assert bool(jnp.all(jnp.isfinite(mu))) and bool(jnp.all(jnp.isfinite(log_var)))
    # Exact final sigmoid: output strictly within [0, 1].
    assert bool(jnp.all((x_reconst >= 0.0) & (x_reconst <= 1.0)))

    # Loose comparison against a pure-JAX reference using the same bf16 weights
    # (bf16 MXU matmuls vs f32 reference -> small relative error expected).
    xr_ref, mu_ref, lv_ref = vae_forward_ref(params, x, k_eps, latent_dim)
    assert float(jnp.max(jnp.abs(x_reconst - xr_ref))) < 0.1
    assert float(jnp.max(jnp.abs(mu - mu_ref))) < 0.1
    assert float(jnp.max(jnp.abs(log_var - lv_ref))) < 0.1

    print("KERNEL_OK")
</pallas_src>

<mosaic_0001>
module attributes {stable_mosaic.version = 11 : i64} {
  func.func @_vae_fwd_kernel(%arg0: i32, %arg1: memref<8x1024xf32, #tpu.memory_space<vmem>>, %arg2: memref<8x32xf32, #tpu.memory_space<vmem>>, %arg3: memref<1024x512xbf16, #tpu.memory_space<vmem>>, %arg4: memref<1x512xf32, #tpu.memory_space<vmem>>, %arg5: memref<512x256xbf16, #tpu.memory_space<vmem>>, %arg6: memref<1x256xf32, #tpu.memory_space<vmem>>, %arg7: memref<256x128xbf16, #tpu.memory_space<vmem>>, %arg8: memref<1x128xf32, #tpu.memory_space<vmem>>, %arg9: memref<128x128xbf16, #tpu.memory_space<vmem>>, %arg10: memref<1x128xf32, #tpu.memory_space<vmem>>, %arg11: memref<32x128xbf16, #tpu.memory_space<vmem>>, %arg12: memref<1x128xf32, #tpu.memory_space<vmem>>, %arg13: memref<128x256xbf16, #tpu.memory_space<vmem>>, %arg14: memref<1x256xf32, #tpu.memory_space<vmem>>, %arg15: memref<256x512xbf16, #tpu.memory_space<vmem>>, %arg16: memref<1x512xf32, #tpu.memory_space<vmem>>, %arg17: memref<512x1024xbf16, #tpu.memory_space<vmem>>, %arg18: memref<1x1024xf32, #tpu.memory_space<vmem>>, %arg19: memref<8x1024xf32, #tpu.memory_space<vmem>>, %arg20: memref<8x128xf32, #tpu.memory_space<vmem>>) attributes {dimension_semantics = [#tpu.dimension_semantics<parallel>], iteration_bounds = array<i64: 1>, scalar_prefetch = 0 : i64, scratch_operands = 0 : i64, tpu.core_type = #tpu.core_type<tc>, window_params = [{transform_indices = @transform_0, window_bounds = array<i64: 8, 1024>}, {transform_indices = @transform_1, window_bounds = array<i64: 8, 32>}, {pipeline_mode = #tpu.pipeline_mode<synchronous>, transform_indices = @transform_2, window_bounds = array<i64: 1024, 512>}, {pipeline_mode = #tpu.pipeline_mode<synchronous>, transform_indices = @transform_3, window_bounds = array<i64: 1, 512>}, {pipeline_mode = #tpu.pipeline_mode<synchronous>, transform_indices = @transform_4, window_bounds = array<i64: 512, 256>}, {pipeline_mode = #tpu.pipeline_mode<synchronous>, transform_indices = @transform_5, window_bounds = array<i64: 1, 256>}, {pipeline_mode = #tpu.pipeline_mode<synchronous>, transform_indices = @transform_6, window_bounds = array<i64: 256, 128>}, {pipeline_mode = #tpu.pipeline_mode<synchronous>, transform_indices = @transform_7, window_bounds = array<i64: 1, 128>}, {pipeline_mode = #tpu.pipeline_mode<synchronous>, transform_indices = @transform_8, window_bounds = array<i64: 128, 128>}, {pipeline_mode = #tpu.pipeline_mode<synchronous>, transform_indices = @transform_9, window_bounds = array<i64: 1, 128>}, {pipeline_mode = #tpu.pipeline_mode<synchronous>, transform_indices = @transform_10, window_bounds = array<i64: 32, 128>}, {pipeline_mode = #tpu.pipeline_mode<synchronous>, transform_indices = @transform_11, window_bounds = array<i64: 1, 128>}, {pipeline_mode = #tpu.pipeline_mode<synchronous>, transform_indices = @transform_12, window_bounds = array<i64: 128, 256>}, {pipeline_mode = #tpu.pipeline_mode<synchronous>, transform_indices = @transform_13, window_bounds = array<i64: 1, 256>}, {pipeline_mode = #tpu.pipeline_mode<synchronous>, transform_indices = @transform_14, window_bounds = array<i64: 256, 512>}, {pipeline_mode = #tpu.pipeline_mode<synchronous>, transform_indices = @transform_15, window_bounds = array<i64: 1, 512>}, {pipeline_mode = #tpu.pipeline_mode<synchronous>, transform_indices = @transform_16, window_bounds = array<i64: 512, 1024>}, {pipeline_mode = #tpu.pipeline_mode<synchronous>, transform_indices = @transform_17, window_bounds = array<i64: 1, 1024>}, {transform_indices = @transform_18, window_bounds = array<i64: 8, 1024>}, {transform_indices = @transform_19, window_bounds = array<i64: 8, 128>}]} {
    %c0 = arith.constant 0 : index
    %c0_0 = arith.constant 0 : index
    %0 = vector.load %arg1[%c0, %c0_0] : memref<8x1024xf32, #tpu.memory_space<vmem>>, vector<8x1024xf32>
    %1 = arith.truncf %0 : vector<8x1024xf32> to vector<8x1024xbf16>
    %c0_1 = arith.constant 0 : index
    %c0_2 = arith.constant 0 : index
    %2 = vector.load %arg3[%c0_1, %c0_2] : memref<1024x512xbf16, #tpu.memory_space<vmem>>, vector<1024x512xbf16>
    %cst = arith.constant dense<0.000000e+00> : vector<8x512xf32>
    %3 = tpu.matmul %1, %2, %cst {dimension_numbers = #tpu.dot_dimension_numbers<[1], [0], [0], [1], [0, 0, 1, 1], [], []>} : vector<8x1024xbf16>, vector<1024x512xbf16>, vector<8x512xf32> -> vector<8x512xf32>
    %c0_3 = arith.constant 0 : index
    %c0_4 = arith.constant 0 : index
    %4 = vector.load %arg4[%c0_3, %c0_4] : memref<1x512xf32, #tpu.memory_space<vmem>>, vector<1x512xf32>
    %5 = vector.broadcast %4 : vector<1x512xf32> to vector<8x512xf32>
    %6 = arith.addf %3, %5 : vector<8x512xf32>
    %7 = math.absf %6 : vector<8x512xf32>
    %cst_5 = arith.constant 0.000000e+00 : f32
    %8 = vector.broadcast %cst_5 : f32 to vector<8x512xf32>
    %9 = arith.subf %8, %7 : vector<8x512xf32>
    %10 = math.exp %9 : vector<8x512xf32>
    %cst_6 = arith.constant 0.000000e+00 : f32
    %11 = vector.broadcast %cst_6 : f32 to vector<8x512xf32>
    %12 = arith.cmpf oge, %6, %11 : vector<8x512xf32>
    %cst_7 = arith.constant 1.000000e+00 : f32
    %13 = vector.broadcast %cst_7 : f32 to vector<8x512xf32>
    %14 = arith.select %12, %13, %10 : vector<8x512xi1>, vector<8x512xf32>
    %cst_8 = arith.constant 1.000000e+00 : f32
    %15 = vector.broadcast %cst_8 : f32 to vector<8x512xf32>
    %16 = arith.addf %15, %10 : vector<8x512xf32>
    %17 = tpu.reciprocal %16 {approx = true} : vector<8x512xf32> -> vector<8x512xf32>
    %18 = arith.mulf %14, %17 : vector<8x512xf32>
    %19 = arith.mulf %6, %18 : vector<8x512xf32>
    %20 = arith.truncf %19 : vector<8x512xf32> to vector<8x512xbf16>
    %c0_9 = arith.constant 0 : index
    %c0_10 = arith.constant 0 : index
    %21 = vector.load %arg5[%c0_9, %c0_10] : memref<512x256xbf16, #tpu.memory_space<vmem>>, vector<512x256xbf16>
    %cst_11 = arith.constant dense<0.000000e+00> : vector<8x256xf32>
    %22 = tpu.matmul %20, %21, %cst_11 {dimension_numbers = #tpu.dot_dimension_numbers<[1], [0], [0], [1], [0, 0, 1, 1], [], []>} : vector<8x512xbf16>, vector<512x256xbf16>, vector<8x256xf32> -> vector<8x256xf32>
    %c0_12 = arith.constant 0 : index
    %c0_13 = arith.constant 0 : index
    %23 = vector.load %arg6[%c0_12, %c0_13] : memref<1x256xf32, #tpu.memory_space<vmem>>, vector<1x256xf32>
    %24 = vector.broadcast %23 : vector<1x256xf32> to vector<8x256xf32>
    %25 = arith.addf %22, %24 : vector<8x256xf32>
    %26 = math.absf %25 : vector<8x256xf32>
    %cst_14 = arith.constant 0.000000e+00 : f32
    %27 = vector.broadcast %cst_14 : f32 to vector<8x256xf32>
    %28 = arith.subf %27, %26 : vector<8x256xf32>
    %29 = math.exp %28 : vector<8x256xf32>
    %cst_15 = arith.constant 0.000000e+00 : f32
    %30 = vector.broadcast %cst_15 : f32 to vector<8x256xf32>
    %31 = arith.cmpf oge, %25, %30 : vector<8x256xf32>
    %cst_16 = arith.constant 1.000000e+00 : f32
    %32 = vector.broadcast %cst_16 : f32 to vector<8x256xf32>
    %33 = arith.select %31, %32, %29 : vector<8x256xi1>, vector<8x256xf32>
    %cst_17 = arith.constant 1.000000e+00 : f32
    %34 = vector.broadcast %cst_17 : f32 to vector<8x256xf32>
    %35 = arith.addf %34, %29 : vector<8x256xf32>
    %36 = tpu.reciprocal %35 {approx = true} : vector<8x256xf32> -> vector<8x256xf32>
    %37 = arith.mulf %33, %36 : vector<8x256xf32>
    %38 = arith.mulf %25, %37 : vector<8x256xf32>
    %39 = arith.truncf %38 : vector<8x256xf32> to vector<8x256xbf16>
    %c0_18 = arith.constant 0 : index
    %c0_19 = arith.constant 0 : index
    %40 = vector.load %arg7[%c0_18, %c0_19] : memref<256x128xbf16, #tpu.memory_space<vmem>>, vector<256x128xbf16>
    %cst_20 = arith.constant dense<0.000000e+00> : vector<8x128xf32>
    %41 = tpu.matmul %39, %40, %cst_20 {dimension_numbers = #tpu.dot_dimension_numbers<[1], [0], [0], [1], [0, 0, 1, 1], [], []>} : vector<8x256xbf16>, vector<256x128xbf16>, vector<8x128xf32> -> vector<8x128xf32>
    %c0_21 = arith.constant 0 : index
    %c0_22 = arith.constant 0 : index
    %42 = vector.load %arg8[%c0_21, %c0_22] : memref<1x128xf32, #tpu.memory_space<vmem>>, vector<1x128xf32>
    %43 = vector.broadcast %42 : vector<1x128xf32> to vector<8x128xf32>
    %44 = arith.addf %41, %43 : vector<8x128xf32>
    %45 = math.absf %44 : vector<8x128xf32>
    %cst_23 = arith.constant 0.000000e+00 : f32
    %46 = vector.broadcast %cst_23 : f32 to vector<8x128xf32>
    %47 = arith.subf %46, %45 : vector<8x128xf32>
    %48 = math.exp %47 : vector<8x128xf32>
    %cst_24 = arith.constant 0.000000e+00 : f32
    %49 = vector.broadcast %cst_24 : f32 to vector<8x128xf32>
    %50 = arith.cmpf oge, %44, %49 : vector<8x128xf32>
    %cst_25 = arith.constant 1.000000e+00 : f32
    %51 = vector.broadcast %cst_25 : f32 to vector<8x128xf32>
    %52 = arith.select %50, %51, %48 : vector<8x128xi1>, vector<8x128xf32>
    %cst_26 = arith.constant 1.000000e+00 : f32
    %53 = vector.broadcast %cst_26 : f32 to vector<8x128xf32>
    %54 = arith.addf %53, %48 : vector<8x128xf32>
    %55 = tpu.reciprocal %54 {approx = true} : vector<8x128xf32> -> vector<8x128xf32>
    %56 = arith.mulf %52, %55 : vector<8x128xf32>
    %57 = arith.mulf %44, %56 : vector<8x128xf32>
    %58 = arith.truncf %57 : vector<8x128xf32> to vector<8x128xbf16>
    %c0_27 = arith.constant 0 : index
    %c0_28 = arith.constant 0 : index
    %59 = vector.load %arg9[%c0_27, %c0_28] : memref<128x128xbf16, #tpu.memory_space<vmem>>, vector<128x128xbf16>
    %cst_29 = arith.constant dense<0.000000e+00> : vector<8x128xf32>
    %60 = tpu.matmul %58, %59, %cst_29 {dimension_numbers = #tpu.dot_dimension_numbers<[1], [0], [0], [1], [0, 0, 1, 1], [], []>} : vector<8x128xbf16>, vector<128x128xbf16>, vector<8x128xf32> -> vector<8x128xf32>
    %c0_30 = arith.constant 0 : index
    %c0_31 = arith.constant 0 : index
    %61 = vector.load %arg10[%c0_30, %c0_31] : memref<1x128xf32, #tpu.memory_space<vmem>>, vector<1x128xf32>
    %62 = vector.broadcast %61 : vector<1x128xf32> to vector<8x128xf32>
    %63 = arith.addf %60, %62 : vector<8x128xf32>
    %c0_32 = arith.constant 0 : index
    %c0_33 = arith.constant 0 : index
    %64 = vector.load %arg20[%c0_32, %c0_33] : memref<8x128xf32, #tpu.memory_space<vmem>>, vector<8x128xf32>
    tpu.vector_store %arg20[%c0_32, %c0_33], %63 {strides = array<i32>} : memref<8x128xf32, #tpu.memory_space<vmem>>, vector<8x128xf32>,
    %65 = vector.extract_strided_slice %63 {offsets = [0, 0], sizes = [8, 32], strides = [1, 1]} : vector<8x128xf32> to vector<8x32xf32>
    %66 = vector.extract_strided_slice %63 {offsets = [0, 32], sizes = [8, 32], strides = [1, 1]} : vector<8x128xf32> to vector<8x32xf32>
    %c0_34 = arith.constant 0 : index
    %c0_35 = arith.constant 0 : index
    %67 = vector.load %arg2[%c0_34, %c0_35] : memref<8x32xf32, #tpu.memory_space<vmem>>, vector<8x32xf32>
    %cst_36 = arith.constant 5.000000e-01 : f32
    %68 = vector.broadcast %cst_36 : f32 to vector<8x32xf32>
    %69 = arith.mulf %68, %66 : vector<8x32xf32>
    %70 = math.exp %69 : vector<8x32xf32>
    %71 = arith.mulf %67, %70 : vector<8x32xf32>
    %72 = arith.addf %65, %71 : vector<8x32xf32>
    %73 = arith.truncf %72 : vector<8x32xf32> to vector<8x32xbf16>
    %c0_37 = arith.constant 0 : index
    %c0_38 = arith.constant 0 : index
    %74 = vector.load %arg11[%c0_37, %c0_38] : memref<32x128xbf16, #tpu.memory_space<vmem>>, vector<32x128xbf16>
    %cst_39 = arith.constant dense<0.000000e+00> : vector<8x128xf32>
    %75 = tpu.matmul %73, %74, %cst_39 {dimension_numbers = #tpu.dot_dimension_numbers<[1], [0], [0], [1], [0, 0, 1, 1], [], []>} : vector<8x32xbf16>, vector<32x128xbf16>, vector<8x128xf32> -> vector<8x128xf32>
    %c0_40 = arith.constant 0 : index
    %c0_41 = arith.constant 0 : index
    %76 = vector.load %arg12[%c0_40, %c0_41] : memref<1x128xf32, #tpu.memory_space<vmem>>, vector<1x128xf32>
    %77 = vector.broadcast %76 : vector<1x128xf32> to vector<8x128xf32>
    %78 = arith.addf %75, %77 : vector<8x128xf32>
    %79 = math.absf %78 : vector<8x128xf32>
    %cst_42 = arith.constant 0.000000e+00 : f32
    %80 = vector.broadcast %cst_42 : f32 to vector<8x128xf32>
    %81 = arith.subf %80, %79 : vector<8x128xf32>
    %82 = math.exp %81 : vector<8x128xf32>
    %cst_43 = arith.constant 0.000000e+00 : f32
    %83 = vector.broadcast %cst_43 : f32 to vector<8x128xf32>
    %84 = arith.cmpf oge, %78, %83 : vector<8x128xf32>
    %cst_44 = arith.constant 1.000000e+00 : f32
    %85 = vector.broadcast %cst_44 : f32 to vector<8x128xf32>
    %86 = arith.select %84, %85, %82 : vector<8x128xi1>, vector<8x128xf32>
    %cst_45 = arith.constant 1.000000e+00 : f32
    %87 = vector.broadcast %cst_45 : f32 to vector<8x128xf32>
    %88 = arith.addf %87, %82 : vector<8x128xf32>
    %89 = tpu.reciprocal %88 {approx = true} : vector<8x128xf32> -> vector<8x128xf32>
    %90 = arith.mulf %86, %89 : vector<8x128xf32>
    %91 = arith.mulf %78, %90 : vector<8x128xf32>
    %92 = arith.truncf %91 : vector<8x128xf32> to vector<8x128xbf16>
    %c0_46 = arith.constant 0 : index
    %c0_47 = arith.constant 0 : index
    %93 = vector.load %arg13[%c0_46, %c0_47] : memref<128x256xbf16, #tpu.memory_space<vmem>>, vector<128x256xbf16>
    %cst_48 = arith.constant dense<0.000000e+00> : vector<8x256xf32>
    %94 = tpu.matmul %92, %93, %cst_48 {dimension_numbers = #tpu.dot_dimension_numbers<[1], [0], [0], [1], [0, 0, 1, 1], [], []>} : vector<8x128xbf16>, vector<128x256xbf16>, vector<8x256xf32> -> vector<8x256xf32>
    %c0_49 = arith.constant 0 : index
    %c0_50 = arith.constant 0 : index
    %95 = vector.load %arg14[%c0_49, %c0_50] : memref<1x256xf32, #tpu.memory_space<vmem>>, vector<1x256xf32>
    %96 = vector.broadcast %95 : vector<1x256xf32> to vector<8x256xf32>
    %97 = arith.addf %94, %96 : vector<8x256xf32>
    %98 = math.absf %97 : vector<8x256xf32>
    %cst_51 = arith.constant 0.000000e+00 : f32
    %99 = vector.broadcast %cst_51 : f32 to vector<8x256xf32>
    %100 = arith.subf %99, %98 : vector<8x256xf32>
    %101 = math.exp %100 : vector<8x256xf32>
    %cst_52 = arith.constant 0.000000e+00 : f32
    %102 = vector.broadcast %cst_52 : f32 to vector<8x256xf32>
    %103 = arith.cmpf oge, %97, %102 : vector<8x256xf32>
    %cst_53 = arith.constant 1.000000e+00 : f32
    %104 = vector.broadcast %cst_53 : f32 to vector<8x256xf32>
    %105 = arith.select %103, %104, %101 : vector<8x256xi1>, vector<8x256xf32>
    %cst_54 = arith.constant 1.000000e+00 : f32
    %106 = vector.broadcast %cst_54 : f32 to vector<8x256xf32>
    %107 = arith.addf %106, %101 : vector<8x256xf32>
    %108 = tpu.reciprocal %107 {approx = true} : vector<8x256xf32> -> vector<8x256xf32>
    %109 = arith.mulf %105, %108 : vector<8x256xf32>
    %110 = arith.mulf %97, %109 : vector<8x256xf32>
    %111 = arith.truncf %110 : vector<8x256xf32> to vector<8x256xbf16>
    %c0_55 = arith.constant 0 : index
    %c0_56 = arith.constant 0 : index
    %112 = vector.load %arg15[%c0_55, %c0_56] : memref<256x512xbf16, #tpu.memory_space<vmem>>, vector<256x512xbf16>
    %cst_57 = arith.constant dense<0.000000e+00> : vector<8x512xf32>
    %113 = tpu.matmul %111, %112, %cst_57 {dimension_numbers = #tpu.dot_dimension_numbers<[1], [0], [0], [1], [0, 0, 1, 1], [], []>} : vector<8x256xbf16>, vector<256x512xbf16>, vector<8x512xf32> -> vector<8x512xf32>
    %c0_58 = arith.constant 0 : index
    %c0_59 = arith.constant 0 : index
    %114 = vector.load %arg16[%c0_58, %c0_59] : memref<1x512xf32, #tpu.memory_space<vmem>>, vector<1x512xf32>
    %115 = vector.broadcast %114 : vector<1x512xf32> to vector<8x512xf32>
    %116 = arith.addf %113, %115 : vector<8x512xf32>
    %117 = math.absf %116 : vector<8x512xf32>
    %cst_60 = arith.constant 0.000000e+00 : f32
    %118 = vector.broadcast %cst_60 : f32 to vector<8x512xf32>
    %119 = arith.subf %118, %117 : vector<8x512xf32>
    %120 = math.exp %119 : vector<8x512xf32>
    %cst_61 = arith.constant 0.000000e+00 : f32
    %121 = vector.broadcast %cst_61 : f32 to vector<8x512xf32>
    %122 = arith.cmpf oge, %116, %121 : vector<8x512xf32>
    %cst_62 = arith.constant 1.000000e+00 : f32
    %123 = vector.broadcast %cst_62 : f32 to vector<8x512xf32>
    %124 = arith.select %122, %123, %120 : vector<8x512xi1>, vector<8x512xf32>
    %cst_63 = arith.constant 1.000000e+00 : f32
    %125 = vector.broadcast %cst_63 : f32 to vector<8x512xf32>
    %126 = arith.addf %125, %120 : vector<8x512xf32>
    %127 = tpu.reciprocal %126 {approx = true} : vector<8x512xf32> -> vector<8x512xf32>
    %128 = arith.mulf %124, %127 : vector<8x512xf32>
    %129 = arith.mulf %116, %128 : vector<8x512xf32>
    %130 = arith.truncf %129 : vector<8x512xf32> to vector<8x512xbf16>
    %c0_64 = arith.constant 0 : index
    %c0_65 = arith.constant 0 : index
    %131 = vector.load %arg17[%c0_64, %c0_65] : memref<512x1024xbf16, #tpu.memory_space<vmem>>, vector<512x1024xbf16>
    %cst_66 = arith.constant dense<0.000000e+00> : vector<8x1024xf32>
    %132 = tpu.matmul %130, %131, %cst_66 {dimension_numbers = #tpu.dot_dimension_numbers<[1], [0], [0], [1], [0, 0, 1, 1], [], []>} : vector<8x512xbf16>, vector<512x1024xbf16>, vector<8x1024xf32> -> vector<8x1024xf32>
    %c0_67 = arith.constant 0 : index
    %c0_68 = arith.constant 0 : index
    %133 = vector.load %arg18[%c0_67, %c0_68] : memref<1x1024xf32, #tpu.memory_space<vmem>>, vector<1x1024xf32>
    %134 = vector.broadcast %133 : vector<1x1024xf32> to vector<8x1024xf32>
    %135 = arith.addf %132, %134 : vector<8x1024xf32>
    %136 = math.absf %135 : vector<8x1024xf32>
    %cst_69 = arith.constant 0.000000e+00 : f32
    %137 = vector.broadcast %cst_69 : f32 to vector<8x1024xf32>
    %138 = arith.subf %137, %136 : vector<8x1024xf32>
    %139 = math.exp %138 : vector<8x1024xf32>
    %cst_70 = arith.constant 0.000000e+00 : f32
    %140 = vector.broadcast %cst_70 : f32 to vector<8x1024xf32>
    %141 = arith.cmpf oge, %135, %140 : vector<8x1024xf32>
    %cst_71 = arith.constant 1.000000e+00 : f32
    %142 = vector.broadcast %cst_71 : f32 to vector<8x1024xf32>
    %143 = arith.select %141, %142, %139 : vector<8x1024xi1>, vector<8x1024xf32>
    %cst_72 = arith.constant 1.000000e+00 : f32
    %144 = vector.broadcast %cst_72 : f32 to vector<8x1024xf32>
    %145 = arith.addf %144, %139 : vector<8x1024xf32>
    %146 = tpu.reciprocal %145 : vector<8x1024xf32> -> vector<8x1024xf32>
    %147 = arith.mulf %143, %146 : vector<8x1024xf32>
    %c0_73 = arith.constant 0 : index
    %c0_74 = arith.constant 0 : index
    %148 = vector.load %arg19[%c0_73, %c0_74] : memref<8x1024xf32, #tpu.memory_space<vmem>>, vector<8x1024xf32>
    tpu.vector_store %arg19[%c0_73, %c0_74], %147 {strides = array<i32>} : memref<8x1024xf32, #tpu.memory_space<vmem>>, vector<8x1024xf32>,
    return
  }
  func.func @transform_0(%arg0: i32) -> (i32, i32) {
    %c0_i32 = arith.constant 0 : i32
    %c0_i32_0 = arith.constant 0 : i32
    return %arg0, %c0_i32 : i32, i32
  }
  func.func @transform_1(%arg0: i32) -> (i32, i32) {
    %c0_i32 = arith.constant 0 : i32
    %c0_i32_0 = arith.constant 0 : i32
    return %arg0, %c0_i32 : i32, i32
  }
  func.func @transform_2(%arg0: i32) -> (i32, i32) {
    %c0_i32 = arith.constant 0 : i32
    %c0_i32_0 = arith.constant 0 : i32
    %c0_i32_1 = arith.constant 0 : i32
    return %c0_i32, %c0_i32_0 : i32, i32
  }
  func.func @transform_3(%arg0: i32) -> (i32, i32) {
    %c0_i32 = arith.constant 0 : i32
    %c0_i32_0 = arith.constant 0 : i32
    %c0_i32_1 = arith.constant 0 : i32
    return %c0_i32, %c0_i32_0 : i32, i32
  }
  func.func @transform_4(%arg0: i32) -> (i32, i32) {
    %c0_i32 = arith.constant 0 : i32
    %c0_i32_0 = arith.constant 0 : i32
    %c0_i32_1 = arith.constant 0 : i32
    return %c0_i32, %c0_i32_0 : i32, i32
  }
  func.func @transform_5(%arg0: i32) -> (i32, i32) {
    %c0_i32 = arith.constant 0 : i32
    %c0_i32_0 = arith.constant 0 : i32
    %c0_i32_1 = arith.constant 0 : i32
    return %c0_i32, %c0_i32_0 : i32, i32
  }
  func.func @transform_6(%arg0: i32) -> (i32, i32) {
    %c0_i32 = arith.constant 0 : i32
    %c0_i32_0 = arith.constant 0 : i32
    %c0_i32_1 = arith.constant 0 : i32
    return %c0_i32, %c0_i32_0 : i32, i32
  }
  func.func @transform_7(%arg0: i32) -> (i32, i32) {
    %c0_i32 = arith.constant 0 : i32
    %c0_i32_0 = arith.constant 0 : i32
    %c0_i32_1 = arith.constant 0 : i32
    return %c0_i32, %c0_i32_0 : i32, i32
  }
  func.func @transform_8(%arg0: i32) -> (i32, i32) {
    %c0_i32 = arith.constant 0 : i32
    %c0_i32_0 = arith.constant 0 : i32
    %c0_i32_1 = arith.constant 0 : i32
    return %c0_i32, %c0_i32_0 : i32, i32
  }
  func.func @transform_9(%arg0: i32) -> (i32, i32) {
    %c0_i32 = arith.constant 0 : i32
    %c0_i32_0 = arith.constant 0 : i32
    %c0_i32_1 = arith.constant 0 : i32
    return %c0_i32, %c0_i32_0 : i32, i32
  }
  func.func @transform_10(%arg0: i32) -> (i32, i32) {
    %c0_i32 = arith.constant 0 : i32
    %c0_i32_0 = arith.constant 0 : i32
    %c0_i32_1 = arith.constant 0 : i32
    return %c0_i32, %c0_i32_0 : i32, i32
  }
  func.func @transform_11(%arg0: i32) -> (i32, i32) {
    %c0_i32 = arith.constant 0 : i32
    %c0_i32_0 = arith.constant 0 : i32
    %c0_i32_1 = arith.constant 0 : i32
    return %c0_i32, %c0_i32_0 : i32, i32
  }
  func.func @transform_12(%arg0: i32) -> (i32, i32) {
    %c0_i32 = arith.constant 0 : i32
    %c0_i32_0 = arith.constant 0 : i32
    %c0_i32_1 = arith.constant 0 : i32
    return %c0_i32, %c0_i32_0 : i32, i32
  }
  func.func @transform_13(%arg0: i32) -> (i32, i32) {
    %c0_i32 = arith.constant 0 : i32
    %c0_i32_0 = arith.constant 0 : i32
    %c0_i32_1 = arith.constant 0 : i32
    return %c0_i32, %c0_i32_0 : i32, i32
  }
  func.func @transform_14(%arg0: i32) -> (i32, i32) {
    %c0_i32 = arith.constant 0 : i32
    %c0_i32_0 = arith.constant 0 : i32
    %c0_i32_1 = arith.constant 0 : i32
    return %c0_i32, %c0_i32_0 : i32, i32
  }
  func.func @transform_15(%arg0: i32) -> (i32, i32) {
    %c0_i32 = arith.constant 0 : i32
    %c0_i32_0 = arith.constant 0 : i32
    %c0_i32_1 = arith.constant 0 : i32
    return %c0_i32, %c0_i32_0 : i32, i32
  }
  func.func @transform_16(%arg0: i32) -> (i32, i32) {
    %c0_i32 = arith.constant 0 : i32
    %c0_i32_0 = arith.constant 0 : i32
    %c0_i32_1 = arith.constant 0 : i32
    return %c0_i32, %c0_i32_0 : i32, i32
  }
  func.func @transform_17(%arg0: i32) -> (i32, i32) {
    %c0_i32 = arith.constant 0 : i32
    %c0_i32_0 = arith.constant 0 : i32
    %c0_i32_1 = arith.constant 0 : i32
    return %c0_i32, %c0_i32_0 : i32, i32
  }
  func.func @transform_18(%arg0: i32) -> (i32, i32) {
    %c0_i32 = arith.constant 0 : i32
    %c0_i32_0 = arith.constant 0 : i32
    return %arg0, %c0_i32 : i32, i32
  }
  func.func @transform_19(%arg0: i32) -> (i32, i32) {
    %c0_i32 = arith.constant 0 : i32
    %c0_i32_0 = arith.constant 0 : i32
    return %arg0, %c0_i32 : i32, i32
  }
}

</mosaic_0001>

<bundles_post_ra>
// kernel: vae_forward.1
= control target key start
LH: loop header
LB: loop body
LE: loop exit
PB: predicated region body
PF: predicated region fallthrough
CT: control target
= control target key end

     0   :  { %s8161_s0 = inlined_call_operand.vmem [shape: f32[8,1024], index: 0, kind: input, shape index: {}]   ;;  %s8162_s1 = inlined_call_operand.vmem [shape: f32[8,32], index: 1, kind: input, shape index: {}]   ;;  %s8163_s2 = inlined_call_operand.hbm [shape: bf16[1024,512], index: 2, kind: input, shape index: {}]   ;;  %s8164_s3 = inlined_call_operand.hbm [shape: f32[1,512], index: 3, kind: input, shape index: {}]   ;;  %s8165_s4 = inlined_call_operand.vmem [shape: bf16[512,256], index: 4, kind: input, shape index: {}]   ;;  %s8166_s5 = inlined_call_operand.hbm [shape: f32[1,256], index: 5, kind: input, shape index: {}]   ;;  %s8167_s6 = inlined_call_operand.hbm [shape: bf16[256,128], index: 6, kind: input, shape index: {}]   ;;  %s8168_s7 = inlined_call_operand.hbm [shape: f32[1,128], index: 7, kind: input, shape index: {}]   ;;  %s8169_s8 = inlined_call_operand.vmem [shape: bf16[128,128], index: 8, kind: input, shape index: {}]   ;;  %s8170_s9 = inlined_call_operand.vmem [shape: f32[1,128], index: 9, kind: input, shape index: {}]   ;;  %s8171_s10 = inlined_call_operand.hbm [shape: bf16[32,128], index: 10, kind: input, shape index: {}]   ;;  %s8172_s11 = inlined_call_operand.hbm [shape: f32[1,128], index: 11, kind: input, shape index: {}]   ;;  %s8173_s12 = inlined_call_operand.hbm [shape: bf16[128,256], index: 12, kind: input, shape index: {}]   ;;  %s8174_s13 = inlined_call_operand.vmem [shape: f32[1,256], index: 13, kind: input, shape index: {}]   ;;  %s8175_s14 = inlined_call_operand.hbm [shape: bf16[256,512], index: 14, kind: input, shape index: {}]   ;;  %s8176_s15 = inlined_call_operand.vmem [shape: f32[1,512], index: 15, kind: input, shape index: {}]   ;;  %s8177_s16 = inlined_call_operand.hbm [shape: bf16[512,1024], index: 16, kind: input, shape index: {}]   ;;  %s8178_s17 = inlined_call_operand.vmem [shape: f32[1,1024], index: 17, kind: input, shape index: {}]   ;;  %s8179_s18 = inlined_call_operand.vmem [shape: f32[8,1024], index: 18, kind: output, shape index: {0}]   ;;  %s8180_s19 = inlined_call_operand.vmem [shape: f32[8,128], index: 19, kind: output, shape index: {1}]  }
   0x1   :  { %8185 = sst [smem:[#allocation24_spill]] %s8161_s0 }
   0x2   :  { %8186 = sst [smem:[#allocation25_spill]] %s8162_s1 }
   0x3   :  { %8187 = sst [smem:[#allocation26_spill]] %s8163_s2 }
   0x4   :  { %8188 = sst [smem:[#allocation27_spill]] %s8164_s3 }
   0x5   :  { %8189 = sst [smem:[#allocation28_spill]] %s8179_s18 }
   0x6   :  { %25 = vsyncpa [#allocation3], 0 }
   0x7   :  { %26 = vsyncpa [#allocation5], 0 }
   0x8   :  { %27 = vsyncpa [#allocation8], 0 }
   0x9   :  { %28 = vsyncpa [#allocation11], 0 }
   0xa   :  { %29 = vsyncpa [#allocation14], 0 }
   0xb   :  { %30 = vsyncpa [#allocation17], 0  ;;  %s7502_s0 = smov [#allocation4]   ;;  %s7503_s20 = smov [#allocation7]  }
   0xc   :  { %s53_s30 = sshll.u32 %s7502_s0, 4  ;;  %s74_s21 = sshll.u32 %s7503_s20, 4  ;;  %s54_s30 = int_to_ptr.vmem [resolvable:$true] %s53_s30  ;;  %s7624_s21 = int_to_ptr.vmem [resolvable:$true] %s74_s21 }
   0xd   :  { %s8190_s2 = sld [smem:[#allocation27_spill]] }
  0x13   :  { %s7270_s23 = scalar_lea.hbm %s8190_s2, 64 }
  0x14   :  { %p7271_p0 = scmp.ne.s32.totalorder %s8190_s2, %s7270_s23  ;;  %p7274_p1 = scmp.lt.u32.totalorder %s7270_s23, %s8190_s2 }
  0x16   :  { %p7276_p2 = pnand %p7274_p1, %p7271_p0 }
  0x18   :  { %7279 = shalt.err (!%p7276_p2)
}
  0x19   :  { %s7280_s27 = scalar_lea.vmem %s54_s30, 64  ;;  %p7285_p4 = scmp.lt.s32.totalorder %s54_s30, %s54_s30 }
  0x1a   :  { %p7281_p3 = scmp.ne.s32.totalorder %s54_s30, %s7280_s27  ;;  %p7286_p5 = scmp.lt.s32.totalorder %s7280_s27, %s7280_s27 }
  0x1c   :  { %p7287_p6 = por %p7286_p5, %p7285_p4 }
  0x1e   :  { %p7288_p7 = pnand %p7287_p6, %p7281_p3 }
  0x20   :  { %7291 = shalt.err (!%p7288_p7)
}
  0x21   :  { %56 = dma.hbm_to_vmem [thread:$0]  %s8190_s2, 64, %s54_s30, [#allocation5]  }
  0x22   :  { %s7292_s1 = scalar_lea.hbm %s8167_s6, 2048 }
  0x23   :  { %p7293_p8 = scmp.ne.s32.totalorder %s8167_s6, %s7292_s1  ;;  %p7296_p9 = scmp.lt.u32.totalorder %s7292_s1, %s8167_s6 }
  0x25   :  { %p7298_p10 = pnand %p7296_p9, %p7293_p8 }
  0x27   :  { %7301 = shalt.err (!%p7298_p10)
}
  0x28   :  { %s7302_s3 = scalar_lea.vmem %s7624_s21, 2048  ;;  %p7307_p12 = scmp.lt.s32.totalorder %s7624_s21, %s7624_s21 }
  0x29   :  { %p7303_p11 = scmp.ne.s32.totalorder %s7624_s21, %s7302_s3  ;;  %p7308_p13 = scmp.lt.s32.totalorder %s7302_s3, %s7302_s3 }
  0x2b   :  { %p7309_p0 = por %p7308_p13, %p7307_p12 }
  0x2d   :  { %p7310_p1 = pnand %p7309_p0, %p7303_p11 }
  0x2f   :  { %7313 = shalt.err (!%p7310_p1)
}
  0x30   :  { %s7504_s30 = smov 64   ;;  %s7505_s2 = smov 4  }
  0x31   :  { %80 = dma.hbm_to_vmem [thread:$0]  %s8167_s6, 2048, %s7624_s21, [#allocation8], %s7504_s30, %s7504_s30, %s7505_s2  }
  0x32   :  { %s7506_s28 = smov [#allocation10]   ;;  %s7507_s0 = smov [#allocation13]  }
  0x33   :  { %s100_s29 = sshll.u32 %s7506_s28, 4  ;;  %s122_s20 = sshll.u32 %s7507_s0, 4  ;;  %s101_s29 = int_to_ptr.vmem [resolvable:$true] %s100_s29  ;;  %s7655_s20 = int_to_ptr.vmem [resolvable:$true] %s122_s20 }
  0x34   :  { %s7314_s24 = scalar_lea.hbm %s8171_s10, 256 }
  0x35   :  { %p7315_p2 = scmp.ne.s32.totalorder %s8171_s10, %s7314_s24  ;;  %p7318_p3 = scmp.lt.u32.totalorder %s7314_s24, %s8171_s10 }
  0x37   :  { %p7320_p4 = pnand %p7318_p3, %p7315_p2 }
  0x39   :  { %7323 = shalt.err (!%p7320_p4)
}
  0x3a   :  { %s7324_s6 = scalar_lea.vmem %s101_s29, 256  ;;  %p7329_p6 = scmp.lt.s32.totalorder %s101_s29, %s101_s29 }
  0x3b   :  { %p7325_p5 = scmp.ne.s32.totalorder %s101_s29, %s7324_s6  ;;  %p7330_p7 = scmp.lt.s32.totalorder %s7324_s6, %s7324_s6 }
  0x3d   :  { %p7331_p8 = por %p7330_p7, %p7329_p6 }
  0x3f   :  { %p7332_p9 = pnand %p7331_p8, %p7325_p5 }
  0x41   :  { %7335 = shalt.err (!%p7332_p9)
}
  0x42   :  { %106 = dma.hbm_to_vmem [thread:$0]  %s8171_s10, 256, %s101_s29, [#allocation11], %s7504_s30, %s7504_s30, %s7505_s2  }
  0x43   :  { %s7336_s0 = scalar_lea.hbm %s8173_s12, 2048 }
  0x44   :  { %p7337_p10 = scmp.ne.s32.totalorder %s8173_s12, %s7336_s0  ;;  %p7340_p11 = scmp.lt.u32.totalorder %s7336_s0, %s8173_s12 }
  0x46   :  { %p7342_p12 = pnand %p7340_p11, %p7337_p10 }
  0x48   :  { %7345 = shalt.err (!%p7342_p12)
}
  0x49   :  { %s7346_s23 = scalar_lea.vmem %s7655_s20, 2048  ;;  %p7351_p0 = scmp.lt.s32.totalorder %s7655_s20, %s7655_s20 }
  0x4a   :  { %p7347_p13 = scmp.ne.s32.totalorder %s7655_s20, %s7346_s23  ;;  %p7352_p1 = scmp.lt.s32.totalorder %s7346_s23, %s7346_s23 }
  0x4c   :  { %p7353_p2 = por %p7352_p1, %p7351_p0 }
  0x4e   :  { %p7354_p3 = pnand %p7353_p2, %p7347_p13 }
  0x50   :  { %7357 = shalt.err (!%p7354_p3)
}
  0x51   :  { %s7508_s10 = smov 128   ;;  %s7509_s30 = smov 8  }
  0x52   :  { %128 = dma.hbm_to_vmem [thread:$0]  %s8173_s12, 2048, %s7655_s20, [#allocation14], %s7508_s10, %s7508_s10, %s7509_s30  }
  0x53   :  { %s7510_s25 = smov [#allocation2]   ;;  %s8191_s26 = sld [smem:[#allocation26_spill]] }
  0x54   :  { %s40_s3 = sshll.u32 %s7510_s25, 4  ;;  %s41_s3 = int_to_ptr.vmem [resolvable:$true] %s40_s3 }
  0x59   :  { %s7358_s27 = scalar_lea.hbm %s8191_s26, 32768 }
  0x5a   :  { %p7359_p4 = scmp.ne.s32.totalorder %s8191_s26, %s7358_s27  ;;  %p7362_p5 = scmp.lt.u32.totalorder %s7358_s27, %s8191_s26 }
  0x5c   :  { %p7364_p6 = pnand %p7362_p5, %p7359_p4 }
  0x5e   :  { %7367 = shalt.err (!%p7364_p6)
}
  0x5f   :  { %s7368_s22 = scalar_lea.vmem %s41_s3, 32768  ;;  %p7373_p8 = scmp.lt.s32.totalorder %s41_s3, %s41_s3 }
  0x60   :  { %p7369_p7 = scmp.ne.s32.totalorder %s41_s3, %s7368_s22  ;;  %p7374_p9 = scmp.lt.s32.totalorder %s7368_s22, %s7368_s22 }
  0x62   :  { %p7375_p10 = por %p7374_p9, %p7373_p8 }
  0x64   :  { %p7376_p11 = pnand %p7375_p10, %p7369_p7 }
  0x66   :  { %7379 = shalt.err (!%p7376_p11)
}
  0x67   :  { %s7511_s12 = smov 256   ;;  %s7512_s20 = smov 16  }
  0x68   :  { %46 = dma.hbm_to_vmem [thread:$0]  %s8191_s26, 32768, %s41_s3, [#allocation3], %s7511_s12, %s7511_s12, %s7512_s20  }
  0x69   :  { %s7513_s10 = smov [#allocation6]   ;;  %s7514_s2 = smov [#allocation9]  }
  0x6a   :  { %s65_s30 = sshll.u32 %s7513_s10, 4  ;;  %s87_s29 = sshll.u32 %s7514_s2, 4  ;;  %s66_s30 = int_to_ptr.vmem [resolvable:$true] %s65_s30  ;;  %s88_s29 = int_to_ptr.vmem [resolvable:$true] %s87_s29 }
  0x6b   :  { %s7380_s21 = scalar_lea.hbm %s8166_s5, 32 }
  0x6c   :  { %p7381_p12 = scmp.ne.s32.totalorder %s8166_s5, %s7380_s21  ;;  %p7384_p13 = scmp.lt.u32.totalorder %s7380_s21, %s8166_s5 }
  0x6e   :  { %p7386_p0 = pnand %p7384_p13, %p7381_p12 }
  0x70   :  { %7389 = shalt.err (!%p7386_p0)
}
  0x71   :  { %s7390_s3 = scalar_lea.vmem %s66_s30, 32  ;;  %p7395_p2 = scmp.lt.s32.totalorder %s66_s30, %s66_s30 }
  0x72   :  { %p7391_p1 = scmp.ne.s32.totalorder %s66_s30, %s7390_s3  ;;  %p7396_p3 = scmp.lt.s32.totalorder %s7390_s3, %s7390_s3 }
  0x74   :  { %p7397_p4 = por %p7396_p3, %p7395_p2 }
  0x76   :  { %p7398_p5 = pnand %p7397_p4, %p7391_p1 }
  0x78   :  { %7401 = shalt.err (!%p7398_p5)
}
  0x79   :  { %68 = dma.hbm_to_vmem [thread:$0]  %s8166_s5, 32, %s66_s30, [#allocation5]  }
  0x7a   :  { %s7402_s23 = scalar_lea.hbm %s8168_s7, 16 }
  0x7b   :  { %p7403_p6 = scmp.ne.s32.totalorder %s8168_s7, %s7402_s23  ;;  %p7406_p7 = scmp.lt.u32.totalorder %s7402_s23, %s8168_s7 }
  0x7d   :  { %p7408_p8 = pnand %p7406_p7, %p7403_p6 }
  0x7f   :  { %7411 = shalt.err (!%p7408_p8)
}
  0x80   :  { %s7412_s21 = scalar_lea.vmem %s88_s29, 16  ;;  %s7416_s27 = scalar_lea.vmem %s88_s29, 32 }
  0x81   :  { %p7413_p9 = scmp.ne.s32.totalorder %s88_s29, %s7412_s21  ;;  %p7417_p10 = scmp.lt.s32.totalorder %s88_s29, %s88_s29 }
  0x82   :  { %p7418_p11 = scmp.lt.s32.totalorder %s7416_s27, %s7412_s21 }
  0x84   :  { %p7419_p12 = por %p7418_p11, %p7417_p10 }
  0x86   :  { %p7420_p13 = pnand %p7419_p12, %p7413_p9 }
  0x88   :  { %7423 = shalt.err (!%p7420_p13)
}
  0x89   :  { %90 = dma.hbm_to_vmem [thread:$0]  %s8168_s7, 16, %s88_s29, [#allocation8]  }
  0x8a   :  { %s7515_s28 = smov [#allocation12]   ;;  %s7516_s1 = smov [#allocation15]  }
  0x8b   :  { %s113_s0 = sshll.u32 %s7515_s28, 4  ;;  %s136_s3 = sshll.u32 %s7516_s1, 4  ;;  %s114_s0 = int_to_ptr.vmem [resolvable:$true] %s113_s0  ;;  %s137_s3 = int_to_ptr.vmem [resolvable:$true] %s136_s3 }
  0x8c   :  { %s7424_s22 = scalar_lea.hbm %s8172_s11, 16 }
  0x8d   :  { %p7425_p0 = scmp.ne.s32.totalorder %s8172_s11, %s7424_s22  ;;  %p7428_p1 = scmp.lt.u32.totalorder %s7424_s22, %s8172_s11 }
  0x8f   :  { %p7430_p2 = pnand %p7428_p1, %p7425_p0 }
  0x91   :  { %7433 = shalt.err (!%p7430_p2)
}
  0x92   :  { %s7434_s7 = scalar_lea.vmem %s114_s0, 16  ;;  %s7438_s29 = scalar_lea.vmem %s114_s0, 32 }
  0x93   :  { %p7435_p3 = scmp.ne.s32.totalorder %s114_s0, %s7434_s7  ;;  %p7439_p4 = scmp.lt.s32.totalorder %s114_s0, %s114_s0 }
  0x94   :  { %p7440_p5 = scmp.lt.s32.totalorder %s7438_s29, %s7434_s7 }
  0x96   :  { %p7441_p6 = por %p7440_p5, %p7439_p4 }
  0x98   :  { %p7442_p7 = pnand %p7441_p6, %p7435_p3 }
  0x9a   :  { %7445 = shalt.err (!%p7442_p7)
}
  0x9b   :  { %116 = dma.hbm_to_vmem [thread:$0]  %s8172_s11, 16, %s114_s0, [#allocation11]  }
  0x9c   :  { %s7446_s5 = scalar_lea.hbm %s8175_s14, 8192 }
  0x9d   :  { %p7447_p8 = scmp.ne.s32.totalorder %s8175_s14, %s7446_s5  ;;  %p7450_p9 = scmp.lt.u32.totalorder %s7446_s5, %s8175_s14 }
  0x9f   :  { %p7452_p10 = pnand %p7450_p9, %p7447_p8 }
  0xa1   :  { %7455 = shalt.err (!%p7452_p10)
}
  0xa2   :  { %s7456_s18 = scalar_lea.vmem %s137_s3, 8192  ;;  %p7461_p12 = scmp.lt.s32.totalorder %s137_s3, %s137_s3 }
  0xa3   :  { %p7457_p11 = scmp.ne.s32.totalorder %s137_s3, %s7456_s18  ;;  %p7462_p13 = scmp.lt.s32.totalorder %s7456_s18, %s7456_s18 }
  0xa5   :  { %p7463_p0 = por %p7462_p13, %p7461_p12 }
  0xa7   :  { %p7464_p1 = pnand %p7463_p0, %p7457_p11 }
  0xa9   :  { %7467 = shalt.err (!%p7464_p1)
}
  0xaa   :  { %142 = dma.hbm_to_vmem [thread:$0]  %s8175_s14, 8192, %s137_s3, [#allocation14], %s7511_s12, %s7511_s12, %s7512_s20  }
  0xab   :  { %s7517_s22 = smov [#allocation16]   ;;  %s7468_s2 = scalar_lea.hbm %s8177_s16, 32768 }
  0xac   :  { %s150_s24 = sshll.u32 %s7517_s22, 4  ;;  %p7469_p2 = scmp.ne.s32.totalorder %s8177_s16, %s7468_s2  ;;  %s151_s24 = int_to_ptr.vmem [resolvable:$true] %s150_s24 }
  0xad   :  { %p7472_p3 = scmp.lt.u32.totalorder %s7468_s2, %s8177_s16 }
  0xaf   :  { %p7474_p4 = pnand %p7472_p3, %p7469_p2 }
  0xb1   :  { %7477 = shalt.err (!%p7474_p4)
}
  0xb2   :  { %s7478_s21 = scalar_lea.vmem %s151_s24, 32768  ;;  %p7483_p6 = scmp.lt.s32.totalorder %s151_s24, %s151_s24 }
  0xb3   :  { %p7479_p5 = scmp.ne.s32.totalorder %s151_s24, %s7478_s21  ;;  %p7484_p7 = scmp.lt.s32.totalorder %s7478_s21, %s7478_s21 }
  0xb5   :  { %p7485_p8 = por %p7484_p7, %p7483_p6 }
  0xb7   :  { %p7486_p9 = pnand %p7485_p8, %p7479_p5 }
  0xb9   :  { %7489 = shalt.err (!%p7486_p9)
}
  0xba   :  { %s7518_s14 = smov 512   ;;  %s7519_s12 = smov 32  }
  0xbb   :  { %156 = dma.hbm_to_vmem [thread:$0]  %s8177_s16, 32768, %s151_s24, [#allocation17], %s7518_s14, %s7518_s14, %s7519_s12  }
  0xbc   :  { %7490 = dma.done.wait [#allocation3], 32768  }
  0xbd   :  { %7491 = vsyncadd [#allocation3], 4294934528 }
  0xbe   :  { %7492 = dma.done.wait [#allocation5], 96  }
  0xbf   :  { %7493 = vsyncadd [#allocation5], 4294967200 }
  0xc0   :  { %7494 = dma.done.wait [#allocation8], 2064  }
  0xc1   :  { %7495 = vsyncadd [#allocation8], 4294965232 }
  0xc2   :  { %7496 = dma.done.wait [#allocation11], 272  }
  0xc3   :  { %7497 = vsyncadd [#allocation11], 4294967024 }
  0xc4   :  { %7498 = dma.done.wait [#allocation14], 10240  }
  0xc5   :  { %7499 = vsyncadd [#allocation14], 4294957056 }
  0xc6   :  { %7500 = dma.done.wait [#allocation17], 32768  }
  0xc7   :  { %7501 = vsyncadd [#allocation17], 4294934528  ;;  %v6554_v0 = vld [vmem:[#allocation2 + $0x4] ss:$16 sps:$4 sm:$0xff]   ;;  %v6556_v1 = vld [vmem:[#allocation2 + $0xc] ss:$16 sps:$4 sm:$0xff]  }
  0xc8   :  { %1764 = vmatprep.subr.bf16.mxu0 %v6554_v0  ;;  %v6558_v2 = vld [vmem:[#allocation2] ss:$16 sps:$4 sm:$0xff]   ;;  %v6559_v3 = vld [vmem:[#allocation2 + $0x8] ss:$16 sps:$4 sm:$0xff]   ;;  %1928 = vmatprep.subr.bf16.mxu1 %v6556_v1  ;;  %v6560_v4 = vld [vmem:[#allocation2 + $0x24] ss:$16 sps:$4 sm:$0xff]  }
  0xc9   :  { %1765 = vmatpush1.bf16.msra.mxu0 %v6558_v2  ;;  %1929 = vmatpush1.bf16.msra.mxu1 %v6559_v3  ;;  %v6562_v5 = vld [vmem:[#allocation2 + $0x2c] ss:$16 sps:$4 sm:$0xff]   ;;  %v6564_v6 = vld [vmem:[#allocation2 + $0x20] ss:$16 sps:$4 sm:$0xff]   ;;  %v6565_v7 = vld [vmem:[#allocation2 + $0x28] ss:$16 sps:$4 sm:$0xff]  }
  0xca   :  { %1766 = vmatprep.subr.bf16.mxu0 %v6560_v4  ;;  %1930 = vmatprep.subr.bf16.mxu1 %v6562_v5  ;;  %v6566_v8 = vld [vmem:[#allocation2 + $0x44] ss:$16 sps:$4 sm:$0xff]   ;;  %v6568_v9 = vld [vmem:[#allocation2 + $0x4c] ss:$16 sps:$4 sm:$0xff]   ;;  %v6570_v10 = vld [vmem:[#allocation2 + $0x40] ss:$16 sps:$4 sm:$0xff]  }
  0xcb   :  { %v6571_v11 = vld [vmem:[#allocation2 + $0x48] ss:$16 sps:$4 sm:$0xff]   ;;  %v6572_v12 = vld [vmem:[#allocation2 + $0x64] ss:$16 sps:$4 sm:$0xff]   ;;  %v6574_v13 = vld [vmem:[#allocation2 + $0x6c] ss:$16 sps:$4 sm:$0xff]  }
  0xcc   :  { %v6576_v14 = vld [vmem:[#allocation2 + $0x60] ss:$16 sps:$4 sm:$0xff]   ;;  %v6577_v15 = vld [vmem:[#allocation2 + $0x68] ss:$16 sps:$4 sm:$0xff]   ;;  %v6578_v16 = vld [vmem:[#allocation2 + $0x84] ss:$16 sps:$4 sm:$0xff]  }
  0xcd   :  { %1767 = vmatpush1.bf16.msra.mxu0 %v6564_v6  ;;  %1931 = vmatpush1.bf16.msra.mxu1 %v6565_v7  ;;  %v6580_v17 = vld [vmem:[#allocation2 + $0x8c] ss:$16 sps:$4 sm:$0xff]   ;;  %v6582_v18 = vld [vmem:[#allocation2 + $0x80] ss:$16 sps:$4 sm:$0xff]   ;;  %v6583_v19 = vld [vmem:[#allocation2 + $0x88] ss:$16 sps:$4 sm:$0xff]  }
  0xce   :  { %1768 = vmatprep.subr.bf16.mxu0 %v6566_v8  ;;  %1932 = vmatprep.subr.bf16.mxu1 %v6568_v9  ;;  %v6584_v20 = vld [vmem:[#allocation2 + $0xa4] ss:$16 sps:$4 sm:$0xff]   ;;  %v6586_v21 = vld [vmem:[#allocation2 + $0xac] ss:$16 sps:$4 sm:$0xff]   ;;  %v6588_v22 = vld [vmem:[#allocation2 + $0xa0] ss:$16 sps:$4 sm:$0xff]  }
  0xcf   :  { %v6589_v23 = vld [vmem:[#allocation2 + $0xa8] ss:$16 sps:$4 sm:$0xff]   ;;  %v6590_v24 = vld [vmem:[#allocation2 + $0xc4] ss:$16 sps:$4 sm:$0xff]   ;;  %v6592_v25 = vld [vmem:[#allocation2 + $0xcc] ss:$16 sps:$4 sm:$0xff]  }
  0xd0   :  { %v6594_v26 = vld [vmem:[#allocation2 + $0xc0] ss:$16 sps:$4 sm:$0xff]   ;;  %v6595_v27 = vld [vmem:[#allocation2 + $0xc8] ss:$16 sps:$4 sm:$0xff]   ;;  %v6596_v28 = vld [vmem:[#allocation2 + $0xe4] ss:$16 sps:$4 sm:$0xff]  }
  0xd1   :  { %1769 = vmatpush1.bf16.msra.mxu0 %v6570_v10  ;;  %1933 = vmatpush1.bf16.msra.mxu1 %v6571_v11  ;;  %v6598_v29 = vld [vmem:[#allocation2 + $0xec] ss:$16 sps:$4 sm:$0xff]   ;;  %v6600_v30 = vld [vmem:[#allocation2 + $0xe0] ss:$16 sps:$4 sm:$0xff]   ;;  %v6601_v31 = vld [vmem:[#allocation2 + $0xe8] ss:$16 sps:$4 sm:$0xff]  }
  0xd2   :  { %1770 = vmatprep.subr.bf16.mxu0 %v6572_v12  ;;  %1934 = vmatprep.subr.bf16.mxu1 %v6574_v13  ;;  %v6602_v32 = vld [vmem:[#allocation2 + $0x104] ss:$16 sps:$4 sm:$0xff]   ;;  %v6604_v33 = vld [vmem:[#allocation2 + $0x10c] ss:$16 sps:$4 sm:$0xff]   ;;  %v6606_v34 = vld [vmem:[#allocation2 + $0x100] ss:$16 sps:$4 sm:$0xff]  }
  0xd3   :  { %v6607_v35 = vld [vmem:[#allocation2 + $0x108] ss:$16 sps:$4 sm:$0xff]   ;;  %v6608_v36 = vld [vmem:[#allocation2 + $0x124] ss:$16 sps:$4 sm:$0xff]   ;;  %v6610_v37 = vld [vmem:[#allocation2 + $0x12c] ss:$16 sps:$4 sm:$0xff]  }
  0xd4   :  { %v6612_v38 = vld [vmem:[#allocation2 + $0x120] ss:$16 sps:$4 sm:$0xff]   ;;  %v6613_v39 = vld [vmem:[#allocation2 + $0x128] ss:$16 sps:$4 sm:$0xff]   ;;  %v6614_v40 = vld [vmem:[#allocation2 + $0x144] ss:$16 sps:$4 sm:$0xff]  }
  0xd5   :  { %1771 = vmatpush1.bf16.msra.mxu0 %v6576_v14  ;;  %1935 = vmatpush1.bf16.msra.mxu1 %v6577_v15  ;;  %v6616_v41 = vld [vmem:[#allocation2 + $0x14c] ss:$16 sps:$4 sm:$0xff]   ;;  %v6618_v42 = vld [vmem:[#allocation2 + $0x140] ss:$16 sps:$4 sm:$0xff]   ;;  %v6619_v43 = vld [vmem:[#allocation2 + $0x148] ss:$16 sps:$4 sm:$0xff]  }
  0xd6   :  { %1772 = vmatprep.subr.bf16.mxu0 %v6578_v16  ;;  %1936 = vmatprep.subr.bf16.mxu1 %v6580_v17  ;;  %v6620_v44 = vld [vmem:[#allocation2 + $0x164] ss:$16 sps:$4 sm:$0xff]   ;;  %v6622_v45 = vld [vmem:[#allocation2 + $0x16c] ss:$16 sps:$4 sm:$0xff]   ;;  %s8192_s5 = sld [smem:[#allocation24_spill]]  ;;  %vm7521_vm6 = vmmov 0  }
  0xd7   :  { %v6624_v47 = vld [vmem:[#allocation2 + $0x160] ss:$16 sps:$4 sm:$0xff]   ;;  %v6625_v49 = vld [vmem:[#allocation2 + $0x168] ss:$16 sps:$4 sm:$0xff]   ;;  %v6626_v50 = vld [vmem:[#allocation2 + $0x184] ss:$16 sps:$4 sm:$0xff]  }
  0xd8   :  { %v6628_v51 = vld [vmem:[#allocation2 + $0x18c] ss:$16 sps:$4 sm:$0xff]   ;;  %v6630_v52 = vld [vmem:[#allocation2 + $0x180] ss:$16 sps:$4 sm:$0xff]   ;;  %v6631_v53 = vld [vmem:[#allocation2 + $0x188] ss:$16 sps:$4 sm:$0xff]  }
  0xd9   :  { %1773 = vmatpush1.bf16.msra.mxu0 %v6582_v18  ;;  %1937 = vmatpush1.bf16.msra.mxu1 %v6583_v19  ;;  %v6632_v54 = vld [vmem:[#allocation2 + $0x1a4] ss:$16 sps:$4 sm:$0xff]   ;;  %v6634_v55 = vld [vmem:[#allocation2 + $0x1ac] ss:$16 sps:$4 sm:$0xff]   ;;  %v6636_v56 = vld [vmem:[#allocation2 + $0x1a0] ss:$16 sps:$4 sm:$0xff]  }
  0xda   :  { %1774 = vmatprep.subr.bf16.mxu0 %v6584_v20  ;;  %1938 = vmatprep.subr.bf16.mxu1 %v6586_v21  ;;  %v6637_v57 = vld [vmem:[#allocation2 + $0x1a8] ss:$16 sps:$4 sm:$0xff]   ;;  %v6638_v58 = vld [vmem:[#allocation2 + $0x1c4] ss:$16 sps:$4 sm:$0xff]   ;;  %v6640_v59 = vld [vmem:[#allocation2 + $0x1cc] ss:$16 sps:$4 sm:$0xff]  }
  0xdb   :  { %v6642_v60 = vld [vmem:[#allocation2 + $0x1c0] ss:$16 sps:$4 sm:$0xff]   ;;  %v6643_v61 = vld [vmem:[#allocation2 + $0x1c8] ss:$16 sps:$4 sm:$0xff]   ;;  %v6644_v62 = vld [vmem:[#allocation2 + $0x1e4] ss:$16 sps:$4 sm:$0xff]  }
  0xdc   :  { %v191_v46 = vld [vmem:[%s8192_s5 + $0x8] sm:$0xff]  ;;  %v6648_v0 = vld [vmem:[#allocation2 + $0x1e0] ss:$16 sps:$4 sm:$0xff]   ;;  %v6652_v3 = vld [vmem:[#allocation2 + $0x204] ss:$16 sps:$4 sm:$0xff]   ;;  %s7522_s21 = smov 96  }
  0xdd   :  { %1775 = vmatpush1.bf16.msra.mxu0 %v6588_v22  ;;  %1939 = vmatpush1.bf16.msra.mxu1 %v6589_v23  ;;  %v199_v48 = vpack.c.bf16 %v191_v46, %v191_v46  ;;  %v6646_v63 = vld [vmem:[#allocation2 + $0x1ec] ss:$16 sps:$4 sm:$0xff]   ;;  %v6649_v1 = vld [vmem:[#allocation2 + $0x1e8] ss:$16 sps:$4 sm:$0xff]   ;;  %v190_v2 = vld [vmem:[%s8192_s5] sm:$0xff]  ;;  %vm2968_vm8 = vcmask 261120  }
  0xde   :  { %1776 = vmatprep.subr.bf16.mxu0 %v6590_v24  ;;  %1940 = vmatprep.subr.bf16.mxu1 %v6592_v25  ;;  %v6655_v4 = vld [vmem:[#allocation2 + $0x20c] ss:$16 sps:$4 sm:$0xff]   ;;  %v198_v5 = vpack.c.bf16 %v190_v2, %v190_v2  ;;  %v6650_v6 = vld [vmem:[#allocation2 + $0x200] ss:$16 sps:$4 sm:$0xff]   ;;  %v6653_v7 = vld [vmem:[#allocation2 + $0x208] ss:$16 sps:$4 sm:$0xff]  }
  0xdf   :  { %1796 = vmatprep.mubr.bf16.mxu0 %v199_v48  ;;  %1960 = vmatprep.mubr.bf16.mxu1 %v199_v48  ;;  %v6658_v8 = vld [vmem:[#allocation2 + $0x224] ss:$16 sps:$4 sm:$0xff]   ;;  %v6661_v9 = vld [vmem:[#allocation2 + $0x22c] ss:$16 sps:$4 sm:$0xff]   ;;  %v6656_v10 = vld [vmem:[#allocation2 + $0x220] ss:$16 sps:$4 sm:$0xff]  }
  0xe0   :  { %v6659_v11 = vld [vmem:[#allocation2 + $0x228] ss:$16 sps:$4 sm:$0xff]   ;;  %v6664_v12 = vld [vmem:[#allocation2 + $0x244] ss:$16 sps:$4 sm:$0xff]   ;;  %v6667_v13 = vld [vmem:[#allocation2 + $0x24c] ss:$16 sps:$4 sm:$0xff]  }
  0xe1   :  { %1777 = vmatpush1.bf16.msra.mxu0 %v6594_v26  ;;  %1941 = vmatpush1.bf16.msra.mxu1 %v6595_v27  ;;  %v6662_v14 = vld [vmem:[#allocation2 + $0x240] ss:$16 sps:$4 sm:$0xff]   ;;  %v6665_v15 = vld [vmem:[#allocation2 + $0x248] ss:$16 sps:$4 sm:$0xff]   ;;  %v6670_v16 = vld [vmem:[#allocation2 + $0x264] ss:$16 sps:$4 sm:$0xff]  }
  0xe2   :  { %1778 = vmatprep.subr.bf16.mxu0 %v6596_v28  ;;  %1942 = vmatprep.subr.bf16.mxu1 %v6598_v29  ;;  %v6673_v17 = vld [vmem:[#allocation2 + $0x26c] ss:$16 sps:$4 sm:$0xff]   ;;  %v6668_v18 = vld [vmem:[#allocation2 + $0x260] ss:$16 sps:$4 sm:$0xff]   ;;  %v6671_v19 = vld [vmem:[#allocation2 + $0x268] ss:$16 sps:$4 sm:$0xff]  }
  0xe3   :  { %v6676_v20 = vld [vmem:[#allocation2 + $0x284] ss:$16 sps:$4 sm:$0xff]   ;;  %v6679_v21 = vld [vmem:[#allocation2 + $0x28c] ss:$16 sps:$4 sm:$0xff]   ;;  %v6674_v22 = vld [vmem:[#allocation2 + $0x280] ss:$16 sps:$4 sm:$0xff]  }
  0xe4   :  { %v6677_v23 = vld [vmem:[#allocation2 + $0x288] ss:$16 sps:$4 sm:$0xff]   ;;  %v6682_v24 = vld [vmem:[#allocation2 + $0x2a4] ss:$16 sps:$4 sm:$0xff]   ;;  %v6685_v25 = vld [vmem:[#allocation2 + $0x2ac] ss:$16 sps:$4 sm:$0xff]  }
  0xe5   :  { %1779 = vmatpush1.bf16.msra.mxu0 %v6600_v30  ;;  %1943 = vmatpush1.bf16.msra.mxu1 %v6601_v31  ;;  %v6680_v26 = vld [vmem:[#allocation2 + $0x2a0] ss:$16 sps:$4 sm:$0xff]   ;;  %v6683_v27 = vld [vmem:[#allocation2 + $0x2a8] ss:$16 sps:$4 sm:$0xff]   ;;  %v6688_v28 = vld [vmem:[#allocation2 + $0x2c4] ss:$16 sps:$4 sm:$0xff]  }
  0xe6   :  { %1780 = vmatprep.subr.bf16.mxu0 %v6602_v32  ;;  %1944 = vmatprep.subr.bf16.mxu1 %v6604_v33  ;;  %v6691_v29 = vld [vmem:[#allocation2 + $0x2cc] ss:$16 sps:$4 sm:$0xff]   ;;  %v6686_v31 = vld [vmem:[#allocation2 + $0x2c0] ss:$16 sps:$4 sm:$0xff]   ;;  %v6689_v33 = vld [vmem:[#allocation2 + $0x2c8] ss:$16 sps:$4 sm:$0xff]  }
  0xe7   :  { %v193_v30 = vld [vmem:[%s8192_s5 + $0x18] sm:$0xff]  ;;  %v6712_v46 = vld [vmem:[#allocation2 + $0x344] ss:$16 sps:$4 sm:$0xff]   ;;  %v6710_v48 = vld [vmem:[#allocation2 + $0x340] ss:$16 sps:$4 sm:$0xff]   ;;  %s8194_s27 = sld [smem:[#allocation28_spill]] }
  0xe8   :  { %v201_v32 = vpack.c.bf16 %v193_v30, %v193_v30  ;;  %v6742_v2 = vld [vmem:[#allocation2 + $0x3e4] ss:$16 sps:$4 sm:$0xff]  }
  0xe9   :  { %1781 = vmatpush1.bf16.msra.mxu0 %v6606_v34  ;;  %1945 = vmatpush1.bf16.msra.mxu1 %v6607_v35  ;;  %v6694_v34 = vld [vmem:[#allocation2 + $0x2e4] ss:$16 sps:$4 sm:$0xff]   ;;  %v6697_v35 = vld [vmem:[#allocation2 + $0x2ec] ss:$16 sps:$4 sm:$0xff]  }
  0xea   :  { %1782 = vmatprep.subr.bf16.mxu0 %v6608_v36  ;;  %1946 = vmatprep.subr.bf16.mxu1 %v6610_v37  ;;  %v6692_v36 = vld [vmem:[#allocation2 + $0x2e0] ss:$16 sps:$4 sm:$0xff]   ;;  %v6695_v37 = vld [vmem:[#allocation2 + $0x2e8] ss:$16 sps:$4 sm:$0xff]   ;;  %v6778_v30 = vld [vmem:[#allocation2 + $0x4a4] ss:$16 sps:$4 sm:$0xff]  }
  0xed   :  { %1783 = vmatpush1.bf16.msra.mxu0 %v6612_v38  ;;  %1947 = vmatpush1.bf16.msra.mxu1 %v6613_v39  ;;  %v6700_v38 = vld [vmem:[#allocation2 + $0x304] ss:$16 sps:$4 sm:$0xff]   ;;  %v6703_v39 = vld [vmem:[#allocation2 + $0x30c] ss:$16 sps:$4 sm:$0xff]  }
  0xee   :  { %1784 = vmatprep.subr.bf16.mxu0 %v6614_v40  ;;  %1948 = vmatprep.subr.bf16.mxu1 %v6616_v41  ;;  %v6698_v40 = vld [vmem:[#allocation2 + $0x300] ss:$16 sps:$4 sm:$0xff]   ;;  %v6701_v41 = vld [vmem:[#allocation2 + $0x308] ss:$16 sps:$4 sm:$0xff]  }
  0xf1   :  { %1785 = vmatpush1.bf16.msra.mxu0 %v6618_v42  ;;  %1949 = vmatpush1.bf16.msra.mxu1 %v6619_v43  ;;  %v6706_v42 = vld [vmem:[#allocation2 + $0x324] ss:$16 sps:$4 sm:$0xff]   ;;  %v6709_v43 = vld [vmem:[#allocation2 + $0x32c] ss:$16 sps:$4 sm:$0xff]  }
  0xf2   :  { %1786 = vmatprep.subr.bf16.mxu0 %v6620_v44  ;;  %1950 = vmatprep.subr.bf16.mxu1 %v6622_v45  ;;  %v6704_v44 = vld [vmem:[#allocation2 + $0x320] ss:$16 sps:$4 sm:$0xff]   ;;  %v6707_v45 = vld [vmem:[#allocation2 + $0x328] ss:$16 sps:$4 sm:$0xff]  }
  0xf5   :  { %1787 = vmatpush1.bf16.msra.mxu0 %v6624_v47  ;;  %1951 = vmatpush1.bf16.msra.mxu1 %v6625_v49  ;;  %v6715_v47 = vld [vmem:[#allocation2 + $0x34c] ss:$16 sps:$4 sm:$0xff]   ;;  %v6713_v49 = vld [vmem:[#allocation2 + $0x348] ss:$16 sps:$4 sm:$0xff]  }
  0xf6   :  { %1788 = vmatprep.subr.bf16.mxu0 %v6626_v50  ;;  %1952 = vmatprep.subr.bf16.mxu1 %v6628_v51  ;;  %v6718_v50 = vld [vmem:[#allocation2 + $0x364] ss:$16 sps:$4 sm:$0xff]   ;;  %v6721_v51 = vld [vmem:[#allocation2 + $0x36c] ss:$16 sps:$4 sm:$0xff]  }
  0xf9   :  { %1789 = vmatpush1.bf16.msra.mxu0 %v6630_v52  ;;  %1953 = vmatpush1.bf16.msra.mxu1 %v6631_v53  ;;  %v6716_v52 = vld [vmem:[#allocation2 + $0x360] ss:$16 sps:$4 sm:$0xff]   ;;  %v6719_v53 = vld [vmem:[#allocation2 + $0x368] ss:$16 sps:$4 sm:$0xff]  }
  0xfa   :  { %1790 = vmatprep.subr.bf16.mxu0 %v6632_v54  ;;  %1954 = vmatprep.subr.bf16.mxu1 %v6634_v55  ;;  %v6724_v54 = vld [vmem:[#allocation2 + $0x384] ss:$16 sps:$4 sm:$0xff]   ;;  %v6727_v55 = vld [vmem:[#allocation2 + $0x38c] ss:$16 sps:$4 sm:$0xff]  }
  0xfd   :  { %1791 = vmatpush1.bf16.msra.mxu0 %v6636_v56  ;;  %1955 = vmatpush1.bf16.msra.mxu1 %v6637_v57  ;;  %v6722_v56 = vld [vmem:[#allocation2 + $0x380] ss:$16 sps:$4 sm:$0xff]   ;;  %v6725_v57 = vld [vmem:[#allocation2 + $0x388] ss:$16 sps:$4 sm:$0xff]  }
  0xfe   :  { %1792 = vmatprep.subr.bf16.mxu0 %v6638_v58  ;;  %1956 = vmatprep.subr.bf16.mxu1 %v6640_v59  ;;  %v6730_v58 = vld [vmem:[#allocation2 + $0x3a4] ss:$16 sps:$4 sm:$0xff]   ;;  %v6733_v59 = vld [vmem:[#allocation2 + $0x3ac] ss:$16 sps:$4 sm:$0xff]  }
 0x101   :  { %1793 = vmatpush1.bf16.msra.mxu0 %v6642_v60  ;;  %1957 = vmatpush1.bf16.msra.mxu1 %v6643_v61  ;;  %v6728_v60 = vld [vmem:[#allocation2 + $0x3a0] ss:$16 sps:$4 sm:$0xff]   ;;  %v6731_v61 = vld [vmem:[#allocation2 + $0x3a8] ss:$16 sps:$4 sm:$0xff]  }
 0x102   :  { %1794 = vmatprep.subr.bf16.mxu0 %v6644_v62  ;;  %1958 = vmatprep.subr.bf16.mxu1 %v6646_v63  ;;  %v6736_v62 = vld [vmem:[#allocation2 + $0x3c4] ss:$16 sps:$4 sm:$0xff]   ;;  %v6739_v63 = vld [vmem:[#allocation2 + $0x3cc] ss:$16 sps:$4 sm:$0xff]  }
 0x105   :  { %1795 = vmatpush1.bf16.msra.mxu0 %v6648_v0  ;;  %1959 = vmatpush1.bf16.msra.mxu1 %v6649_v1  ;;  %v6734_v0 = vld [vmem:[#allocation2 + $0x3c0] ss:$16 sps:$4 sm:$0xff]   ;;  %v6737_v1 = vld [vmem:[#allocation2 + $0x3c8] ss:$16 sps:$4 sm:$0xff]  }
 0x106   :  { %1805 = vmatprep.subr.bf16.mxu0 %v6652_v3  ;;  %1969 = vmatprep.subr.bf16.mxu1 %v6655_v4  ;;  %v6745_v3 = vld [vmem:[#allocation2 + $0x3ec] ss:$16 sps:$4 sm:$0xff]   ;;  %v6740_v4 = vld [vmem:[#allocation2 + $0x3e0] ss:$16 sps:$4 sm:$0xff]  }
 0x108   :  { %1797 = vmatmul.mubr.bf16.vlgmr.msra.gmra.mrb[0].mxu0 %v198_v5  ;;  %1961 = vmatmul.mubr.bf16.vlgmr.msra.gmra.mrb[0].mxu1 %v198_v5  ;;  %v6743_v5 = vld [vmem:[#allocation2 + $0x3e8] ss:$16 sps:$4 sm:$0xff]  }
 0x109   :  { %1806 = vmatpush1.bf16.msra.mxu0 %v6650_v6  ;;  %1970 = vmatpush1.bf16.msra.mxu1 %v6653_v7  ;;  %v6748_v6 = vld [vmem:[#allocation2 + $0x404] ss:$16 sps:$4 sm:$0xff]  }
 0x10a   :  { %1807 = vmatprep.subr.bf16.mxu0 %v6658_v8  ;;  %1971 = vmatprep.subr.bf16.mxu1 %v6661_v9  ;;  %v192_v7 = vld [vmem:[%s8192_s5 + $0x10] sm:$0xff]  ;;  %v6751_v8 = vld [vmem:[#allocation2 + $0x40c] ss:$16 sps:$4 sm:$0xff]  }
 0x10b   :  { %1837 = vmatprep.mubr.bf16.mxu0 %v201_v32  ;;  %2001 = vmatprep.mubr.bf16.mxu1 %v201_v32  ;;  %v6746_v9 = vld [vmem:[#allocation2 + $0x400] ss:$16 sps:$4 sm:$0xff]  }
 0x10c   :  { %v6776_v32 = vld [vmem:[#allocation2 + $0x4a0] ss:$16 sps:$4 sm:$0xff]  }
 0x10d   :  { %1808 = vmatpush1.bf16.msra.mxu0 %v6656_v10  ;;  %1972 = vmatpush1.bf16.msra.mxu1 %v6659_v11  ;;  %v6749_v10 = vld [vmem:[#allocation2 + $0x408] ss:$16 sps:$4 sm:$0xff]   ;;  %v200_v11 = vpack.c.bf16 %v192_v7, %v192_v7  ;;  %v6841_v7 = vld [vmem:[#allocation2 + $0x5ec] ss:$16 sps:$4 sm:$0xff]  }
 0x10e   :  { %1809 = vmatprep.subr.bf16.mxu0 %v6664_v12  ;;  %1973 = vmatprep.subr.bf16.mxu1 %v6667_v13  ;;  %v6754_v12 = vld [vmem:[#allocation2 + $0x424] ss:$16 sps:$4 sm:$0xff]   ;;  %v6757_v13 = vld [vmem:[#allocation2 + $0x42c] ss:$16 sps:$4 sm:$0xff]  }
 0x111   :  { %1810 = vmatpush1.bf16.msra.mxu0 %v6662_v14  ;;  %1974 = vmatpush1.bf16.msra.mxu1 %v6665_v15  ;;  %v195_v14 = vld [vmem:[%s8192_s5 + $0x28] sm:$0xff] }
 0x112   :  { %1811 = vmatprep.subr.bf16.mxu0 %v6670_v16  ;;  %1975 = vmatprep.subr.bf16.mxu1 %v6673_v17  ;;  %v203_v15 = vpack.c.bf16 %v195_v14, %v195_v14  ;;  %v6752_v16 = vld [vmem:[#allocation2 + $0x420] ss:$16 sps:$4 sm:$0xff]   ;;  %v6755_v17 = vld [vmem:[#allocation2 + $0x428] ss:$16 sps:$4 sm:$0xff]  }
 0x113   :  { %v6842_v14 = vld [vmem:[#allocation2 + $0x600] ss:$16 sps:$4 sm:$0xff]  }
 0x115   :  { %1812 = vmatpush1.bf16.msra.mxu0 %v6668_v18  ;;  %1976 = vmatpush1.bf16.msra.mxu1 %v6671_v19  ;;  %v6760_v18 = vld [vmem:[#allocation2 + $0x444] ss:$16 sps:$4 sm:$0xff]   ;;  %v6763_v19 = vld [vmem:[#allocation2 + $0x44c] ss:$16 sps:$4 sm:$0xff]  }
 0x116   :  { %1813 = vmatprep.subr.bf16.mxu0 %v6676_v20  ;;  %1977 = vmatprep.subr.bf16.mxu1 %v6679_v21  ;;  %v6758_v20 = vld [vmem:[#allocation2 + $0x440] ss:$16 sps:$4 sm:$0xff]   ;;  %v6761_v21 = vld [vmem:[#allocation2 + $0x448] ss:$16 sps:$4 sm:$0xff]  }
 0x119   :  { %1814 = vmatpush1.bf16.msra.mxu0 %v6674_v22  ;;  %1978 = vmatpush1.bf16.msra.mxu1 %v6677_v23  ;;  %v6766_v22 = vld [vmem:[#allocation2 + $0x464] ss:$16 sps:$4 sm:$0xff]   ;;  %v6769_v23 = vld [vmem:[#allocation2 + $0x46c] ss:$16 sps:$4 sm:$0xff]  }
 0x11a   :  { %1815 = vmatprep.subr.bf16.mxu0 %v6682_v24  ;;  %1979 = vmatprep.subr.bf16.mxu1 %v6685_v25  ;;  %v6764_v24 = vld [vmem:[#allocation2 + $0x460] ss:$16 sps:$4 sm:$0xff]   ;;  %v6767_v25 = vld [vmem:[#allocation2 + $0x468] ss:$16 sps:$4 sm:$0xff]  }
 0x11d   :  { %1816 = vmatpush1.bf16.msra.mxu0 %v6680_v26  ;;  %1980 = vmatpush1.bf16.msra.mxu1 %v6683_v27  ;;  %v6772_v26 = vld [vmem:[#allocation2 + $0x484] ss:$16 sps:$4 sm:$0xff]   ;;  %v6775_v27 = vld [vmem:[#allocation2 + $0x48c] ss:$16 sps:$4 sm:$0xff]  }
 0x11e   :  { %1817 = vmatprep.subr.bf16.mxu0 %v6688_v28  ;;  %1981 = vmatprep.subr.bf16.mxu1 %v6691_v29  ;;  %v6770_v28 = vld [vmem:[#allocation2 + $0x480] ss:$16 sps:$4 sm:$0xff]   ;;  %v6773_v29 = vld [vmem:[#allocation2 + $0x488] ss:$16 sps:$4 sm:$0xff]  }
 0x121   :  { %1818 = vmatpush1.bf16.msra.mxu0 %v6686_v31  ;;  %1982 = vmatpush1.bf16.msra.mxu1 %v6689_v33  ;;  %v6781_v31 = vld [vmem:[#allocation2 + $0x4ac] ss:$16 sps:$4 sm:$0xff]   ;;  %v6779_v33 = vld [vmem:[#allocation2 + $0x4a8] ss:$16 sps:$4 sm:$0xff]  }
 0x122   :  { %1819 = vmatprep.subr.bf16.mxu0 %v6694_v34  ;;  %1983 = vmatprep.subr.bf16.mxu1 %v6697_v35  ;;  %v6784_v34 = vld [vmem:[#allocation2 + $0x4c4] ss:$16 sps:$4 sm:$0xff]   ;;  %v6787_v35 = vld [vmem:[#allocation2 + $0x4cc] ss:$16 sps:$4 sm:$0xff]  }
 0x125   :  { %1820 = vmatpush1.bf16.msra.mxu0 %v6692_v36  ;;  %1984 = vmatpush1.bf16.msra.mxu1 %v6695_v37  ;;  %v6782_v36 = vld [vmem:[#allocation2 + $0x4c0] ss:$16 sps:$4 sm:$0xff]   ;;  %v6785_v37 = vld [vmem:[#allocation2 + $0x4c8] ss:$16 sps:$4 sm:$0xff]  }
 0x126   :  { %1821 = vmatprep.subr.bf16.mxu0 %v6700_v38  ;;  %1985 = vmatprep.subr.bf16.mxu1 %v6703_v39  ;;  %v6790_v38 = vld [vmem:[#allocation2 + $0x4e4] ss:$16 sps:$4 sm:$0xff]   ;;  %v6793_v39 = vld [vmem:[#allocation2 + $0x4ec] ss:$16 sps:$4 sm:$0xff]  }
 0x129   :  { %1822 = vmatpush1.bf16.msra.mxu0 %v6698_v40  ;;  %1986 = vmatpush1.bf16.msra.mxu1 %v6701_v41  ;;  %v6788_v40 = vld [vmem:[#allocation2 + $0x4e0] ss:$16 sps:$4 sm:$0xff]   ;;  %v6791_v41 = vld [vmem:[#allocation2 + $0x4e8] ss:$16 sps:$4 sm:$0xff]  }
 0x12a   :  { %1823 = vmatprep.subr.bf16.mxu0 %v6706_v42  ;;  %1987 = vmatprep.subr.bf16.mxu1 %v6709_v43  ;;  %v6796_v42 = vld [vmem:[#allocation2 + $0x504] ss:$16 sps:$4 sm:$0xff]   ;;  %v6799_v43 = vld [vmem:[#allocation2 + $0x50c] ss:$16 sps:$4 sm:$0xff]  }
 0x12d   :  { %1824 = vmatpush1.bf16.msra.mxu0 %v6704_v44  ;;  %1988 = vmatpush1.bf16.msra.mxu1 %v6707_v45  ;;  %v6794_v44 = vld [vmem:[#allocation2 + $0x500] ss:$16 sps:$4 sm:$0xff]   ;;  %v6797_v45 = vld [vmem:[#allocation2 + $0x508] ss:$16 sps:$4 sm:$0xff]  }
 0x12e   :  { %1825 = vmatprep.subr.bf16.mxu0 %v6712_v46  ;;  %1989 = vmatprep.subr.bf16.mxu1 %v6715_v47  ;;  %v6802_v46 = vld [vmem:[#allocation2 + $0x524] ss:$16 sps:$4 sm:$0xff]   ;;  %v6805_v47 = vld [vmem:[#allocation2 + $0x52c] ss:$16 sps:$4 sm:$0xff]  }
 0x131   :  { %1826 = vmatpush1.bf16.msra.mxu0 %v6710_v48  ;;  %1990 = vmatpush1.bf16.msra.mxu1 %v6713_v49  ;;  %v6800_v48 = vld [vmem:[#allocation2 + $0x520] ss:$16 sps:$4 sm:$0xff]   ;;  %v6803_v49 = vld [vmem:[#allocation2 + $0x528] ss:$16 sps:$4 sm:$0xff]  }
 0x132   :  { %1827 = vmatprep.subr.bf16.mxu0 %v6718_v50  ;;  %1991 = vmatprep.subr.bf16.mxu1 %v6721_v51  ;;  %v6808_v50 = vld [vmem:[#allocation2 + $0x544] ss:$16 sps:$4 sm:$0xff]   ;;  %v6811_v51 = vld [vmem:[#allocation2 + $0x54c] ss:$16 sps:$4 sm:$0xff]  }
 0x135   :  { %1828 = vmatpush1.bf16.msra.mxu0 %v6716_v52  ;;  %1992 = vmatpush1.bf16.msra.mxu1 %v6719_v53  ;;  %v6806_v52 = vld [vmem:[#allocation2 + $0x540] ss:$16 sps:$4 sm:$0xff]   ;;  %v6809_v53 = vld [vmem:[#allocation2 + $0x548] ss:$16 sps:$4 sm:$0xff]  }
 0x136   :  { %1829 = vmatprep.subr.bf16.mxu0 %v6724_v54  ;;  %1993 = vmatprep.subr.bf16.mxu1 %v6727_v55  ;;  %v6814_v54 = vld [vmem:[#allocation2 + $0x564] ss:$16 sps:$4 sm:$0xff]   ;;  %v6817_v55 = vld [vmem:[#allocation2 + $0x56c] ss:$16 sps:$4 sm:$0xff]  }
 0x139   :  { %1830 = vmatpush1.bf16.msra.mxu0 %v6722_v56  ;;  %1994 = vmatpush1.bf16.msra.mxu1 %v6725_v57  ;;  %v6812_v56 = vld [vmem:[#allocation2 + $0x560] ss:$16 sps:$4 sm:$0xff]   ;;  %v6815_v57 = vld [vmem:[#allocation2 + $0x568] ss:$16 sps:$4 sm:$0xff]  }
 0x13a   :  { %1831 = vmatprep.subr.bf16.mxu0 %v6730_v58  ;;  %1995 = vmatprep.subr.bf16.mxu1 %v6733_v59  ;;  %v6820_v58 = vld [vmem:[#allocation2 + $0x584] ss:$16 sps:$4 sm:$0xff]   ;;  %v6823_v59 = vld [vmem:[#allocation2 + $0x58c] ss:$16 sps:$4 sm:$0xff]  }
 0x13d   :  { %1832 = vmatpush1.bf16.msra.mxu0 %v6728_v60  ;;  %1996 = vmatpush1.bf16.msra.mxu1 %v6731_v61  ;;  %v6818_v60 = vld [vmem:[#allocation2 + $0x580] ss:$16 sps:$4 sm:$0xff]   ;;  %v6821_v61 = vld [vmem:[#allocation2 + $0x588] ss:$16 sps:$4 sm:$0xff]  }
 0x13e   :  { %1833 = vmatprep.subr.bf16.mxu0 %v6736_v62  ;;  %1997 = vmatprep.subr.bf16.mxu1 %v6739_v63  ;;  %v6826_v62 = vld [vmem:[#allocation2 + $0x5a4] ss:$16 sps:$4 sm:$0xff]   ;;  %v6829_v63 = vld [vmem:[#allocation2 + $0x5ac] ss:$16 sps:$4 sm:$0xff]  }
 0x141   :  { %1834 = vmatpush1.bf16.msra.mxu0 %v6734_v0  ;;  %1998 = vmatpush1.bf16.msra.mxu1 %v6737_v1  ;;  %v6824_v0 = vld [vmem:[#allocation2 + $0x5a0] ss:$16 sps:$4 sm:$0xff]   ;;  %v6827_v1 = vld [vmem:[#allocation2 + $0x5a8] ss:$16 sps:$4 sm:$0xff]  }
 0x142   :  { %1835 = vmatprep.subr.bf16.mxu0 %v6742_v2  ;;  %1999 = vmatprep.subr.bf16.mxu1 %v6745_v3  ;;  %v6832_v2 = vld [vmem:[#allocation2 + $0x5c4] ss:$16 sps:$4 sm:$0xff]   ;;  %v6835_v3 = vld [vmem:[#allocation2 + $0x5cc] ss:$16 sps:$4 sm:$0xff]  }
 0x145   :  { %1836 = vmatpush1.bf16.msra.mxu0 %v6740_v4  ;;  %2000 = vmatpush1.bf16.msra.mxu1 %v6743_v5  ;;  %v6830_v4 = vld [vmem:[#allocation2 + $0x5c0] ss:$16 sps:$4 sm:$0xff]   ;;  %v6833_v5 = vld [vmem:[#allocation2 + $0x5c8] ss:$16 sps:$4 sm:$0xff]  }
 0x146   :  { %1846 = vmatprep.subr.bf16.mxu0 %v6748_v6  ;;  %2010 = vmatprep.subr.bf16.mxu1 %v6751_v8  ;;  %v6838_v6 = vld [vmem:[#allocation2 + $0x5e4] ss:$16 sps:$4 sm:$0xff]   ;;  %v6836_v8 = vld [vmem:[#allocation2 + $0x5e0] ss:$16 sps:$4 sm:$0xff]  }
 0x148   :  { %1838 = vmatmul.mubr.bf16.vlgmr.msra.gmra.mrb[0].mxu0 %v200_v11  ;;  %2002 = vmatmul.mubr.bf16.vlgmr.msra.gmra.mrb[0].mxu1 %v200_v11  ;;  %v6844_v11 = vld [vmem:[#allocation2 + $0x604] ss:$16 sps:$4 sm:$0xff]  }
 0x149   :  { %1847 = vmatpush1.bf16.msra.mxu0 %v6746_v9  ;;  %2011 = vmatpush1.bf16.msra.mxu1 %v6749_v10  ;;  %v6839_v9 = vld [vmem:[#allocation2 + $0x5e8] ss:$16 sps:$4 sm:$0xff]   ;;  %v194_v10 = vld [vmem:[%s8192_s5 + $0x20] sm:$0xff] }
 0x14a   :  { %1848 = vmatprep.subr.bf16.mxu0 %v6754_v12  ;;  %2012 = vmatprep.subr.bf16.mxu1 %v6757_v13  ;;  %v6847_v12 = vld [vmem:[#allocation2 + $0x60c] ss:$16 sps:$4 sm:$0xff]  }
 0x14b   :  { %1878 = vmatprep.mubr.bf16.mxu0 %v203_v15  ;;  %2042 = vmatprep.mubr.bf16.mxu1 %v203_v15  ;;  %v197_v13 = vld [vmem:[%s8192_s5 + $0x38] sm:$0xff] }
 0x14c   :  { %v6845_v15 = vld [vmem:[#allocation2 + $0x608] ss:$16 sps:$4 sm:$0xff]  }
 0x14d   :  { %1849 = vmatpush1.bf16.msra.mxu0 %v6752_v16  ;;  %2013 = vmatpush1.bf16.msra.mxu1 %v6755_v17  ;;  %v202_v16 = vpack.c.bf16 %v194_v10, %v194_v10  ;;  %v6850_v17 = vld [vmem:[#allocation2 + $0x624] ss:$16 sps:$4 sm:$0xff]  }
 0x14e   :  { %1850 = vmatprep.subr.bf16.mxu0 %v6760_v18  ;;  %2014 = vmatprep.subr.bf16.mxu1 %v6763_v19  ;;  %v6853_v18 = vld [vmem:[#allocation2 + $0x62c] ss:$16 sps:$4 sm:$0xff]   ;;  %v6848_v19 = vld [vmem:[#allocation2 + $0x620] ss:$16 sps:$4 sm:$0xff]   ;;  %v6934_v10 = vld [vmem:[#allocation2 + $0x7e4] ss:$16 sps:$4 sm:$0xff]  }
 0x151   :  { %1851 = vmatpush1.bf16.msra.mxu0 %v6758_v20  ;;  %2015 = vmatpush1.bf16.msra.mxu1 %v6761_v21  ;;  %v6851_v20 = vld [vmem:[#allocation2 + $0x628] ss:$16 sps:$4 sm:$0xff]   ;;  %v205_v21 = vpack.c.bf16 %v197_v13, %v197_v13 }
 0x152   :  { %1852 = vmatprep.subr.bf16.mxu0 %v6766_v22  ;;  %2016 = vmatprep.subr.bf16.mxu1 %v6769_v23  ;;  %v6856_v22 = vld [vmem:[#allocation2 + $0x644] ss:$16 sps:$4 sm:$0xff]   ;;  %v6859_v23 = vld [vmem:[#allocation2 + $0x64c] ss:$16 sps:$4 sm:$0xff]   ;;  %v6935_v13 = vld [vmem:[#allocation2 + $0x7e8] ss:$16 sps:$4 sm:$0xff]  }
 0x155   :  { %1853 = vmatpush1.bf16.msra.mxu0 %v6764_v24  ;;  %2017 = vmatpush1.bf16.msra.mxu1 %v6767_v25  ;;  %v6854_v24 = vld [vmem:[#allocation2 + $0x640] ss:$16 sps:$4 sm:$0xff]   ;;  %v6857_v25 = vld [vmem:[#allocation2 + $0x648] ss:$16 sps:$4 sm:$0xff]  }
 0x156   :  { %1854 = vmatprep.subr.bf16.mxu0 %v6772_v26  ;;  %2018 = vmatprep.subr.bf16.mxu1 %v6775_v27  ;;  %v6862_v26 = vld [vmem:[#allocation2 + $0x664] ss:$16 sps:$4 sm:$0xff]   ;;  %v6865_v27 = vld [vmem:[#allocation2 + $0x66c] ss:$16 sps:$4 sm:$0xff]  }
 0x159   :  { %1855 = vmatpush1.bf16.msra.mxu0 %v6770_v28  ;;  %2019 = vmatpush1.bf16.msra.mxu1 %v6773_v29  ;;  %v6860_v28 = vld [vmem:[#allocation2 + $0x660] ss:$16 sps:$4 sm:$0xff]   ;;  %v6863_v29 = vld [vmem:[#allocation2 + $0x668] ss:$16 sps:$4 sm:$0xff]  }
 0x15a   :  { %1856 = vmatprep.subr.bf16.mxu0 %v6778_v30  ;;  %2020 = vmatprep.subr.bf16.mxu1 %v6781_v31  ;;  %v6868_v30 = vld [vmem:[#allocation2 + $0x684] ss:$16 sps:$4 sm:$0xff]   ;;  %v6871_v31 = vld [vmem:[#allocation2 + $0x68c] ss:$16 sps:$4 sm:$0xff]  }
 0x15d   :  { %1857 = vmatpush1.bf16.msra.mxu0 %v6776_v32  ;;  %2021 = vmatpush1.bf16.msra.mxu1 %v6779_v33  ;;  %v6866_v32 = vld [vmem:[#allocation2 + $0x680] ss:$16 sps:$4 sm:$0xff]   ;;  %v6869_v33 = vld [vmem:[#allocation2 + $0x688] ss:$16 sps:$4 sm:$0xff]  }
 0x15e   :  { %1858 = vmatprep.subr.bf16.mxu0 %v6784_v34  ;;  %2022 = vmatprep.subr.bf16.mxu1 %v6787_v35  ;;  %v6874_v34 = vld [vmem:[#allocation2 + $0x6a4] ss:$16 sps:$4 sm:$0xff]   ;;  %v6877_v35 = vld [vmem:[#allocation2 + $0x6ac] ss:$16 sps:$4 sm:$0xff]  }
 0x161   :  { %1859 = vmatpush1.bf16.msra.mxu0 %v6782_v36  ;;  %2023 = vmatpush1.bf16.msra.mxu1 %v6785_v37  ;;  %v6872_v36 = vld [vmem:[#allocation2 + $0x6a0] ss:$16 sps:$4 sm:$0xff]   ;;  %v6875_v37 = vld [vmem:[#allocation2 + $0x6a8] ss:$16 sps:$4 sm:$0xff]  }
 0x162   :  { %1860 = vmatprep.subr.bf16.mxu0 %v6790_v38  ;;  %2024 = vmatprep.subr.bf16.mxu1 %v6793_v39  ;;  %v6880_v38 = vld [vmem:[#allocation2 + $0x6c4] ss:$16 sps:$4 sm:$0xff]   ;;  %v6883_v39 = vld [vmem:[#allocation2 + $0x6cc] ss:$16 sps:$4 sm:$0xff]  }
 0x165   :  { %1861 = vmatpush1.bf16.msra.mxu0 %v6788_v40  ;;  %2025 = vmatpush1.bf16.msra.mxu1 %v6791_v41  ;;  %v6878_v40 = vld [vmem:[#allocation2 + $0x6c0] ss:$16 sps:$4 sm:$0xff]   ;;  %v6881_v41 = vld [vmem:[#allocation2 + $0x6c8] ss:$16 sps:$4 sm:$0xff]  }
 0x166   :  { %1862 = vmatprep.subr.bf16.mxu0 %v6796_v42  ;;  %2026 = vmatprep.subr.bf16.mxu1 %v6799_v43  ;;  %v6886_v42 = vld [vmem:[#allocation2 + $0x6e4] ss:$16 sps:$4 sm:$0xff]   ;;  %v6889_v43 = vld [vmem:[#allocation2 + $0x6ec] ss:$16 sps:$4 sm:$0xff]  }
 0x169   :  { %1863 = vmatpush1.bf16.msra.mxu0 %v6794_v44  ;;  %2027 = vmatpush1.bf16.msra.mxu1 %v6797_v45  ;;  %v6884_v44 = vld [vmem:[#allocation2 + $0x6e0] ss:$16 sps:$4 sm:$0xff]   ;;  %v6887_v45 = vld [vmem:[#allocation2 + $0x6e8] ss:$16 sps:$4 sm:$0xff]  }
 0x16a   :  { %1864 = vmatprep.subr.bf16.mxu0 %v6802_v46  ;;  %2028 = vmatprep.subr.bf16.mxu1 %v6805_v47  ;;  %v6892_v46 = vld [vmem:[#allocation2 + $0x704] ss:$16 sps:$4 sm:$0xff]   ;;  %v6895_v47 = vld [vmem:[#allocation2 + $0x70c] ss:$16 sps:$4 sm:$0xff]  }
 0x16d   :  { %1865 = vmatpush1.bf16.msra.mxu0 %v6800_v48  ;;  %2029 = vmatpush1.bf16.msra.mxu1 %v6803_v49  ;;  %v6890_v48 = vld [vmem:[#allocation2 + $0x700] ss:$16 sps:$4 sm:$0xff]   ;;  %v6893_v49 = vld [vmem:[#allocation2 + $0x708] ss:$16 sps:$4 sm:$0xff]  }
 0x16e   :  { %1866 = vmatprep.subr.bf16.mxu0 %v6808_v50  ;;  %2030 = vmatprep.subr.bf16.mxu1 %v6811_v51  ;;  %v6898_v50 = vld [vmem:[#allocation2 + $0x724] ss:$16 sps:$4 sm:$0xff]   ;;  %v6901_v51 = vld [vmem:[#allocation2 + $0x72c] ss:$16 sps:$4 sm:$0xff]  }
 0x171   :  { %1867 = vmatpush1.bf16.msra.mxu0 %v6806_v52  ;;  %2031 = vmatpush1.bf16.msra.mxu1 %v6809_v53  ;;  %v6896_v52 = vld [vmem:[#allocation2 + $0x720] ss:$16 sps:$4 sm:$0xff]   ;;  %v6899_v53 = vld [vmem:[#allocation2 + $0x728] ss:$16 sps:$4 sm:$0xff]  }
 0x172   :  { %1868 = vmatprep.subr.bf16.mxu0 %v6814_v54  ;;  %2032 = vmatprep.subr.bf16.mxu1 %v6817_v55  ;;  %v6904_v54 = vld [vmem:[#allocation2 + $0x744] ss:$16 sps:$4 sm:$0xff]   ;;  %v6907_v55 = vld [vmem:[#allocation2 + $0x74c] ss:$16 sps:$4 sm:$0xff]  }
 0x175   :  { %1869 = vmatpush1.bf16.msra.mxu0 %v6812_v56  ;;  %2033 = vmatpush1.bf16.msra.mxu1 %v6815_v57  ;;  %v6902_v56 = vld [vmem:[#allocation2 + $0x740] ss:$16 sps:$4 sm:$0xff]   ;;  %v6905_v57 = vld [vmem:[#allocation2 + $0x748] ss:$16 sps:$4 sm:$0xff]  }
 0x176   :  { %1870 = vmatprep.subr.bf16.mxu0 %v6820_v58  ;;  %2034 = vmatprep.subr.bf16.mxu1 %v6823_v59  ;;  %v6910_v58 = vld [vmem:[#allocation2 + $0x764] ss:$16 sps:$4 sm:$0xff]   ;;  %v6913_v59 = vld [vmem:[#allocation2 + $0x76c] ss:$16 sps:$4 sm:$0xff]  }
 0x179   :  { %1871 = vmatpush1.bf16.msra.mxu0 %v6818_v60  ;;  %2035 = vmatpush1.bf16.msra.mxu1 %v6821_v61  ;;  %v6908_v60 = vld [vmem:[#allocation2 + $0x760] ss:$16 sps:$4 sm:$0xff]   ;;  %v6911_v61 = vld [vmem:[#allocation2 + $0x768] ss:$16 sps:$4 sm:$0xff]  }
 0x17a   :  { %1872 = vmatprep.subr.bf16.mxu0 %v6826_v62  ;;  %2036 = vmatprep.subr.bf16.mxu1 %v6829_v63  ;;  %v6916_v62 = vld [vmem:[#allocation2 + $0x784] ss:$16 sps:$4 sm:$0xff]   ;;  %v6919_v63 = vld [vmem:[#allocation2 + $0x78c] ss:$16 sps:$4 sm:$0xff]  }
 0x17d   :  { %1873 = vmatpush1.bf16.msra.mxu0 %v6824_v0  ;;  %2037 = vmatpush1.bf16.msra.mxu1 %v6827_v1  ;;  %v6914_v0 = vld [vmem:[#allocation2 + $0x780] ss:$16 sps:$4 sm:$0xff]   ;;  %v6917_v1 = vld [vmem:[#allocation2 + $0x788] ss:$16 sps:$4 sm:$0xff]  }
 0x17e   :  { %1874 = vmatprep.subr.bf16.mxu0 %v6832_v2  ;;  %2038 = vmatprep.subr.bf16.mxu1 %v6835_v3  ;;  %v6922_v2 = vld [vmem:[#allocation2 + $0x7a4] ss:$16 sps:$4 sm:$0xff]   ;;  %v6925_v3 = vld [vmem:[#allocation2 + $0x7ac] ss:$16 sps:$4 sm:$0xff]  }
 0x181   :  { %1875 = vmatpush1.bf16.msra.mxu0 %v6830_v4  ;;  %2039 = vmatpush1.bf16.msra.mxu1 %v6833_v5  ;;  %v6920_v4 = vld [vmem:[#allocation2 + $0x7a0] ss:$16 sps:$4 sm:$0xff]   ;;  %v6923_v5 = vld [vmem:[#allocation2 + $0x7a8] ss:$16 sps:$4 sm:$0xff]  }
 0x182   :  { %1876 = vmatprep.subr.bf16.mxu0 %v6838_v6  ;;  %2040 = vmatprep.subr.bf16.mxu1 %v6841_v7  ;;  %v6928_v6 = vld [vmem:[#allocation2 + $0x7c4] ss:$16 sps:$4 sm:$0xff]   ;;  %v6931_v7 = vld [vmem:[#allocation2 + $0x7cc] ss:$16 sps:$4 sm:$0xff]  }
 0x185   :  { %1877 = vmatpush1.bf16.msra.mxu0 %v6836_v8  ;;  %2041 = vmatpush1.bf16.msra.mxu1 %v6839_v9  ;;  %v6926_v8 = vld [vmem:[#allocation2 + $0x7c0] ss:$16 sps:$4 sm:$0xff]   ;;  %v6929_v9 = vld [vmem:[#allocation2 + $0x7c8] ss:$16 sps:$4 sm:$0xff]  }
 0x186   :  { %1887 = vmatprep.subr.bf16.mxu0 %v6844_v11  ;;  %2051 = vmatprep.subr.bf16.mxu1 %v6847_v12  ;;  %v6937_v11 = vld [vmem:[#allocation2 + $0x7ec] ss:$16 sps:$4 sm:$0xff]   ;;  %v6932_v12 = vld [vmem:[#allocation2 + $0x7e0] ss:$16 sps:$4 sm:$0xff]  }
 0x188   :  { %1879 = vmatmul.mubr.bf16.vlgmr.msra.gmra.mrb[0].mxu0 %v202_v16  ;;  %2043 = vmatmul.mubr.bf16.vlgmr.msra.gmra.mrb[0].mxu1 %v202_v16 }
 0x189   :  { %1888 = vmatpush1.bf16.msra.mxu0 %v6842_v14  ;;  %2052 = vmatpush1.bf16.msra.mxu1 %v6845_v15  ;;  %v196_v14 = vld [vmem:[%s8192_s5 + $0x30] sm:$0xff]  ;;  %v6940_v15 = vld [vmem:[%s8165_s4 + $0x4] ss:$8 sps:$4 sm:$0xff]  }
 0x18a   :  { %1889 = vmatprep.subr.bf16.mxu0 %v6850_v17  ;;  %2053 = vmatprep.subr.bf16.mxu1 %v6853_v18  ;;  %v204_v16 = vpack.c.bf16 %v196_v14, %v196_v14  ;;  %v6938_v17 = vld [vmem:[%s8165_s4] ss:$8 sps:$4 sm:$0xff]   ;;  %v6943_v18 = vld [vmem:[%s8165_s4 + $0x14] ss:$8 sps:$4 sm:$0xff]  }
 0x18b   :  { %1919 = vmatprep.mubr.bf16.mxu0 %v205_v21  ;;  %2083 = vmatprep.mubr.bf16.mxu1 %v205_v21  ;;  %v6944_v21 = vld [vmem:[%s8165_s4 + $0x20] ss:$8 sps:$4 sm:$0xff]  }
 0x18d   :  { %1890 = vmatpush1.bf16.msra.mxu0 %v6848_v19  ;;  %2054 = vmatpush1.bf16.msra.mxu1 %v6851_v20  ;;  %v6941_v19 = vld [vmem:[%s8165_s4 + $0x10] ss:$8 sps:$4 sm:$0xff]   ;;  %v6946_v20 = vld [vmem:[%s8165_s4 + $0x24] ss:$8 sps:$4 sm:$0xff]  }
 0x18e   :  { %1891 = vmatprep.subr.bf16.mxu0 %v6856_v22  ;;  %2055 = vmatprep.subr.bf16.mxu1 %v6859_v23  ;;  %v6949_v22 = vld [vmem:[%s8165_s4 + $0x34] ss:$8 sps:$4 sm:$0xff]   ;;  %v6947_v23 = vld [vmem:[%s8165_s4 + $0x30] ss:$8 sps:$4 sm:$0xff]  }
 0x191   :  { %1892 = vmatpush1.bf16.msra.mxu0 %v6854_v24  ;;  %2056 = vmatpush1.bf16.msra.mxu1 %v6857_v25  ;;  %v6952_v24 = vld [vmem:[%s8165_s4 + $0x44] ss:$8 sps:$4 sm:$0xff]   ;;  %v6950_v25 = vld [vmem:[%s8165_s4 + $0x40] ss:$8 sps:$4 sm:$0xff]  }
 0x192   :  { %1893 = vmatprep.subr.bf16.mxu0 %v6862_v26  ;;  %2057 = vmatprep.subr.bf16.mxu1 %v6865_v27  ;;  %v6955_v26 = vld [vmem:[%s8165_s4 + $0x54] ss:$8 sps:$4 sm:$0xff]   ;;  %v6953_v27 = vld [vmem:[%s8165_s4 + $0x50] ss:$8 sps:$4 sm:$0xff]  }
 0x195   :  { %1894 = vmatpush1.bf16.msra.mxu0 %v6860_v28  ;;  %2058 = vmatpush1.bf16.msra.mxu1 %v6863_v29  ;;  %v6958_v28 = vld [vmem:[%s8165_s4 + $0x64] ss:$8 sps:$4 sm:$0xff]   ;;  %v6956_v29 = vld [vmem:[%s8165_s4 + $0x60] ss:$8 sps:$4 sm:$0xff]  }
 0x196   :  { %1895 = vmatprep.subr.bf16.mxu0 %v6868_v30  ;;  %2059 = vmatprep.subr.bf16.mxu1 %v6871_v31  ;;  %v6961_v30 = vld [vmem:[%s8165_s4 + $0x74] ss:$8 sps:$4 sm:$0xff]   ;;  %v6959_v31 = vld [vmem:[%s8165_s4 + $0x70] ss:$8 sps:$4 sm:$0xff]  }
 0x199   :  { %1896 = vmatpush1.bf16.msra.mxu0 %v6866_v32  ;;  %2060 = vmatpush1.bf16.msra.mxu1 %v6869_v33  ;;  %v6964_v32 = vld [vmem:[%s8165_s4 + $0x84] ss:$8 sps:$4 sm:$0xff]   ;;  %v6962_v33 = vld [vmem:[%s8165_s4 + $0x80] ss:$8 sps:$4 sm:$0xff]  }
 0x19a   :  { %1897 = vmatprep.subr.bf16.mxu0 %v6874_v34  ;;  %2061 = vmatprep.subr.bf16.mxu1 %v6877_v35  ;;  %v6967_v34 = vld [vmem:[%s8165_s4 + $0x94] ss:$8 sps:$4 sm:$0xff]   ;;  %v6965_v35 = vld [vmem:[%s8165_s4 + $0x90] ss:$8 sps:$4 sm:$0xff]  }
 0x19d   :  { %1898 = vmatpush1.bf16.msra.mxu0 %v6872_v36  ;;  %2062 = vmatpush1.bf16.msra.mxu1 %v6875_v37  ;;  %v6970_v36 = vld [vmem:[%s8165_s4 + $0xa4] ss:$8 sps:$4 sm:$0xff]   ;;  %v6968_v37 = vld [vmem:[%s8165_s4 + $0xa0] ss:$8 sps:$4 sm:$0xff]  }
 0x19e   :  { %1899 = vmatprep.subr.bf16.mxu0 %v6880_v38  ;;  %2063 = vmatprep.subr.bf16.mxu1 %v6883_v39  ;;  %v6973_v38 = vld [vmem:[%s8165_s4 + $0xb4] ss:$8 sps:$4 sm:$0xff]   ;;  %v6971_v39 = vld [vmem:[%s8165_s4 + $0xb0] ss:$8 sps:$4 sm:$0xff]  }
 0x1a1   :  { %1900 = vmatpush1.bf16.msra.mxu0 %v6878_v40  ;;  %2064 = vmatpush1.bf16.msra.mxu1 %v6881_v41  ;;  %v6976_v40 = vld [vmem:[%s8165_s4 + $0xc4] ss:$8 sps:$4 sm:$0xff]   ;;  %v6974_v41 = vld [vmem:[%s8165_s4 + $0xc0] ss:$8 sps:$4 sm:$0xff]  }
 0x1a2   :  { %1901 = vmatprep.subr.bf16.mxu0 %v6886_v42  ;;  %2065 = vmatprep.subr.bf16.mxu1 %v6889_v43  ;;  %v6979_v42 = vld [vmem:[%s8165_s4 + $0xd4] ss:$8 sps:$4 sm:$0xff]   ;;  %v6977_v43 = vld [vmem:[%s8165_s4 + $0xd0] ss:$8 sps:$4 sm:$0xff]  }
 0x1a5   :  { %1902 = vmatpush1.bf16.msra.mxu0 %v6884_v44  ;;  %2066 = vmatpush1.bf16.msra.mxu1 %v6887_v45  ;;  %v6982_v44 = vld [vmem:[%s8165_s4 + $0xe4] ss:$8 sps:$4 sm:$0xff]   ;;  %v6980_v45 = vld [vmem:[%s8165_s4 + $0xe0] ss:$8 sps:$4 sm:$0xff]  }
 0x1a6   :  { %1903 = vmatprep.subr.bf16.mxu0 %v6892_v46  ;;  %2067 = vmatprep.subr.bf16.mxu1 %v6895_v47  ;;  %v6985_v46 = vld [vmem:[%s8165_s4 + $0xf4] ss:$8 sps:$4 sm:$0xff]   ;;  %v6983_v47 = vld [vmem:[%s8165_s4 + $0xf0] ss:$8 sps:$4 sm:$0xff]  }
 0x1a9   :  { %1904 = vmatpush1.bf16.msra.mxu0 %v6890_v48  ;;  %2068 = vmatpush1.bf16.msra.mxu1 %v6893_v49  ;;  %v6988_v48 = vld [vmem:[%s8165_s4 + $0x104] ss:$8 sps:$4 sm:$0xff]   ;;  %v464_v49 = vlaneseq }
 0x1aa   :  { %1905 = vmatprep.subr.bf16.mxu0 %v6898_v50  ;;  %2069 = vmatprep.subr.bf16.mxu1 %v6901_v51 }
 0x1ab   :  { %v7887_v50 = vshrl.u32 %v464_v49, 7 }
 0x1ad   :  { %1906 = vmatpush1.bf16.msra.mxu0 %v6896_v52  ;;  %2070 = vmatpush1.bf16.msra.mxu1 %v6899_v53  ;;  %v7890_v51 = vsub.s32 0, %v7887_v50  ;;  %v7892_v52 = vld [vmem:[#allocation4] sm:$0xf]  ;;  %v7895_v53 = vsub.s32 1, %v7887_v50 }
 0x1ae   :  { %1907 = vmatprep.subr.bf16.mxu0 %v6904_v54  ;;  %2071 = vmatprep.subr.bf16.mxu1 %v6907_v55  ;;  %v7898_v54 = vsub.s32 3, %v7887_v50 }
 0x1af   :  { %v467_v55 = vrot.slane %v7892_v52, %v7890_v51 }
 0x1b1   :  { %1908 = vmatpush1.bf16.msra.mxu0 %v6902_v56  ;;  %2072 = vmatpush1.bf16.msra.mxu1 %v6905_v57  ;;  %v471_v56 = vrot.slane %v7892_v52, %v7895_v53  ;;  %v479_v57 = vrot.slane %v7892_v52, %v7898_v54 }
 0x1b2   :  { %1909 = vmatprep.subr.bf16.mxu0 %v6910_v58  ;;  %2073 = vmatprep.subr.bf16.mxu1 %v6913_v59 }
 0x1b5   :  { %1910 = vmatpush1.bf16.msra.mxu0 %v6908_v60  ;;  %2074 = vmatpush1.bf16.msra.mxu1 %v6911_v61 }
 0x1b6   :  { %1911 = vmatprep.subr.bf16.mxu0 %v6916_v62  ;;  %2075 = vmatprep.subr.bf16.mxu1 %v6919_v63 }
 0x1b9   :  { %1912 = vmatpush1.bf16.msra.mxu0 %v6914_v0  ;;  %2076 = vmatpush1.bf16.msra.mxu1 %v6917_v1 }
 0x1ba   :  { %1913 = vmatprep.subr.bf16.mxu0 %v6922_v2  ;;  %2077 = vmatprep.subr.bf16.mxu1 %v6925_v3 }
 0x1bd   :  { %1914 = vmatpush1.bf16.msra.mxu0 %v6920_v4  ;;  %2078 = vmatpush1.bf16.msra.mxu1 %v6923_v5 }
 0x1be   :  { %1915 = vmatprep.subr.bf16.mxu0 %v6928_v6  ;;  %2079 = vmatprep.subr.bf16.mxu1 %v6931_v7 }
 0x1c1   :  { %1916 = vmatpush1.bf16.msra.mxu0 %v6926_v8  ;;  %2080 = vmatpush1.bf16.msra.mxu1 %v6929_v9 }
 0x1c2   :  { %1917 = vmatprep.subr.bf16.mxu0 %v6934_v10  ;;  %2081 = vmatprep.subr.bf16.mxu1 %v6937_v11 }
 0x1c5   :  { %1918 = vmatpush1.bf16.msra.mxu0 %v6932_v12  ;;  %2082 = vmatpush1.bf16.msra.mxu1 %v6935_v13 }
 0x1c6   :  { %2532 = vmatprep.subr.bf16.mxu0 %v6940_v15 }
 0x1c8   :  { %1920 = vmatmul.mubr.bf16.vlgmr.msra.gmra.mrb[0].mxu0 %v204_v16  ;;  %2084 = vmatmul.mubr.bf16.vlgmr.msra.gmra.mrb[0].mxu1 %v204_v16 }
 0x1c9   :  { %2533 = vmatpush1.bf16.msra.mxu0 %v6938_v17 }
 0x1ca   :  { %2534 = vmatprep.subr.bf16.mxu0 %v6943_v18 }
 0x1cd   :  { %2535 = vmatpush1.bf16.msra.mxu0 %v6941_v19 }
 0x1ce   :  { %2536 = vmatprep.subr.bf16.mxu0 %v6946_v20 }
 0x1d1   :  { %2537 = vmatpush1.bf16.msra.mxu0 %v6944_v21 }
 0x1d2   :  { %2538 = vmatprep.subr.bf16.mxu0 %v6949_v22 }
 0x1d5   :  { %2539 = vmatpush1.bf16.msra.mxu0 %v6947_v23 }
 0x1d6   :  { %2540 = vmatprep.subr.bf16.mxu0 %v6952_v24 }
 0x1d9   :  { %2541 = vmatpush1.bf16.msra.mxu0 %v6950_v25 }
 0x1da   :  { %2542 = vmatprep.subr.bf16.mxu0 %v6955_v26 }
 0x1dd   :  { %2543 = vmatpush1.bf16.msra.mxu0 %v6953_v27 }
 0x1de   :  { %2544 = vmatprep.subr.bf16.mxu0 %v6958_v28 }
 0x1e1   :  { %2545 = vmatpush1.bf16.msra.mxu0 %v6956_v29 }
 0x1e2   :  { %2546 = vmatprep.subr.bf16.mxu0 %v6961_v30 }
 0x1e5   :  { %2547 = vmatpush1.bf16.msra.mxu0 %v6959_v31 }
 0x1e6   :  { %2548 = vmatprep.subr.bf16.mxu0 %v6964_v32 }
 0x1e9   :  { %2549 = vmatpush1.bf16.msra.mxu0 %v6962_v33  ;;  %v6986_v33 = vld [vmem:[%s8165_s4 + $0x100] ss:$8 sps:$4 sm:$0xff]  }
 0x1ea   :  { %2550 = vmatprep.subr.bf16.mxu0 %v6967_v34 }
 0x1ed   :  { %2551 = vmatpush1.bf16.msra.mxu0 %v6965_v35  ;;  %v6991_v35 = vld [vmem:[%s8165_s4 + $0x114] ss:$8 sps:$4 sm:$0xff]  }
 0x1ee   :  { %2552 = vmatprep.subr.bf16.mxu0 %v6970_v36 }
 0x1f1   :  { %2553 = vmatpush1.bf16.msra.mxu0 %v6968_v37  ;;  %v7915_v37 = vsub.s32 2, %v7887_v50 }
 0x1f2   :  { %2554 = vmatprep.subr.bf16.mxu0 %v6973_v38  ;;  %v6989_v38 = vld [vmem:[%s8165_s4 + $0x110] ss:$8 sps:$4 sm:$0xff]  }
 0x1f5   :  { %2555 = vmatpush1.bf16.msra.mxu0 %v6971_v39  ;;  %v6994_v39 = vld [vmem:[%s8165_s4 + $0x124] ss:$8 sps:$4 sm:$0xff]  }
 0x1f6   :  { %2556 = vmatprep.subr.bf16.mxu0 %v6976_v40  ;;  %v475_v40 = vrot.slane %v7892_v52, %v7915_v37  ;;  %v7001_v52 = vld [vmem:[%s8165_s4 + $0x150] ss:$8 sps:$4 sm:$0xff]  }
 0x1f9   :  { %2557 = vmatpush1.bf16.msra.mxu0 %v6974_v41  ;;  %v6992_v41 = vld [vmem:[%s8165_s4 + $0x120] ss:$8 sps:$4 sm:$0xff]  }
 0x1fa   :  { %2558 = vmatprep.subr.bf16.mxu0 %v6979_v42  ;;  %v6997_v42 = vld [vmem:[%s8165_s4 + $0x134] ss:$8 sps:$4 sm:$0xff]  }
 0x1fd   :  { %2559 = vmatpush1.bf16.msra.mxu0 %v6977_v43 }
 0x1fe   :  { %2560 = vmatprep.subr.bf16.mxu0 %v6982_v44  ;;  %v6995_v44 = vld [vmem:[%s8165_s4 + $0x130] ss:$8 sps:$4 sm:$0xff]  }
 0x201   :  { %2561 = vmatpush1.bf16.msra.mxu0 %v6980_v45  ;;  %v7000_v45 = vld [vmem:[%s8165_s4 + $0x144] ss:$8 sps:$4 sm:$0xff]  }
 0x202   :  { %2562 = vmatprep.subr.bf16.mxu0 %v6985_v46 }
 0x205   :  { %2563 = vmatpush1.bf16.msra.mxu0 %v6983_v47  ;;  %v6998_v47 = vld [vmem:[%s8165_s4 + $0x140] ss:$8 sps:$4 sm:$0xff]  }
 0x206   :  { %2573 = vmatprep.subr.bf16.mxu0 %v6988_v48  ;;  %v7003_v48 = vld [vmem:[%s8165_s4 + $0x154] ss:$8 sps:$4 sm:$0xff]  }
 0x29b   :  { %v1921_v58 = vpop.f32.mrb[0].mxu0  ;;  %v7906_v59 = vpop.f32.mrb[0].mxu1 }
 0x29c   :  { %v6474_v60 = vadd.f32 %v1921_v58, %v467_v55  ;;  %v1923_v61 = vpop.f32.mrb[1].mxu0  ;;  %v2087_v62 = vpop.f32.mrb[1].mxu1  ;;  %v6476_v43 = vadd.f32 %v7906_v59, %v475_v40  ;;  %v7006_v55 = vld [vmem:[%s8165_s4 + $0x164] ss:$8 sps:$4 sm:$0xff]   ;;  %v7009_v58 = vld [vmem:[%s8165_s4 + $0x174] ss:$8 sps:$4 sm:$0xff]  }
 0x29d   :  { %v6475_v63 = vadd.f32 %v1923_v61, %v471_v56  ;;  %v6477_v0 = vadd.f32 %v2087_v62, %v479_v57  ;;  %v1925_v1 = vpop.f32.mrb[2].mxu0  ;;  %v2089_v2 = vpop.f32.mrb[2].mxu1  ;;  %v7004_v57 = vld [vmem:[%s8165_s4 + $0x160] ss:$8 sps:$4 sm:$0xff]   ;;  %v7007_v59 = vld [vmem:[%s8165_s4 + $0x170] ss:$8 sps:$4 sm:$0xff]  }
 0x29e   :  { %v2092_v3 = vand.u32 2147483647, %v6474_v60  ;;  %v1926_v7 = vpop.f32.mrb[3].mxu0  ;;  %v2090_v8 = vpop.f32.mrb[3].mxu1  ;;  %vm2108_vm0 = vcmp.ge.f32.partialorder %v6474_v60, 0.0  ;;  %vm2110_vm3 = vcmp.ge.f32.partialorder %v6476_v43, 0.0 }
 0x29f   :  { %v2093_v4 = vand.u32 2147483647, %v6475_v63  ;;  %v2095_v5 = vand.u32 2147483647, %v6477_v0  ;;  %vm2109_vm1 = vcmp.ge.f32.partialorder %v6475_v63, 0.0  ;;  %vm2111_vm2 = vcmp.ge.f32.partialorder %v6477_v0, 0.0 }
 0x2a0   :  { %v2096_v6 = vsub.f32 0.0, %v2092_v3  ;;  %v2094_v46 = vand.u32 2147483647, %v6476_v43  ;;  %v7010_v61 = vld [vmem:[%s8165_s4 + $0x180] ss:$8 sps:$4 sm:$0xff]  }
 0x2a1   :  { %v2097_v9 = vsub.f32 0.0, %v2093_v4  ;;  %v2099_v10 = vsub.f32 0.0, %v2095_v5  ;;  %v7015_v62 = vld [vmem:[%s8165_s4 + $0x194] ss:$8 sps:$4 sm:$0xff]   ;;  %v7018_v1 = vld [vmem:[%s8165_s4 + $0x1a4] ss:$8 sps:$4 sm:$0xff]  }
 0x2a2   :  { %v2100_v11 = vmul.f32 1.442695, %v2096_v6  ;;  %v2098_v49 = vsub.f32 0.0, %v2094_v46  ;;  %v7016_v3 = vld [vmem:[%s8165_s4 + $0x1a0] ss:$8 sps:$4 sm:$0xff]  }
 0x2a3   :  { %v2102_v12 = vmul.f32 1.442695, %v2097_v9  ;;  %v2106_v13 = vmul.f32 1.442695, %v2099_v10  ;;  %v7021_v4 = vld [vmem:[%s8165_s4 + $0x1b4] ss:$8 sps:$4 sm:$0xff]  }
 0x2a4   :  { %7180 = vpow2.f32 %v2100_v11  ;;  %v2104_v56 = vmul.f32 1.442695, %v2098_v49  ;;  %v7019_v5 = vld [vmem:[%s8165_s4 + $0x1b0] ss:$8 sps:$4 sm:$0xff]   ;;  %v7024_v6 = vld [vmem:[%s8165_s4 + $0x1c4] ss:$8 sps:$4 sm:$0xff]  }
 0x2a5   :  { %7182 = vpow2.f32 %v2102_v12  ;;  %v7022_v7 = vld [vmem:[%s8165_s4 + $0x1c0] ss:$8 sps:$4 sm:$0xff]   ;;  %v7027_v8 = vld [vmem:[%s8165_s4 + $0x1d4] ss:$8 sps:$4 sm:$0xff]   ;;  %v7025_v9 = vld [vmem:[%s8165_s4 + $0x1d0] ss:$8 sps:$4 sm:$0xff]  }
 0x2a6   :  { %7184 = vpow2.f32 %v2106_v13  ;;  %v7030_v10 = vld [vmem:[%s8165_s4 + $0x1e4] ss:$8 sps:$4 sm:$0xff]   ;;  %v7028_v13 = vld [vmem:[%s8165_s4 + $0x1e0] ss:$8 sps:$4 sm:$0xff]  }
 0x2ae   :  { %v7181_v14 = vpop.eup %7180 }
 0x2af   :  { %v2116_v15 = vadd.f32 1.0, %v7181_v14  ;;  %v7183_v16 = vpop.eup %7182  ;;  %v2112_v21 = vsel %vm2108_vm0, 1.0, %v7181_v14 }
 0x2b0   :  { %v7185_v17 = vpop.eup %7184  ;;  %v2117_v18 = vadd.f32 1.0, %v7183_v16  ;;  %v2113_v24 = vsel %vm2109_vm1, 1.0, %v7183_v16  ;;  %v7031_v16 = vld [vmem:[%s8165_s4 + $0x1f0] ss:$8 sps:$4 sm:$0xff]  }
 0x2b1   :  { %7186 = vrcp.f32 %v2116_v15  ;;  %v2119_v19 = vadd.f32 1.0, %v7185_v17  ;;  %v2115_v26 = vsel %vm2111_vm2, 1.0, %v7185_v17  ;;  %v7033_v15 = vld [vmem:[%s8165_s4 + $0x1f4] ss:$8 sps:$4 sm:$0xff]  }
 0x2b2   :  { %7188 = vrcp.f32 %v2117_v18 }
 0x2b3   :  { %7190 = vrcp.f32 %v2119_v19  ;;  %v7034_v19 = vld [vmem:[#allocation7 + $0x40] sm:$0xff]  }
 0x2b4   :  { %7192 = vpow2.f32 %v2104_v56  ;;  %6412 = vmatprep.subr.bf16.mxu1 %v7034_v19 }
 0x2bb   :  { %v7187_v20 = vpop.eup %7186 }
 0x2bc   :  { %v2124_v22 = vmul.f32 %v7187_v20, %v2112_v21  ;;  %v7189_v23 = vpop.eup %7188  ;;  %v7035_v20 = vld [vmem:[#allocation7] sm:$0xff]   ;;  %v7036_v21 = vld [vmem:[#allocation7 + $0x48] sm:$0xff]  }
 0x2bd   :  { %v7191_v25 = vpop.eup %7190  ;;  %v2125_v27 = vmul.f32 %v7189_v23, %v2113_v24  ;;  %6413 = vmatpush3.bf16.msra.mxu1 %v7035_v20  ;;  %v7038_v23 = vld [vmem:[#allocation7 + $0x50] sm:$0xff]  }
 0x2be   :  { %v2128_v28 = vmul.f32 %v6474_v60, %v2124_v22  ;;  %v2127_v29 = vmul.f32 %v7191_v25, %v2115_v26  ;;  %v7012_v60 = vld [vmem:[%s8165_s4 + $0x184] ss:$8 sps:$4 sm:$0xff]   ;;  %6414 = vmatprep.subr.bf16.mxu1 %v7036_v21  ;;  %v7039_v24 = vld [vmem:[#allocation7 + $0x10] sm:$0xff]  }
 0x2bf   :  { %v2129_v30 = vmul.f32 %v6475_v63, %v2125_v27  ;;  %v7013_v63 = vld [vmem:[%s8165_s4 + $0x190] ss:$8 sps:$4 sm:$0xff]   ;;  %v7040_v25 = vld [vmem:[#allocation7 + $0x58] sm:$0xff]   ;;  %v7042_v27 = vld [vmem:[#allocation7 + $0x60] sm:$0xff]  }
 0x2c0   :  { %v2131_v31 = vmul.f32 %v6477_v0, %v2127_v29  ;;  %v2132_v34 = vpack.c.bf16 %v2128_v28, %v2128_v28  ;;  %v7193_v0 = vpop.eup %7192  ;;  %v7037_v22 = vld [vmem:[#allocation7 + $0x8] sm:$0xff]   ;;  %v7041_v26 = vld [vmem:[#allocation7 + $0x18] sm:$0xff]   ;;  %v7043_v28 = vld [vmem:[#allocation7 + $0x20] sm:$0xff]  }
 0x2c1   :  { %v2133_v32 = vpack.c.bf16 %v2129_v30, %v2129_v30  ;;  %v2118_v2 = vadd.f32 1.0, %v7193_v0  ;;  %v2114_v12 = vsel %vm2110_vm3, 1.0, %v7193_v0  ;;  %6415 = vmatpush3.bf16.msra.mxu1 %v7037_v22  ;;  %v7044_v29 = vld [vmem:[#allocation7 + $0x68] sm:$0xff]  }
 0x2c2   :  { %v2135_v36 = vpack.c.bf16 %v2131_v31, %v2131_v31  ;;  %6416 = vmatprep.subr.bf16.mxu1 %v7038_v23  ;;  %v7045_v30 = vld [vmem:[#allocation7 + $0x28] sm:$0xff]   ;;  %v7046_v31 = vld [vmem:[#allocation7 + $0x70] sm:$0xff]  }
 0x2c3   :  { %2564 = vmatprep.mubr.bf16.mxu0 %v2133_v32  ;;  %7194 = vrcp.f32 %v2118_v2  ;;  %v7047_v32 = vld [vmem:[#allocation7 + $0x30] sm:$0xff]  }
 0x2c4   :  { %2565 = vmatmul.mubr.bf16.vlgmr.msra.gmra.mrb[4].mxu0 %v2132_v34  ;;  %v7049_v34 = vld [vmem:[#allocation7 + $0x38] sm:$0xff]  }
 0x2c5   :  { %2574 = vmatpush1.bf16.msra.mxu0 %v6986_v33  ;;  %2605 = vmatprep.mubr.bf16.mxu0 %v2135_v36  ;;  %v7048_v33 = vld [vmem:[#allocation7 + $0x78] sm:$0xff]  }
 0x2c6   :  { %2575 = vmatprep.subr.bf16.mxu0 %v6991_v35  ;;  %6417 = vmatpush3.bf16.msra.mxu1 %v7039_v24  ;;  %v2200_v35 = vld [vmem:[#allocation6] sm:$0x3] }
 0x2c7   :  { %6418 = vmatprep.subr.bf16.mxu1 %v7040_v25  ;;  %v2205_v36 = vrot.slane %v2200_v35, %v7890_v51 }
 0x2c9   :  { %2576 = vmatpush1.bf16.msra.mxu0 %v6989_v38  ;;  %v2209_v38 = vrot.slane %v2200_v35, %v7895_v53 }
 0x2ca   :  { %2577 = vmatprep.subr.bf16.mxu0 %v6994_v39  ;;  %6419 = vmatpush3.bf16.msra.mxu1 %v7041_v26 }
 0x2cb   :  { %6420 = vmatprep.subr.bf16.mxu1 %v7042_v27 }
 0x2cd   :  { %2578 = vmatpush1.bf16.msra.mxu0 %v6992_v41  ;;  %v7195_v11 = vpop.eup %7194 }
 0x2ce   :  { %2579 = vmatprep.subr.bf16.mxu0 %v6997_v42  ;;  %v2126_v14 = vmul.f32 %v7195_v11, %v2114_v12  ;;  %6421 = vmatpush3.bf16.msra.mxu1 %v7043_v28  ;;  %v7055_v11 = vld [vmem:[%s8169_s8 + $0x28] sm:$0xff]   ;;  %v7056_v12 = vld [vmem:[%s8169_s8 + $0x30] sm:$0xff]  }
 0x2cf   :  { %6422 = vmatprep.subr.bf16.mxu1 %v7044_v29 }
 0x2d0   :  { %v2130_v17 = vmul.f32 %v6476_v43, %v2126_v14 }
 0x2d1   :  { %2580 = vmatpush1.bf16.msra.mxu0 %v6995_v44 }
 0x2d2   :  { %2581 = vmatprep.subr.bf16.mxu0 %v7000_v45  ;;  %v2134_v18 = vpack.c.bf16 %v2130_v17, %v2130_v17  ;;  %6423 = vmatpush3.bf16.msra.mxu1 %v7045_v30 }
 0x2d3   :  { %6424 = vmatprep.subr.bf16.mxu1 %v7046_v31  ;;  %v7058_v31 = vld [vmem:[#allocation10] sm:$0xff]  }
 0x2d5   :  { %2582 = vmatpush1.bf16.msra.mxu0 %v6998_v47 }
 0x2d6   :  { %2583 = vmatprep.subr.bf16.mxu0 %v7003_v48  ;;  %6425 = vmatpush3.bf16.msra.mxu1 %v7047_v32  ;;  %v6063_v32 = vld [vmem:[%s8170_s9] ss:$0 sm:$0xff]  ;;  %s8193_s9 = sld [smem:[#allocation25_spill]] }
 0x2d7   :  { %6426 = vmatprep.subr.bf16.mxu1 %v7048_v33 }
 0x2d9   :  { %2584 = vmatpush1.bf16.msra.mxu0 %v7001_v52 }
 0x2da   :  { %2585 = vmatprep.subr.bf16.mxu0 %v7006_v55  ;;  %6427 = vmatpush3.bf16.msra.mxu1 %v7049_v34 }
 0x2dd   :  { %2586 = vmatpush1.bf16.msra.mxu0 %v7004_v57 }
 0x2de   :  { %2587 = vmatprep.subr.bf16.mxu0 %v7009_v58 }
 0x2e1   :  { %2588 = vmatpush1.bf16.msra.mxu0 %v7007_v59 }
 0x2e2   :  { %2589 = vmatprep.subr.bf16.mxu0 %v7012_v60 }
 0x2e5   :  { %2590 = vmatpush1.bf16.msra.mxu0 %v7010_v61 }
 0x2e6   :  { %2591 = vmatprep.subr.bf16.mxu0 %v7015_v62 }
 0x2e9   :  { %2592 = vmatpush1.bf16.msra.mxu0 %v7013_v63 }
 0x2ea   :  { %2593 = vmatprep.subr.bf16.mxu0 %v7018_v1 }
 0x2ed   :  { %2594 = vmatpush1.bf16.msra.mxu0 %v7016_v3 }
 0x2ee   :  { %2595 = vmatprep.subr.bf16.mxu0 %v7021_v4 }
 0x2f1   :  { %2596 = vmatpush1.bf16.msra.mxu0 %v7019_v5  ;;  %v7050_v5 = vld [vmem:[%s8169_s8] sm:$0xff]  }
 0x2f2   :  { %2597 = vmatprep.subr.bf16.mxu0 %v7024_v6  ;;  %v7520_v6 = vmov 0.0  }
 0x2f3   :  { %6446 = vmatprep.subr.bf16.mxu1 %v7520_v6 }
 0x2f5   :  { %2598 = vmatpush1.bf16.msra.mxu0 %v7022_v7  ;;  %v7051_v7 = vld [vmem:[%s8169_s8 + $0x8] sm:$0xff]  }
 0x2f6   :  { %2599 = vmatprep.subr.bf16.mxu0 %v7027_v8  ;;  %v7052_v8 = vld [vmem:[%s8169_s8 + $0x10] sm:$0xff]  }
 0x2f9   :  { %2600 = vmatpush1.bf16.msra.mxu0 %v7025_v9  ;;  %v7053_v9 = vld [vmem:[%s8169_s8 + $0x18] sm:$0xff]  }
 0x2fa   :  { %2601 = vmatprep.subr.bf16.mxu0 %v7030_v10  ;;  %v7054_v10 = vld [vmem:[%s8169_s8 + $0x20] sm:$0xff]  }
 0x2fd   :  { %2602 = vmatpush1.bf16.msra.mxu0 %v7028_v13  ;;  %v7057_v13 = vld [vmem:[%s8169_s8 + $0x38] sm:$0xff]  }
 0x2fe   :  { %2603 = vmatprep.subr.bf16.mxu0 %v7033_v15  ;;  %v6046_v15 = vld [vmem:[#allocation9] ss:$0 sm:$0xff] }
 0x301   :  { %2604 = vmatpush1.bf16.msra.mxu0 %v7031_v16 }
 0x304   :  { %2606 = vmatmul.mubr.bf16.vlgmr.msra.gmra.mrb[4].mxu0 %v2134_v18 }
 0x3d7   :  { %v2607_v39 = vpop.f32.mrb[4].mxu0 }
 0x3d8   :  { %v6478_v40 = vadd.f32 %v2607_v39, %v2205_v36  ;;  %v2609_v41 = vpop.f32.mrb[5].mxu0 }
 0x3d9   :  { %v6479_v42 = vadd.f32 %v2609_v41, %v2209_v38  ;;  %v2611_v43 = vpop.f32.mrb[6].mxu0  ;;  %v7059_v41 = vld [vmem:[#allocation10 + $0x8] sm:$0xff]  }
 0x3da   :  { %v2614_v44 = vand.u32 2147483647, %v6478_v40  ;;  %v2612_v45 = vpop.f32.mrb[7].mxu0  ;;  %vm2622_vm4 = vcmp.ge.f32.partialorder %v6478_v40, 0.0  ;;  %v2934_v43 = vld [vmem:[%s8193_s9] sm:$0xff] }
 0x3db   :  { %v2615_v46 = vand.u32 2147483647, %v6479_v42  ;;  %vm2623_vm5 = vcmp.ge.f32.partialorder %v6479_v42, 0.0 }
 0x3dc   :  { %v2616_v47 = vsub.f32 0.0, %v2614_v44 }
 0x3dd   :  { %v2617_v48 = vsub.f32 0.0, %v2615_v46 }
 0x3de   :  { %v2618_v49 = vmul.f32 1.442695, %v2616_v47 }
 0x3df   :  { %v2620_v52 = vmul.f32 1.442695, %v2617_v48  ;;  %v7062_v48 = vld [vmem:[#allocation13 + $0x4] ss:$8 sps:$4 sm:$0xff]  }
 0x3e0   :  { %7196 = vpow2.f32 %v2618_v49  ;;  %v7060_v49 = vld [vmem:[#allocation13] ss:$8 sps:$4 sm:$0xff]  }
 0x3e1   :  { %7198 = vpow2.f32 %v2620_v52  ;;  %v7065_v52 = vld [vmem:[#allocation13 + $0x14] ss:$8 sps:$4 sm:$0xff]  }
 0x3ea   :  { %v7197_v55 = vpop.eup %7196 }
 0x3eb   :  { %v7199_v56 = vpop.eup %7198  ;;  %v2626_v57 = vadd.f32 1.0, %v7197_v55  ;;  %v2624_v60 = vsel %vm2622_vm4, 1.0, %v7197_v55  ;;  %v7063_v55 = vld [vmem:[#allocation13 + $0x10] ss:$8 sps:$4 sm:$0xff]  }
 0x3ec   :  { %v2627_v58 = vadd.f32 1.0, %v7199_v56  ;;  %v2625_v63 = vsel %vm2623_vm5, 1.0, %v7199_v56  ;;  %v7068_v56 = vld [vmem:[#allocation13 + $0x24] ss:$8 sps:$4 sm:$0xff]  }
 0x3ed   :  { %7200 = vrcp.f32 %v2626_v57  ;;  %v7066_v57 = vld [vmem:[#allocation13 + $0x20] ss:$8 sps:$4 sm:$0xff]  }
 0x3ee   :  { %7202 = vrcp.f32 %v2627_v58  ;;  %v7071_v58 = vld [vmem:[#allocation13 + $0x34] ss:$8 sps:$4 sm:$0xff]  }
 0x3f7   :  { %v7201_v59 = vpop.eup %7200 }
 0x3f8   :  { %v7203_v61 = vpop.eup %7202  ;;  %v2630_v62 = vmul.f32 %v7201_v59, %v2624_v60  ;;  %v7069_v59 = vld [vmem:[#allocation13 + $0x30] ss:$8 sps:$4 sm:$0xff]   ;;  %v7074_v60 = vld [vmem:[#allocation13 + $0x44] ss:$8 sps:$4 sm:$0xff]  }
 0x3f9   :  { %v2631_v0 = vmul.f32 %v7203_v61, %v2625_v63  ;;  %v7072_v61 = vld [vmem:[#allocation13 + $0x40] ss:$8 sps:$4 sm:$0xff]   ;;  %v7075_v63 = vld [vmem:[#allocation13 + $0x50] ss:$8 sps:$4 sm:$0xff]  }
 0x3fa   :  { %v2632_v1 = vmul.f32 %v6478_v40, %v2630_v62  ;;  %v7077_v62 = vld [vmem:[#allocation13 + $0x54] ss:$8 sps:$4 sm:$0xff]  }
 0x3fb   :  { %v2633_v2 = vmul.f32 %v6479_v42, %v2631_v0  ;;  %v7080_v0 = vld [vmem:[#allocation13 + $0x64] ss:$8 sps:$4 sm:$0xff]  }
 0x3fc   :  { %v2634_v4 = vpack.c.bf16 %v2632_v1, %v2632_v1  ;;  %v7078_v1 = vld [vmem:[#allocation13 + $0x60] ss:$8 sps:$4 sm:$0xff]  }
 0x3fd   :  { %v2635_v3 = vpack.c.bf16 %v2633_v2, %v2633_v2  ;;  %v7083_v2 = vld [vmem:[#allocation13 + $0x74] ss:$8 sps:$4 sm:$0xff]  }
 0x3ff   :  { %2803 = vmatprep.mubr.bf16.mxu1 %v2635_v3  ;;  %v7081_v3 = vld [vmem:[#allocation13 + $0x70] ss:$8 sps:$4 sm:$0xff]  }
 0x400   :  { %2804 = vmatmul.mubr.bf16.vlgmr.msra.gmra.mrb[4].mxu1 %v2634_v4  ;;  %v7523_v4 = vmov 0  }
 0x401   :  { %6447 = vmatpush3.bf16.msra.mxu1 %v7050_v5  ;;  %6462 = vmatprep.mubr.msk.bf16.mxu1 %vm7521_vm6, %v7520_v6  ;;  %v7086_v5 = vld [vmem:[#allocation15 + $0x4] ss:$16 sps:$4 sm:$0xff]  }
 0x402   :  { %6448 = vmatprep.subr.bf16.mxu1 %v7520_v6 }
 0x405   :  { %6449 = vmatpush3.bf16.msra.mxu1 %v7051_v7  ;;  %v7089_v7 = vld [vmem:[#allocation15 + $0xc] ss:$16 sps:$4 sm:$0xff]  }
 0x406   :  { %6450 = vmatprep.subr.bf16.mxu1 %v7520_v6  ;;  %3641 = vmatprep.subr.bf16.mxu0 %v7089_v7  ;;  %v7155_v7 = vld [vmem:[#allocation15 + $0x16c] ss:$16 sps:$4 sm:$0xff]  }
 0x409   :  { %6451 = vmatpush3.bf16.msra.mxu1 %v7052_v8  ;;  %v7095_v8 = vld [vmem:[#allocation15 + $0x2c] ss:$16 sps:$4 sm:$0xff]  }
 0x40a   :  { %6452 = vmatprep.subr.bf16.mxu1 %v7520_v6 }
 0x40d   :  { %6453 = vmatpush3.bf16.msra.mxu1 %v7053_v9  ;;  %v7093_v9 = vld [vmem:[#allocation15 + $0x28] ss:$16 sps:$4 sm:$0xff]  }
 0x40e   :  { %6454 = vmatprep.subr.bf16.mxu1 %v7520_v6 }
 0x411   :  { %6455 = vmatpush3.bf16.msra.mxu1 %v7054_v10  ;;  %v7101_v10 = vld [vmem:[#allocation15 + $0x4c] ss:$16 sps:$4 sm:$0xff]  }
 0x412   :  { %6456 = vmatprep.subr.bf16.mxu1 %v7520_v6 }
 0x415   :  { %6457 = vmatpush3.bf16.msra.mxu1 %v7055_v11  ;;  %v7099_v11 = vld [vmem:[#allocation15 + $0x48] ss:$16 sps:$4 sm:$0xff]  }
 0x416   :  { %6458 = vmatprep.subr.bf16.mxu1 %v7520_v6 }
 0x419   :  { %6459 = vmatpush3.bf16.msra.mxu1 %v7056_v12  ;;  %v7107_v12 = vld [vmem:[#allocation15 + $0x6c] ss:$16 sps:$4 sm:$0xff]  }
 0x41a   :  { %6460 = vmatprep.subr.bf16.mxu1 %v7520_v6 }
 0x41d   :  { %6461 = vmatpush3.bf16.msra.mxu1 %v7057_v13  ;;  %v7105_v13 = vld [vmem:[#allocation15 + $0x68] ss:$16 sps:$4 sm:$0xff]  }
 0x41e   :  { %6466 = vmatprep.subr.bf16.mxu1 %v7520_v6 }
 0x4d3   :  { %v6428_v14 = vpop.f32.mrb[4].mxu1 }
 0x4d4   :  { %v6429_v16 = vpop.f32.mrb[5].mxu1 }
 0x4d5   :  { %v6430_v17 = vadd.f32 %v6429_v16, %v6428_v14  ;;  %v6431_v18 = vpop.f32.mrb[6].mxu1  ;;  %v7113_v14 = vld [vmem:[#allocation15 + $0x8c] ss:$16 sps:$4 sm:$0xff]  }
 0x4d6   :  { %v6432_v19 = vpop.f32.mrb[7].mxu1  ;;  %v7119_v16 = vld [vmem:[#allocation15 + $0xac] ss:$16 sps:$4 sm:$0xff]  }
 0x4d7   :  { %v2806_v20 = vadd.f32 %v6430_v17, %v6046_v15  ;;  %v7111_v15 = vld [vmem:[#allocation15 + $0x88] ss:$16 sps:$4 sm:$0xff]   ;;  %v6072_v18 = vld [vmem:[#allocation12] ss:$0 sm:$0xff] }
 0x4d8   :  { %v7117_v17 = vld [vmem:[#allocation15 + $0xa8] ss:$16 sps:$4 sm:$0xff]  }
 0x4d9   :  { %v2811_v21 = vand.u32 2147483647, %v2806_v20  ;;  %vm2815_vm7 = vcmp.ge.f32.partialorder %v2806_v20, 0.0 }
 0x4db   :  { %v2812_v22 = vsub.f32 0.0, %v2811_v21 }
 0x4dd   :  { %v2813_v23 = vmul.f32 1.442695, %v2812_v22 }
 0x4df   :  { %7204 = vpow2.f32 %v2813_v23 }
 0x4e9   :  { %v7205_v24 = vpop.eup %7204 }
 0x4ea   :  { %v2817_v25 = vadd.f32 1.0, %v7205_v24  ;;  %v2816_v27 = vsel %vm2815_vm7, 1.0, %v7205_v24 }
 0x4ec   :  { %7206 = vrcp.f32 %v2817_v25 }
 0x4f6   :  { %v7207_v26 = vpop.eup %7206 }
 0x4f7   :  { %v2819_v28 = vmul.f32 %v7207_v26, %v2816_v27 }
 0x4f9   :  { %v2820_v29 = vmul.f32 %v2819_v28, %v2806_v20 }
 0x4fb   :  { %v2821_v30 = vpack.c.bf16 %v2820_v29, %v2820_v29 }
 0x4fd   :  { %6463 = vmatmul.mubr.bf16.vlgmr.msra.gmra.mrb[8].mxu1 %v2821_v30 }
 0x4fe   :  { %6470 = vmatprep.mubr.msk.bf16.mxu1 %vm7521_vm6, %v7520_v6  ;;  %6467 = vmatpush3.bf16.msra.mxu1 %v7058_v31 }
 0x4ff   :  { %6468 = vmatprep.subr.bf16.mxu1 %v7520_v6  ;;  %v7087_v6 = vld [vmem:[#allocation15 + $0x8] ss:$16 sps:$4 sm:$0xff]  }
 0x500   :  { %3642 = vmatpush1.bf16.msra.mxu0 %v7087_v6  ;;  %v7152_v6 = vld [vmem:[#allocation15 + $0x164] ss:$16 sps:$4 sm:$0xff]  }
 0x501   :  { %3643 = vmatprep.subr.bf16.mxu0 %v7095_v8  ;;  %v7150_v8 = vld [vmem:[#allocation15 + $0x160] ss:$16 sps:$4 sm:$0xff]  }
 0x502   :  { %6469 = vmatpush3.bf16.msra.mxu1 %v7059_v41  ;;  %v7102_v41 = vld [vmem:[#allocation15 + $0x60] ss:$16 sps:$4 sm:$0xff]  }
 0x503   :  { %3131 = vmatprep.subr.bf16.mxu1 %v7062_v48  ;;  %v7120_v48 = vld [vmem:[#allocation15 + $0xc0] ss:$16 sps:$4 sm:$0xff]  }
 0x504   :  { %3644 = vmatpush1.bf16.msra.mxu0 %v7093_v9  ;;  %v7153_v9 = vld [vmem:[#allocation15 + $0x168] ss:$16 sps:$4 sm:$0xff]  }
 0x505   :  { %3645 = vmatprep.subr.bf16.mxu0 %v7101_v10  ;;  %v7158_v10 = vld [vmem:[#allocation15 + $0x184] ss:$16 sps:$4 sm:$0xff]  }
 0x508   :  { %3646 = vmatpush1.bf16.msra.mxu0 %v7099_v11  ;;  %v7161_v11 = vld [vmem:[#allocation15 + $0x18c] ss:$16 sps:$4 sm:$0xff]  }
 0x509   :  { %3647 = vmatprep.subr.bf16.mxu0 %v7107_v12  ;;  %v7156_v12 = vld [vmem:[#allocation15 + $0x180] ss:$16 sps:$4 sm:$0xff]  }
 0x50c   :  { %3648 = vmatpush1.bf16.msra.mxu0 %v7105_v13  ;;  %v7159_v13 = vld [vmem:[#allocation15 + $0x188] ss:$16 sps:$4 sm:$0xff]  }
 0x50d   :  { %3649 = vmatprep.subr.bf16.mxu0 %v7113_v14  ;;  %v7164_v14 = vld [vmem:[#allocation15 + $0x1a4] ss:$16 sps:$4 sm:$0xff]  }
 0x510   :  { %3650 = vmatpush1.bf16.msra.mxu0 %v7111_v15  ;;  %v7167_v15 = vld [vmem:[#allocation15 + $0x1ac] ss:$16 sps:$4 sm:$0xff]  }
 0x511   :  { %3651 = vmatprep.subr.bf16.mxu0 %v7119_v16  ;;  %v7162_v16 = vld [vmem:[#allocation15 + $0x1a0] ss:$16 sps:$4 sm:$0xff]  }
 0x514   :  { %3652 = vmatpush1.bf16.msra.mxu0 %v7117_v17  ;;  %v7165_v17 = vld [vmem:[#allocation15 + $0x1a8] ss:$16 sps:$4 sm:$0xff]  }
 0x5d0   :  { %v2927_v33 = vpop.f32.mrb[8].mxu1 }
 0x5d1   :  { %v2928_v34 = vadd.f32 %v6063_v32, %v2927_v33  ;;  %v6464_v35 = vpop.f32.mrb[9].mxu1  ;;  %v7084_v33 = vld [vmem:[#allocation15] ss:$16 sps:$4 sm:$0xff]  }
 0x5d2   :  { %v2930_v36 = vpop.f32.mrb[10].mxu1  ;;  %v7092_v35 = vld [vmem:[#allocation15 + $0x24] ss:$16 sps:$4 sm:$0xff]  }
 0x5d3   :  { %2933 = vst [vmem:[%s8180_s19] sm:$0xff] %v2928_v34  ;;  %v2935_v38 = vmul.f32 0.5, %v2928_v34  ;;  %v6465_v39 = vpop.f32.mrb[11].mxu1  ;;  %v7090_v36 = vld [vmem:[#allocation15 + $0x20] ss:$16 sps:$4 sm:$0xff]  }
 0x5d4   :  { %v7096_v39 = vld [vmem:[#allocation15 + $0x40] ss:$16 sps:$4 sm:$0xff]  }
 0x5d5   :  { %v2936_v40 = vmul.f32 1.442695, %v2935_v38  ;;  %v7098_v38 = vld [vmem:[#allocation15 + $0x44] ss:$16 sps:$4 sm:$0xff]  }
 0x5d7   :  { %7208 = vpow2.f32 %v2936_v40  ;;  %v7104_v40 = vld [vmem:[#allocation15 + $0x64] ss:$16 sps:$4 sm:$0xff]  }
 0x5e1   :  { %v7209_v42 = vpop.eup %7208 }
 0x5e2   :  { %2939 = vrot.lane.b32.xlu0 %v7209_v42, %s7522_s21  ;;  %v7110_v42 = vld [vmem:[#allocation15 + $0x84] ss:$16 sps:$4 sm:$0xff]  }
 0x654   :  { %v2940_v44 = vpop.permute.xlu0 %2939 }
 0x655   :  { %v2942_v45 = vmul.f32 %v2940_v44, %v2934_v43  ;;  %v7108_v43 = vld [vmem:[#allocation15 + $0x80] ss:$16 sps:$4 sm:$0xff]   ;;  %v7116_v44 = vld [vmem:[#allocation15 + $0xa4] ss:$16 sps:$4 sm:$0xff]  }
 0x657   :  { %v2943_v46 = vadd.f32 %v2942_v45, %v2928_v34  ;;  %v7114_v45 = vld [vmem:[#allocation15 + $0xa0] ss:$16 sps:$4 sm:$0xff]  }
 0x659   :  { %v2944_v47 = vpack.c.bf16 %v2943_v46, %v2943_v46  ;;  %v7122_v46 = vld [vmem:[#allocation15 + $0xc4] ss:$16 sps:$4 sm:$0xff]  }
 0x65b   :  { %6471 = vmatmul.mubr.msk.bf16.vlgmr.msra.gmra.mrb[12].mxu1 %vm2968_vm8, %v2944_v47  ;;  %v7125_v47 = vld [vmem:[#allocation15 + $0xcc] ss:$16 sps:$4 sm:$0xff]  }
 0x65c   :  { %3132 = vmatpush1.bf16.msra.mxu1 %v7060_v49  ;;  %3163 = vmatprep.mubr.bf16.mxu1 %v7523_v4  ;;  %v7123_v49 = vld [vmem:[#allocation15 + $0xc8] ss:$16 sps:$4 sm:$0xff]   ;;  %v7144_v4 = vld [vmem:[#allocation15 + $0x140] ss:$16 sps:$4 sm:$0xff]  }
 0x65d   :  { %3133 = vmatprep.subr.bf16.mxu1 %v7065_v52  ;;  %3653 = vmatprep.subr.bf16.mxu0 %v7125_v47  ;;  %v7128_v52 = vld [vmem:[#allocation15 + $0xe4] ss:$16 sps:$4 sm:$0xff]  }
 0x65e   :  { %3654 = vmatpush1.bf16.msra.mxu0 %v7123_v49 }
 0x660   :  { %3134 = vmatpush1.bf16.msra.mxu1 %v7063_v55  ;;  %v7131_v55 = vld [vmem:[#allocation15 + $0xec] ss:$16 sps:$4 sm:$0xff]  }
 0x661   :  { %3135 = vmatprep.subr.bf16.mxu1 %v7068_v56  ;;  %v7126_v56 = vld [vmem:[#allocation15 + $0xe0] ss:$16 sps:$4 sm:$0xff]   ;;  %3655 = vmatprep.subr.bf16.mxu0 %v7131_v55 }
 0x664   :  { %3136 = vmatpush1.bf16.msra.mxu1 %v7066_v57  ;;  %v7129_v57 = vld [vmem:[#allocation15 + $0xe8] ss:$16 sps:$4 sm:$0xff]  }
 0x665   :  { %3137 = vmatprep.subr.bf16.mxu1 %v7071_v58  ;;  %3656 = vmatpush1.bf16.msra.mxu0 %v7129_v57  ;;  %v7134_v58 = vld [vmem:[#allocation15 + $0x104] ss:$16 sps:$4 sm:$0xff]  }
 0x668   :  { %3138 = vmatpush1.bf16.msra.mxu1 %v7069_v59  ;;  %v7137_v59 = vld [vmem:[#allocation15 + $0x10c] ss:$16 sps:$4 sm:$0xff]  }
 0x669   :  { %3139 = vmatprep.subr.bf16.mxu1 %v7074_v60  ;;  %v7132_v60 = vld [vmem:[#allocation15 + $0x100] ss:$16 sps:$4 sm:$0xff]   ;;  %3657 = vmatprep.subr.bf16.mxu0 %v7137_v59 }
 0x66c   :  { %3140 = vmatpush1.bf16.msra.mxu1 %v7072_v61  ;;  %v7135_v61 = vld [vmem:[#allocation15 + $0x108] ss:$16 sps:$4 sm:$0xff]  }
 0x66d   :  { %3141 = vmatprep.subr.bf16.mxu1 %v7077_v62  ;;  %3658 = vmatpush1.bf16.msra.mxu0 %v7135_v61  ;;  %v7140_v62 = vld [vmem:[#allocation15 + $0x124] ss:$16 sps:$4 sm:$0xff]  }
 0x670   :  { %3142 = vmatpush1.bf16.msra.mxu1 %v7075_v63  ;;  %v7143_v63 = vld [vmem:[#allocation15 + $0x12c] ss:$16 sps:$4 sm:$0xff]  }
 0x671   :  { %3143 = vmatprep.subr.bf16.mxu1 %v7080_v0  ;;  %v7138_v0 = vld [vmem:[#allocation15 + $0x120] ss:$16 sps:$4 sm:$0xff]   ;;  %3659 = vmatprep.subr.bf16.mxu0 %v7143_v63 }
 0x674   :  { %3144 = vmatpush1.bf16.msra.mxu1 %v7078_v1  ;;  %v7141_v1 = vld [vmem:[#allocation15 + $0x128] ss:$16 sps:$4 sm:$0xff]  }
 0x675   :  { %3145 = vmatprep.subr.bf16.mxu1 %v7083_v2  ;;  %3660 = vmatpush1.bf16.msra.mxu0 %v7141_v1  ;;  %v7146_v2 = vld [vmem:[#allocation15 + $0x144] ss:$16 sps:$4 sm:$0xff]  }
 0x676   :  { %v3734_v1 = vld [vmem:[#allocation16 + $0x40] sm:$0xff] }
 0x678   :  { %3146 = vmatpush1.bf16.msra.mxu1 %v7081_v3  ;;  %v7149_v3 = vld [vmem:[#allocation15 + $0x14c] ss:$16 sps:$4 sm:$0xff]  }
 0x679   :  { %3600 = vmatprep.subr.bf16.mxu1 %v7086_v5  ;;  %v7147_v5 = vld [vmem:[#allocation15 + $0x148] ss:$16 sps:$4 sm:$0xff]   ;;  %3661 = vmatprep.subr.bf16.mxu0 %v7149_v3  ;;  %v3738_v3 = vld [vmem:[#allocation16 + $0x60] sm:$0xff] }
 0x67a   :  { %3662 = vmatpush1.bf16.msra.mxu0 %v7147_v5  ;;  %v3739_v5 = vld [vmem:[#allocation16 + $0x68] sm:$0xff] }
 0x67b   :  { %3663 = vmatprep.subr.bf16.mxu0 %v7155_v7 }
 0x67e   :  { %3664 = vmatpush1.bf16.msra.mxu0 %v7153_v9 }
 0x67f   :  { %3665 = vmatprep.subr.bf16.mxu0 %v7161_v11  ;;  %v3746_v11 = vld [vmem:[#allocation16 + $0xa0] sm:$0xff] }
 0x682   :  { %3666 = vmatpush1.bf16.msra.mxu0 %v7159_v13  ;;  %v3747_v13 = vld [vmem:[#allocation16 + $0xa8] sm:$0xff] }
 0x683   :  { %3667 = vmatprep.subr.bf16.mxu0 %v7167_v15 }
 0x686   :  { %3668 = vmatpush1.bf16.msra.mxu0 %v7165_v17 }
 0x72e   :  { %v3006_v19 = vpop.f32.mrb[12].mxu1 }
 0x72f   :  { %v3007_v20 = vadd.f32 %v6072_v18, %v3006_v19  ;;  %v6472_v21 = vpop.f32.mrb[13].mxu1  ;;  %v7170_v18 = vld [vmem:[#allocation15 + $0x1c4] ss:$16 sps:$4 sm:$0xff]   ;;  %v7173_v19 = vld [vmem:[#allocation15 + $0x1cc] ss:$16 sps:$4 sm:$0xff]  }
 0x730   :  { %v3009_v22 = vpop.f32.mrb[14].mxu1  ;;  %v7171_v21 = vld [vmem:[#allocation15 + $0x1c8] ss:$16 sps:$4 sm:$0xff]   ;;  %3669 = vmatprep.subr.bf16.mxu0 %v7173_v19  ;;  %v3754_v19 = vld [vmem:[#allocation16 + $0xe0] sm:$0xff] }
 0x731   :  { %v3012_v23 = vand.u32 2147483647, %v3007_v20  ;;  %v6473_v24 = vpop.f32.mrb[15].mxu1  ;;  %vm3016_vm9 = vcmp.ge.f32.partialorder %v3007_v20, 0.0  ;;  %3670 = vmatpush1.bf16.msra.mxu0 %v7171_v21  ;;  %v7176_v22 = vld [vmem:[#allocation15 + $0x1e4] ss:$16 sps:$4 sm:$0xff]  }
 0x732   :  { %v7174_v24 = vld [vmem:[#allocation15 + $0x1e0] ss:$16 sps:$4 sm:$0xff]   ;;  %v3755_v21 = vld [vmem:[#allocation16 + $0xe8] sm:$0xff] }
 0x733   :  { %v3013_v25 = vsub.f32 0.0, %v3012_v23  ;;  %v7179_v23 = vld [vmem:[#allocation15 + $0x1ec] ss:$16 sps:$4 sm:$0xff]  }
 0x734   :  { %3671 = vmatprep.subr.bf16.mxu0 %v7179_v23 }
 0x735   :  { %v3014_v26 = vmul.f32 1.442695, %v3013_v25  ;;  %v7177_v25 = vld [vmem:[#allocation15 + $0x1e8] ss:$16 sps:$4 sm:$0xff]  }
 0x736   :  { %3672 = vmatpush1.bf16.msra.mxu0 %v7177_v25 }
 0x737   :  { %7210 = vpow2.f32 %v3014_v26  ;;  %v3726_v26 = vld [vmem:[#allocation16] sm:$0xff] }
 0x741   :  { %v7211_v27 = vpop.eup %7210 }
 0x742   :  { %v3018_v28 = vadd.f32 1.0, %v7211_v27  ;;  %v3017_v30 = vsel %vm3016_vm9, 1.0, %v7211_v27  ;;  %v3730_v27 = vld [vmem:[#allocation16 + $0x20] sm:$0xff] }
 0x744   :  { %7212 = vrcp.f32 %v3018_v28  ;;  %v3727_v28 = vld [vmem:[#allocation16 + $0x8] sm:$0xff] }
 0x74e   :  { %v7213_v29 = vpop.eup %7212 }
 0x74f   :  { %v3020_v31 = vmul.f32 %v7213_v29, %v3017_v30  ;;  %v6156_v29 = vcombine.low %v3726_v26, %v3730_v27  ;;  %v6157_v30 = vcombine.high %v3726_v26, %v3730_v27  ;;  %v3758_v26 = vld [vmem:[#allocation16 + $0x100] sm:$0xff] }
 0x750   :  { %v3762_v27 = vld [vmem:[#allocation16 + $0x120] sm:$0xff] }
 0x751   :  { %v3021_v32 = vmul.f32 %v3020_v31, %v3007_v20  ;;  %v7168_v20 = vld [vmem:[#allocation15 + $0x1c0] ss:$16 sps:$4 sm:$0xff]   ;;  %v3731_v31 = vld [vmem:[#allocation16 + $0x28] sm:$0xff] }
 0x753   :  { %v3022_v34 = vpack.c.bf16 %v3021_v32, %v3021_v32  ;;  %v6158_v32 = vcombine.low %v3727_v28, %v3731_v31 }
 0x755   :  { %3164 = vmatmul.mubr.bf16.vlgmr.msra.gmra.mrb[16].mxu1 %v3022_v34  ;;  %v3039_v34 = vld [vmem:[%s8174_s13] sm:$0x3] }
 0x756   :  { %3601 = vmatpush1.bf16.msra.mxu1 %v7084_v33  ;;  %v6159_v33 = vcombine.high %v3727_v28, %v3731_v31  ;;  %v3759_v28 = vld [vmem:[#allocation16 + $0x108] sm:$0xff] }
 0x757   :  { %3602 = vmatprep.subr.bf16.mxu1 %v7092_v35  ;;  %v3044_v35 = vrot.slane %v3039_v34, %v7890_v51 }
 0x758   :  { %5386 = vmatprep.subr.bf16.mxu0 %v6159_v33 }
 0x75a   :  { %3603 = vmatpush1.bf16.msra.mxu1 %v7090_v36  ;;  %v3048_v36 = vrot.slane %v3039_v34, %v7895_v53  ;;  %v3766_v34 = vld [vmem:[#allocation16 + $0x140] sm:$0xff] }
 0x75b   :  { %3604 = vmatprep.subr.bf16.mxu1 %v7098_v38 }
 0x75e   :  { %3605 = vmatpush1.bf16.msra.mxu1 %v7096_v39 }
 0x75f   :  { %3606 = vmatprep.subr.bf16.mxu1 %v7104_v40 }
 0x762   :  { %3607 = vmatpush1.bf16.msra.mxu1 %v7102_v41 }
 0x763   :  { %3608 = vmatprep.subr.bf16.mxu1 %v7110_v42 }
 0x766   :  { %3609 = vmatpush1.bf16.msra.mxu1 %v7108_v43 }
 0x767   :  { %3610 = vmatprep.subr.bf16.mxu1 %v7116_v44 }
 0x76a   :  { %3611 = vmatpush1.bf16.msra.mxu1 %v7114_v45 }
 0x76b   :  { %3612 = vmatprep.subr.bf16.mxu1 %v7122_v46 }
 0x76e   :  { %3613 = vmatpush1.bf16.msra.mxu1 %v7120_v48 }
 0x76f   :  { %3614 = vmatprep.subr.bf16.mxu1 %v7128_v52 }
 0x772   :  { %3615 = vmatpush1.bf16.msra.mxu1 %v7126_v56 }
 0x773   :  { %3616 = vmatprep.subr.bf16.mxu1 %v7134_v58 }
 0x776   :  { %3617 = vmatpush1.bf16.msra.mxu1 %v7132_v60 }
 0x777   :  { %3618 = vmatprep.subr.bf16.mxu1 %v7140_v62 }
 0x77a   :  { %3619 = vmatpush1.bf16.msra.mxu1 %v7138_v0 }
 0x77b   :  { %3620 = vmatprep.subr.bf16.mxu1 %v7146_v2 }
 0x77e   :  { %3621 = vmatpush1.bf16.msra.mxu1 %v7144_v4  ;;  %v3735_v4 = vld [vmem:[#allocation16 + $0x48] sm:$0xff] }
 0x77f   :  { %3622 = vmatprep.subr.bf16.mxu1 %v7152_v6  ;;  %v6167_v9 = vcombine.high %v3735_v4, %v3739_v5  ;;  %v6166_v15 = vcombine.low %v3735_v4, %v3739_v5  ;;  %v3795_v5 = vld [vmem:[#allocation16 + $0x228] sm:$0xff] }
 0x782   :  { %3623 = vmatpush1.bf16.msra.mxu1 %v7150_v8  ;;  %v6165_v8 = vcombine.high %v3734_v1, %v3738_v3 }
 0x783   :  { %3624 = vmatprep.subr.bf16.mxu1 %v7158_v10  ;;  %v3742_v10 = vld [vmem:[#allocation16 + $0x80] sm:$0xff] }
 0x786   :  { %3625 = vmatpush1.bf16.msra.mxu1 %v7156_v12  ;;  %v3743_v12 = vld [vmem:[#allocation16 + $0x88] sm:$0xff] }
 0x787   :  { %3626 = vmatprep.subr.bf16.mxu1 %v7164_v14  ;;  %v6164_v14 = vcombine.low %v3734_v1, %v3738_v3  ;;  %v6175_v17 = vcombine.high %v3743_v12, %v3747_v13  ;;  %v6174_v23 = vcombine.low %v3743_v12, %v3747_v13  ;;  %v3790_v1 = vld [vmem:[#allocation16 + $0x200] sm:$0xff]  ;;  %v3791_v3 = vld [vmem:[#allocation16 + $0x208] sm:$0xff] }
 0x788   :  { %v3803_v13 = vld [vmem:[#allocation16 + $0x268] sm:$0xff] }
 0x78a   :  { %3627 = vmatpush1.bf16.msra.mxu1 %v7162_v16  ;;  %v6173_v16 = vcombine.high %v3742_v10, %v3746_v11 }
 0x78b   :  { %3628 = vmatprep.subr.bf16.mxu1 %v7170_v18  ;;  %v3750_v18 = vld [vmem:[#allocation16 + $0xc0] sm:$0xff] }
 0x78e   :  { %3629 = vmatpush1.bf16.msra.mxu1 %v7168_v20  ;;  %v3751_v20 = vld [vmem:[#allocation16 + $0xc8] sm:$0xff] }
 0x78f   :  { %3630 = vmatprep.subr.bf16.mxu1 %v7176_v22  ;;  %v6172_v22 = vcombine.low %v3742_v10, %v3746_v11  ;;  %v6183_v25 = vcombine.high %v3751_v20, %v3755_v21  ;;  %v6182_v31 = vcombine.low %v3751_v20, %v3755_v21  ;;  %v3802_v10 = vld [vmem:[#allocation16 + $0x260] sm:$0xff]  ;;  %v3799_v11 = vld [vmem:[#allocation16 + $0x248] sm:$0xff] }
 0x790   :  { %v3811_v21 = vld [vmem:[#allocation16 + $0x2a8] sm:$0xff] }
 0x792   :  { %3631 = vmatpush1.bf16.msra.mxu1 %v7174_v24  ;;  %v6181_v24 = vcombine.high %v3750_v18, %v3754_v19 }
 0x793   :  { %5304 = vmatprep.subr.bf16.mxu1 %v6157_v30  ;;  %v6180_v30 = vcombine.low %v3750_v18, %v3754_v19  ;;  %v3810_v18 = vld [vmem:[#allocation16 + $0x2a0] sm:$0xff]  ;;  %v3807_v19 = vld [vmem:[#allocation16 + $0x288] sm:$0xff] }
 0x828   :  { %v3165_v38 = vpop.f32.mrb[16].mxu1 }
 0x829   :  { %v3166_v39 = vadd.f32 %v3165_v38, %v3044_v35  ;;  %v3167_v40 = vpop.f32.mrb[17].mxu1  ;;  %v3770_v35 = vld [vmem:[#allocation16 + $0x160] sm:$0xff]  ;;  %v3771_v38 = vld [vmem:[#allocation16 + $0x168] sm:$0xff] }
 0x82a   :  { %v3168_v41 = vadd.f32 %v3167_v40, %v3048_v36  ;;  %v3169_v42 = vpop.f32.mrb[18].mxu1  ;;  %v3767_v36 = vld [vmem:[#allocation16 + $0x148] sm:$0xff] }
 0x82b   :  { %v3172_v43 = vand.u32 2147483647, %v3166_v39  ;;  %v3170_v44 = vpop.f32.mrb[19].mxu1  ;;  %vm3180_vm10 = vcmp.ge.f32.partialorder %v3166_v39, 0.0  ;;  %v6199_v42 = vcombine.high %v3767_v36, %v3771_v38 }
 0x82c   :  { %v3173_v45 = vand.u32 2147483647, %v3168_v41  ;;  %vm3181_vm11 = vcmp.ge.f32.partialorder %v3168_v41, 0.0  ;;  %v6198_v44 = vcombine.low %v3767_v36, %v3771_v38  ;;  %v3827_v38 = vld [vmem:[#allocation16 + $0x328] sm:$0xff] }
 0x82d   :  { %v3174_v46 = vsub.f32 0.0, %v3172_v43  ;;  %v6196_v43 = vcombine.low %v3766_v34, %v3770_v35 }
 0x82e   :  { %v3175_v47 = vsub.f32 0.0, %v3173_v45  ;;  %v3774_v45 = vld [vmem:[#allocation16 + $0x180] sm:$0xff] }
 0x82f   :  { %v3176_v48 = vmul.f32 1.442695, %v3174_v46  ;;  %v3778_v46 = vld [vmem:[#allocation16 + $0x1a0] sm:$0xff] }
 0x830   :  { %v3178_v49 = vmul.f32 1.442695, %v3175_v47  ;;  %v3775_v47 = vld [vmem:[#allocation16 + $0x188] sm:$0xff] }
 0x831   :  { %7214 = vpow2.f32 %v3176_v48  ;;  %v6205_v48 = vcombine.high %v3774_v45, %v3778_v46 }
 0x832   :  { %7216 = vpow2.f32 %v3178_v49  ;;  %v3779_v49 = vld [vmem:[#allocation16 + $0x1a8] sm:$0xff] }
 0x83b   :  { %v7215_v52 = vpop.eup %7214 }
 0x83c   :  { %v7217_v55 = vpop.eup %7216  ;;  %v3184_v56 = vadd.f32 1.0, %v7215_v52  ;;  %v3182_v59 = vsel %vm3180_vm10, 1.0, %v7215_v52  ;;  %v6204_v52 = vcombine.low %v3774_v45, %v3778_v46  ;;  %v3835_v46 = vld [vmem:[#allocation16 + $0x368] sm:$0xff] }
 0x83d   :  { %v3185_v57 = vadd.f32 1.0, %v7217_v55  ;;  %v3183_v62 = vsel %vm3181_vm11, 1.0, %v7217_v55  ;;  %v6206_v55 = vcombine.low %v3775_v47, %v3779_v49 }
 0x83e   :  { %7218 = vrcp.f32 %v3184_v56  ;;  %v6207_v56 = vcombine.high %v3775_v47, %v3779_v49 }
 0x83f   :  { %7220 = vrcp.f32 %v3185_v57  ;;  %v3782_v57 = vld [vmem:[#allocation16 + $0x1c0] sm:$0xff] }
 0x848   :  { %v7219_v58 = vpop.eup %7218 }
 0x849   :  { %v7221_v60 = vpop.eup %7220  ;;  %v3188_v61 = vmul.f32 %v7219_v58, %v3182_v59  ;;  %v3786_v58 = vld [vmem:[#allocation16 + $0x1e0] sm:$0xff]  ;;  %v3783_v59 = vld [vmem:[#allocation16 + $0x1c8] sm:$0xff] }
 0x84a   :  { %v3189_v63 = vmul.f32 %v7221_v60, %v3183_v62  ;;  %v6213_v60 = vcombine.high %v3782_v57, %v3786_v58  ;;  %v6212_v62 = vcombine.low %v3782_v57, %v3786_v58  ;;  %v3843_v58 = vld [vmem:[#allocation16 + $0x3a8] sm:$0xff] }
 0x84b   :  { %v3190_v0 = vmul.f32 %v3188_v61, %v3166_v39  ;;  %v6188_v39 = vcombine.low %v3758_v26, %v3762_v27  ;;  %v3787_v61 = vld [vmem:[#allocation16 + $0x1e8] sm:$0xff] }
 0x84c   :  { %v3191_v2 = vmul.f32 %v3189_v63, %v3168_v41  ;;  %v6197_v41 = vcombine.high %v3766_v34, %v3770_v35  ;;  %v6214_v63 = vcombine.low %v3783_v59, %v3787_v61  ;;  %v3826_v34 = vld [vmem:[#allocation16 + $0x320] sm:$0xff]  ;;  %v3823_v35 = vld [vmem:[#allocation16 + $0x308] sm:$0xff] }
 0x84d   :  { %v3192_v7 = vpack.c.bf16 %v3190_v0, %v3190_v0  ;;  %v6215_v0 = vcombine.high %v3783_v59, %v3787_v61 }
 0x84e   :  { %v3193_v6 = vpack.c.bf16 %v3191_v2, %v3191_v2  ;;  %v3794_v2 = vld [vmem:[#allocation16 + $0x220] sm:$0xff] }
 0x84f   :  { %v6221_v4 = vcombine.high %v3790_v1, %v3794_v2 }
 0x850   :  { %3632 = vmatprep.mubr.bf16.mxu1 %v3193_v6  ;;  %3673 = vmatprep.mubr.bf16.mxu0 %v3193_v6  ;;  %v6220_v6 = vcombine.low %v3790_v1, %v3794_v2  ;;  %v3851_v2 = vld [vmem:[#allocation16 + $0x3e8] sm:$0xff] }
 0x851   :  { %3633 = vmatmul.mubr.bf16.vlgmr.msra.gmra.mrb[20].mxu1 %v3192_v7  ;;  %3674 = vmatmul.mubr.bf16.vlgmr.msra.gmra.mrb[8].mxu0 %v3192_v7  ;;  %v6222_v7 = vcombine.low %v3791_v3, %v3795_v5 }
 0x852   :  { %5305 = vmatpush1.bf16.msra.mxu1 %v6156_v29  ;;  %5387 = vmatpush1.bf16.msra.mxu0 %v6158_v32  ;;  %v3763_v29 = vld [vmem:[#allocation16 + $0x128] sm:$0xff]  ;;  %v6189_v32 = vcombine.high %v3758_v26, %v3762_v27  ;;  %v3818_v26 = vld [vmem:[#allocation16 + $0x2e0] sm:$0xff] }
 0x853   :  { %5306 = vmatprep.subr.bf16.mxu1 %v6165_v8  ;;  %5388 = vmatprep.subr.bf16.mxu0 %v6167_v9  ;;  %v6191_v33 = vcombine.high %v3759_v28, %v3763_v29  ;;  %v6190_v40 = vcombine.low %v3759_v28, %v3763_v29  ;;  %v6223_v8 = vcombine.high %v3791_v3, %v3795_v5  ;;  %v3798_v9 = vld [vmem:[#allocation16 + $0x240] sm:$0xff]  ;;  %v3815_v27 = vld [vmem:[#allocation16 + $0x2c8] sm:$0xff] }
 0x854   :  { %v6229_v12 = vcombine.high %v3798_v9, %v3802_v10  ;;  %v3819_v29 = vld [vmem:[#allocation16 + $0x2e8] sm:$0xff] }
 0x856   :  { %5307 = vmatpush1.bf16.msra.mxu1 %v6164_v14  ;;  %5389 = vmatpush1.bf16.msra.mxu0 %v6166_v15  ;;  %v6228_v14 = vcombine.low %v3798_v9, %v3802_v10  ;;  %v6230_v15 = vcombine.low %v3799_v11, %v3803_v13  ;;  %v8057_v10 = vld [vmem:[#allocation16 + $0x428] sm:$0xff] }
 0x857   :  { %5308 = vmatprep.subr.bf16.mxu1 %v6173_v16  ;;  %5390 = vmatprep.subr.bf16.mxu0 %v6175_v17  ;;  %v6231_v16 = vcombine.high %v3799_v11, %v3803_v13  ;;  %v3806_v17 = vld [vmem:[#allocation16 + $0x280] sm:$0xff] }
 0x858   :  { %v6237_v20 = vcombine.high %v3806_v17, %v3810_v18 }
 0x85a   :  { %5309 = vmatpush1.bf16.msra.mxu1 %v6172_v22  ;;  %5391 = vmatpush1.bf16.msra.mxu0 %v6174_v23  ;;  %v6236_v22 = vcombine.low %v3806_v17, %v3810_v18  ;;  %v6238_v23 = vcombine.low %v3807_v19, %v3811_v21 }
 0x85b   :  { %5310 = vmatprep.subr.bf16.mxu1 %v6181_v24  ;;  %5392 = vmatprep.subr.bf16.mxu0 %v6183_v25  ;;  %v6239_v24 = vcombine.high %v3807_v19, %v3811_v21  ;;  %v3814_v25 = vld [vmem:[#allocation16 + $0x2c0] sm:$0xff] }
 0x85c   :  { %v6245_v28 = vcombine.high %v3814_v25, %v3818_v26 }
 0x85e   :  { %5311 = vmatpush1.bf16.msra.mxu1 %v6180_v30  ;;  %5393 = vmatpush1.bf16.msra.mxu0 %v6182_v31  ;;  %v6244_v30 = vcombine.low %v3814_v25, %v3818_v26  ;;  %v6246_v31 = vcombine.low %v3815_v27, %v3819_v29 }
 0x85f   :  { %5312 = vmatprep.subr.bf16.mxu1 %v6189_v32  ;;  %5394 = vmatprep.subr.bf16.mxu0 %v6191_v33  ;;  %v6247_v32 = vcombine.high %v3815_v27, %v3819_v29  ;;  %v3822_v33 = vld [vmem:[#allocation16 + $0x300] sm:$0xff] }
 0x860   :  { %v6253_v36 = vcombine.high %v3822_v33, %v3826_v34 }
 0x862   :  { %5313 = vmatpush1.bf16.msra.mxu1 %v6188_v39  ;;  %5395 = vmatpush1.bf16.msra.mxu0 %v6190_v40  ;;  %v6252_v39 = vcombine.low %v3822_v33, %v3826_v34  ;;  %v6254_v40 = vcombine.low %v3823_v35, %v3827_v38 }
 0x863   :  { %5314 = vmatprep.subr.bf16.mxu1 %v6197_v41  ;;  %5396 = vmatprep.subr.bf16.mxu0 %v6199_v42  ;;  %v6255_v41 = vcombine.high %v3823_v35, %v3827_v38  ;;  %v3830_v42 = vld [vmem:[#allocation16 + $0x340] sm:$0xff] }
 0x866   :  { %5315 = vmatpush1.bf16.msra.mxu1 %v6196_v43  ;;  %5397 = vmatpush1.bf16.msra.mxu0 %v6198_v44  ;;  %v3834_v43 = vld [vmem:[#allocation16 + $0x360] sm:$0xff]  ;;  %v3831_v44 = vld [vmem:[#allocation16 + $0x348] sm:$0xff] }
 0x867   :  { %5316 = vmatprep.subr.bf16.mxu1 %v6205_v48  ;;  %5398 = vmatprep.subr.bf16.mxu0 %v6207_v56  ;;  %v6261_v45 = vcombine.high %v3830_v42, %v3834_v43  ;;  %v6260_v47 = vcombine.low %v3830_v42, %v3834_v43  ;;  %v6262_v48 = vcombine.low %v3831_v44, %v3835_v46  ;;  %v3839_v56 = vld [vmem:[#allocation16 + $0x388] sm:$0xff] }
 0x868   :  { %v6263_v49 = vcombine.high %v3831_v44, %v3835_v46  ;;  %v6271_v61 = vcombine.high %v3839_v56, %v3843_v58 }
 0x86a   :  { %5317 = vmatpush1.bf16.msra.mxu1 %v6204_v52  ;;  %5399 = vmatpush1.bf16.msra.mxu0 %v6206_v55  ;;  %v3838_v52 = vld [vmem:[#allocation16 + $0x380] sm:$0xff] }
 0x86b   :  { %5318 = vmatprep.subr.bf16.mxu1 %v6213_v60  ;;  %5400 = vmatprep.subr.bf16.mxu0 %v6215_v0  ;;  %v3842_v55 = vld [vmem:[#allocation16 + $0x3a0] sm:$0xff]  ;;  %v6270_v60 = vcombine.low %v3839_v56, %v3843_v58  ;;  %v3847_v0 = vld [vmem:[#allocation16 + $0x3c8] sm:$0xff] }
 0x86c   :  { %v6269_v57 = vcombine.high %v3838_v52, %v3842_v55  ;;  %v6268_v59 = vcombine.low %v3838_v52, %v3842_v55  ;;  %v6279_v5 = vcombine.high %v3847_v0, %v3851_v2 }
 0x86e   :  { %5319 = vmatpush1.bf16.msra.mxu1 %v6212_v62  ;;  %5401 = vmatpush1.bf16.msra.mxu0 %v6214_v63  ;;  %v3846_v62 = vld [vmem:[#allocation16 + $0x3c0] sm:$0xff] }
 0x86f   :  { %5320 = vmatprep.subr.bf16.mxu1 %v6221_v4  ;;  %5402 = vmatprep.subr.bf16.mxu0 %v6223_v8  ;;  %v3850_v63 = vld [vmem:[#allocation16 + $0x3e0] sm:$0xff]  ;;  %v6278_v4 = vcombine.low %v3847_v0, %v3851_v2  ;;  %v8053_v8 = vld [vmem:[#allocation16 + $0x408] sm:$0xff] }
 0x870   :  { %v6277_v1 = vcombine.high %v3846_v62, %v3850_v63  ;;  %v6276_v3 = vcombine.low %v3846_v62, %v3850_v63  ;;  %v6287_v13 = vcombine.high %v8053_v8, %v8057_v10  ;;  %v3866_v62 = vld [vmem:[#allocation16 + $0x460] sm:$0xff]  ;;  %v3863_v63 = vld [vmem:[#allocation16 + $0x448] sm:$0xff] }
 0x871   :  { %v3867_v0 = vld [vmem:[#allocation16 + $0x468] sm:$0xff] }
 0x872   :  { %5321 = vmatpush1.bf16.msra.mxu1 %v6220_v6  ;;  %5403 = vmatpush1.bf16.msra.mxu0 %v6222_v7  ;;  %v8049_v6 = vld [vmem:[#allocation16 + $0x400] sm:$0xff] }
 0x873   :  { %5322 = vmatprep.subr.bf16.mxu1 %v6229_v12  ;;  %5404 = vmatprep.subr.bf16.mxu0 %v6231_v16  ;;  %v8051_v7 = vld [vmem:[#allocation16 + $0x420] sm:$0xff]  ;;  %v6286_v12 = vcombine.low %v8053_v8, %v8057_v10 }
 0x874   :  { %v6285_v9 = vcombine.high %v8049_v6, %v8051_v7  ;;  %v6284_v11 = vcombine.low %v8049_v6, %v8051_v7 }
 0x876   :  { %5323 = vmatpush1.bf16.msra.mxu1 %v6228_v14  ;;  %5405 = vmatpush1.bf16.msra.mxu0 %v6230_v15  ;;  %v8068_v14 = vld [vmem:[%s8176_s15] sm:$0xf] }
 0x877   :  { %5324 = vmatprep.subr.bf16.mxu1 %v6237_v20  ;;  %5406 = vmatprep.subr.bf16.mxu0 %v6239_v24  ;;  %v3263_v15 = vrot.slane %v8068_v14, %v7890_v51  ;;  %v3267_v16 = vrot.slane %v8068_v14, %v7895_v53  ;;  %v3275_v17 = vrot.slane %v8068_v14, %v7898_v54 }
 0x878   :  { %v3271_v6 = vrot.slane %v8068_v14, %v7915_v37 }
 0x87a   :  { %5325 = vmatpush1.bf16.msra.mxu1 %v6236_v22  ;;  %5407 = vmatpush1.bf16.msra.mxu0 %v6238_v23 }
 0x87b   :  { %5326 = vmatprep.subr.bf16.mxu1 %v6245_v28  ;;  %5408 = vmatprep.subr.bf16.mxu0 %v6247_v32 }
 0x87e   :  { %5327 = vmatpush1.bf16.msra.mxu1 %v6244_v30  ;;  %5409 = vmatpush1.bf16.msra.mxu0 %v6246_v31 }
 0x87f   :  { %5328 = vmatprep.subr.bf16.mxu1 %v6253_v36  ;;  %5410 = vmatprep.subr.bf16.mxu0 %v6255_v41 }
 0x882   :  { %5329 = vmatpush1.bf16.msra.mxu1 %v6252_v39  ;;  %5411 = vmatpush1.bf16.msra.mxu0 %v6254_v40 }
 0x883   :  { %5330 = vmatprep.subr.bf16.mxu1 %v6261_v45  ;;  %5412 = vmatprep.subr.bf16.mxu0 %v6263_v49 }
 0x886   :  { %5331 = vmatpush1.bf16.msra.mxu1 %v6260_v47  ;;  %5413 = vmatpush1.bf16.msra.mxu0 %v6262_v48 }
 0x887   :  { %5332 = vmatprep.subr.bf16.mxu1 %v6269_v57  ;;  %5414 = vmatprep.subr.bf16.mxu0 %v6271_v61 }
 0x88a   :  { %5333 = vmatpush1.bf16.msra.mxu1 %v6268_v59  ;;  %5415 = vmatpush1.bf16.msra.mxu0 %v6270_v60  ;;  %v3862_v60 = vld [vmem:[#allocation16 + $0x440] sm:$0xff] }
 0x88b   :  { %5334 = vmatprep.subr.bf16.mxu1 %v6277_v1  ;;  %5416 = vmatprep.subr.bf16.mxu0 %v6279_v5  ;;  %v6295_v5 = vcombine.high %v3863_v63, %v3867_v0 }
 0x88e   :  { %5335 = vmatpush1.bf16.msra.mxu1 %v6276_v3  ;;  %5417 = vmatpush1.bf16.msra.mxu0 %v6278_v4  ;;  %v3870_v3 = vld [vmem:[#allocation16 + $0x480] sm:$0xff]  ;;  %v6293_v4 = vcombine.high %v3862_v60, %v3866_v62 }
 0x88f   :  { %5345 = vmatprep.subr.bf16.mxu1 %v6285_v9  ;;  %5427 = vmatprep.subr.bf16.mxu0 %v6287_v13  ;;  %v3874_v9 = vld [vmem:[#allocation16 + $0x4a0] sm:$0xff]  ;;  %v3871_v13 = vld [vmem:[#allocation16 + $0x488] sm:$0xff] }
 0x890   :  { %v6300_v7 = vcombine.low %v3870_v3, %v3874_v9 }
 0x924   :  { %v3634_v18 = vpop.f32.mrb[20].mxu1  ;;  %v8076_v19 = vpop.f32.mrb[8].mxu0 }
 0x925   :  { %v3635_v20 = vadd.f32 %v3634_v18, %v3263_v15  ;;  %v3636_v21 = vpop.f32.mrb[21].mxu1  ;;  %v3677_v22 = vpop.f32.mrb[9].mxu0  ;;  %v3875_v15 = vld [vmem:[#allocation16 + $0x4a8] sm:$0xff]  ;;  %v6294_v18 = vcombine.low %v3863_v63, %v3867_v0  ;;  %v3918_v0 = vld [vmem:[#allocation16 + $0x600] sm:$0xff] }
 0x926   :  { %v3637_v23 = vadd.f32 %v3636_v21, %v3267_v16  ;;  %v3678_v24 = vadd.f32 %v3677_v22, %v3275_v17  ;;  %v3638_v25 = vpop.f32.mrb[22].mxu1  ;;  %v3679_v26 = vpop.f32.mrb[10].mxu0  ;;  %v6292_v17 = vcombine.low %v3862_v60, %v3866_v62  ;;  %v6303_v21 = vcombine.high %v3871_v13, %v3875_v15  ;;  %v3878_v22 = vld [vmem:[#allocation16 + $0x4c0] sm:$0xff] }
 0x927   :  { %v3682_v27 = vand.u32 2147483647, %v3635_v20  ;;  %v3639_v31 = vpop.f32.mrb[23].mxu1  ;;  %v3680_v32 = vpop.f32.mrb[11].mxu0  ;;  %vm3698_vm12 = vcmp.ge.f32.partialorder %v3635_v20, 0.0  ;;  %v3883_v25 = vld [vmem:[#allocation16 + $0x4e8] sm:$0xff]  ;;  %v6302_v8 = vcombine.low %v3871_v13, %v3875_v15 }
 0x928   :  { %v3683_v28 = vand.u32 2147483647, %v3637_v23  ;;  %v3685_v29 = vand.u32 2147483647, %v3678_v24  ;;  %vm3699_vm13 = vcmp.ge.f32.partialorder %v3637_v23, 0.0  ;;  %vm3701_vm14 = vcmp.ge.f32.partialorder %v3678_v24, 0.0 }
 0x929   :  { %v3686_v30 = vsub.f32 0.0, %v3682_v27  ;;  %v3890_v26 = vld [vmem:[#allocation16 + $0x520] sm:$0xff]  ;;  %v3887_v27 = vld [vmem:[#allocation16 + $0x508] sm:$0xff] }
 0x92a   :  { %v3687_v33 = vsub.f32 0.0, %v3683_v28  ;;  %v3689_v34 = vsub.f32 0.0, %v3685_v29  ;;  %v3891_v28 = vld [vmem:[#allocation16 + $0x528] sm:$0xff]  ;;  %v8099_v29 = vadd.f32 %v8076_v19, %v3271_v6 }
 0x92b   :  { %v3690_v35 = vmul.f32 1.442695, %v3686_v30  ;;  %v6319_v32 = vcombine.high %v3887_v27, %v3891_v28 }
 0x92c   :  { %v3692_v36 = vmul.f32 1.442695, %v3687_v33  ;;  %v3696_v38 = vmul.f32 1.442695, %v3689_v34  ;;  %v3894_v33 = vld [vmem:[#allocation16 + $0x540] sm:$0xff]  ;;  %vm3700_vm15 = vcmp.ge.f32.partialorder %v8099_v29, 0.0 }
 0x92d   :  { %7222 = vpow2.f32 %v3690_v35  ;;  %v3898_v34 = vld [vmem:[#allocation16 + $0x560] sm:$0xff]  ;;  %v3895_v35 = vld [vmem:[#allocation16 + $0x548] sm:$0xff] }
 0x92e   :  { %7224 = vpow2.f32 %v3692_v36  ;;  %v3899_v36 = vld [vmem:[#allocation16 + $0x568] sm:$0xff]  ;;  %v6325_v19 = vcombine.high %v3894_v33, %v3898_v34 }
 0x92f   :  { %7226 = vpow2.f32 %v3696_v38  ;;  %v3684_v38 = vand.u32 2147483647, %v8099_v29 }
 0x937   :  { %v7223_v39 = vpop.eup %7222 }
 0x938   :  { %v3706_v40 = vadd.f32 1.0, %v7223_v39  ;;  %v7225_v41 = vpop.eup %7224  ;;  %v3702_v46 = vsel %vm3698_vm12, 1.0, %v7223_v39 }
 0x939   :  { %v7227_v42 = vpop.eup %7226  ;;  %v3707_v43 = vadd.f32 1.0, %v7225_v41  ;;  %v3703_v49 = vsel %vm3699_vm13, 1.0, %v7225_v41  ;;  %v6327_v41 = vcombine.high %v3895_v35, %v3899_v36 }
 0x93a   :  { %7228 = vrcp.f32 %v3706_v40  ;;  %v3709_v44 = vadd.f32 1.0, %v7227_v42  ;;  %v3705_v56 = vsel %vm3701_vm14, 1.0, %v7227_v42  ;;  %v6318_v40 = vcombine.low %v3887_v27, %v3891_v28  ;;  %v3902_v42 = vld [vmem:[#allocation16 + $0x580] sm:$0xff] }
 0x93b   :  { %7230 = vrcp.f32 %v3707_v43  ;;  %v3906_v43 = vld [vmem:[#allocation16 + $0x5a0] sm:$0xff] }
 0x93c   :  { %7232 = vrcp.f32 %v3709_v44  ;;  %v3903_v44 = vld [vmem:[#allocation16 + $0x588] sm:$0xff]  ;;  %v6332_v60 = vcombine.low %v3902_v42, %v3906_v43 }
 0x944   :  { %v7229_v45 = vpop.eup %7228 }
 0x945   :  { %v3714_v47 = vmul.f32 %v7229_v45, %v3702_v46  ;;  %v7231_v48 = vpop.eup %7230  ;;  %v3907_v45 = vld [vmem:[#allocation16 + $0x5a8] sm:$0xff]  ;;  %v3688_v46 = vsub.f32 0.0, %v3684_v38 }
 0x946   :  { %v7233_v52 = vpop.eup %7232  ;;  %v3715_v55 = vmul.f32 %v7231_v48, %v3703_v49  ;;  %v6326_v48 = vcombine.low %v3895_v35, %v3899_v36  ;;  %v6333_v49 = vcombine.high %v3902_v42, %v3906_v43  ;;  %v3955_v42 = vld [vmem:[#allocation16 + $0x728] sm:$0xff] }
 0x947   :  { %v3718_v57 = vmul.f32 %v3714_v47, %v3635_v20  ;;  %v3717_v58 = vmul.f32 %v7233_v52, %v3705_v56  ;;  %v6301_v20 = vcombine.high %v3870_v3, %v3874_v9  ;;  %v6324_v47 = vcombine.low %v3894_v33, %v3898_v34  ;;  %v3914_v56 = vld [vmem:[#allocation16 + $0x5e0] sm:$0xff]  ;;  %v3947_v33 = vld [vmem:[#allocation16 + $0x6e8] sm:$0xff] }
 0x948   :  { %v3719_v59 = vmul.f32 %v3715_v55, %v3637_v23  ;;  %v3882_v23 = vld [vmem:[#allocation16 + $0x4e0] sm:$0xff]  ;;  %v6335_v52 = vcombine.high %v3903_v44, %v3907_v45 }
 0x949   :  { %v3721_v61 = vmul.f32 %v3717_v58, %v3678_v24  ;;  %v8080_v2 = vpack.c.bf16 %v3718_v57, %v3718_v57  ;;  %v3879_v24 = vld [vmem:[#allocation16 + $0x4c8] sm:$0xff]  ;;  %v6309_v10 = vcombine.high %v3878_v22, %v3882_v23  ;;  %v6308_v30 = vcombine.low %v3878_v22, %v3882_v23  ;;  %v3910_v55 = vld [vmem:[#allocation16 + $0x5c0] sm:$0xff] }
 0x94a   :  { %v8078_v1 = vpack.c.bf16 %v3719_v59, %v3719_v59  ;;  %v6310_v31 = vcombine.low %v3879_v24, %v3883_v25  ;;  %v3911_v57 = vld [vmem:[#allocation16 + $0x5c8] sm:$0xff]  ;;  %v3694_v59 = vmul.f32 1.442695, %v3688_v46  ;;  %v6341_v62 = vcombine.high %v3910_v55, %v3914_v56  ;;  %v3922_v3 = vld [vmem:[#allocation16 + $0x620] sm:$0xff] }
 0x94b   :  { %v8084_v16 = vpack.c.bf16 %v3721_v61, %v3721_v61  ;;  %v3915_v58 = vld [vmem:[#allocation16 + $0x5e8] sm:$0xff]  ;;  %v6334_v61 = vcombine.low %v3903_v44, %v3907_v45  ;;  %v6340_v9 = vcombine.low %v3910_v55, %v3914_v56  ;;  %v6349_v15 = vcombine.high %v3918_v0, %v3922_v3 }
 0x94c   :  { %5336 = vmatprep.mubr.bf16.mxu1 %v8078_v1  ;;  %5418 = vmatprep.mubr.bf16.mxu0 %v8078_v1  ;;  %v6343_v63 = vcombine.high %v3911_v57, %v3915_v58  ;;  %7234 = vpow2.f32 %v3694_v59  ;;  %v6342_v13 = vcombine.low %v3911_v57, %v3915_v58  ;;  %v3931_v22 = vld [vmem:[#allocation16 + $0x668] sm:$0xff]  ;;  %v6348_v23 = vcombine.low %v3918_v0, %v3922_v3  ;;  %v3966_v59 = vld [vmem:[#allocation16 + $0x780] sm:$0xff] }
 0x94d   :  { %5337 = vmatmul.mubr.bf16.vlgmr.msra.gmra.mrb[24].mxu1 %v8080_v2  ;;  %5419 = vmatmul.mubr.bf16.vlgmr.msra.gmra.mrb[12].mxu0 %v8080_v2 }
 0x94e   :  { %5346 = vmatpush1.bf16.msra.mxu1 %v6284_v11  ;;  %5428 = vmatpush1.bf16.msra.mxu0 %v6286_v12  ;;  %v6311_v11 = vcombine.high %v3879_v24, %v3883_v25  ;;  %v3886_v12 = vld [vmem:[#allocation16 + $0x500] sm:$0xff] }
 0x94f   :  { %5377 = vmatprep.mubr.bf16.mxu1 %v8084_v16  ;;  %5459 = vmatprep.mubr.bf16.mxu0 %v8084_v16  ;;  %v6317_v14 = vcombine.high %v3886_v12, %v3890_v26  ;;  %v6316_v39 = vcombine.low %v3886_v12, %v3890_v26 }
 0x950   :  { %5347 = vmatprep.subr.bf16.mxu1 %v6293_v4  ;;  %5429 = vmatprep.subr.bf16.mxu0 %v6295_v5  ;;  %v3919_v4 = vld [vmem:[#allocation16 + $0x608] sm:$0xff] }
 0x951   :  { %v3923_v5 = vld [vmem:[#allocation16 + $0x628] sm:$0xff] }
 0x952   :  { %5348 = vmatpush1.bf16.msra.mxu1 %v6292_v17  ;;  %5430 = vmatpush1.bf16.msra.mxu0 %v6294_v18  ;;  %v6351_v17 = vcombine.high %v3919_v4, %v3923_v5  ;;  %v3926_v18 = vld [vmem:[#allocation16 + $0x640] sm:$0xff]  ;;  %v6350_v24 = vcombine.low %v3919_v4, %v3923_v5 }
 0x953   :  { %5349 = vmatprep.subr.bf16.mxu1 %v6301_v20  ;;  %5431 = vmatprep.subr.bf16.mxu0 %v6303_v21  ;;  %v3930_v20 = vld [vmem:[#allocation16 + $0x660] sm:$0xff]  ;;  %v3927_v21 = vld [vmem:[#allocation16 + $0x648] sm:$0xff] }
 0x954   :  { %v6357_v25 = vcombine.high %v3926_v18, %v3930_v20  ;;  %v6359_v6 = vcombine.high %v3927_v21, %v3931_v22  ;;  %v6356_v12 = vcombine.low %v3926_v18, %v3930_v20  ;;  %v6358_v26 = vcombine.low %v3927_v21, %v3931_v22  ;;  %v3974_v5 = vld [vmem:[#allocation16 + $0x7c0] sm:$0xff] }
 0x956   :  { %5350 = vmatpush1.bf16.msra.mxu1 %v6300_v7  ;;  %5432 = vmatpush1.bf16.msra.mxu0 %v6302_v8  ;;  %v3934_v7 = vld [vmem:[#allocation16 + $0x680] sm:$0xff]  ;;  %v7235_v27 = vpop.eup %7234 }
 0x957   :  { %5351 = vmatprep.subr.bf16.mxu1 %v6309_v10  ;;  %5433 = vmatprep.subr.bf16.mxu0 %v6311_v11  ;;  %v3938_v8 = vld [vmem:[#allocation16 + $0x6a0] sm:$0xff]  ;;  %v3935_v10 = vld [vmem:[#allocation16 + $0x688] sm:$0xff]  ;;  %v3708_v34 = vadd.f32 1.0, %v7235_v27  ;;  %v3704_v18 = vsel %vm3700_vm15, 1.0, %v7235_v27 }
 0x958   :  { %v3939_v11 = vld [vmem:[#allocation16 + $0x6a8] sm:$0xff]  ;;  %v6365_v28 = vcombine.high %v3934_v7, %v3938_v8  ;;  %v6364_v35 = vcombine.low %v3934_v7, %v3938_v8  ;;  %v3729_v7 = vld [vmem:[#allocation16 + $0x18] sm:$0xff] }
 0x959   :  { %v6366_v36 = vcombine.low %v3935_v10, %v3939_v11  ;;  %7236 = vrcp.f32 %v3708_v34  ;;  %v3733_v8 = vld [vmem:[#allocation16 + $0x38] sm:$0xff] }
 0x95a   :  { %5352 = vmatpush1.bf16.msra.mxu1 %v6308_v30  ;;  %5434 = vmatpush1.bf16.msra.mxu0 %v6310_v31  ;;  %v6367_v30 = vcombine.high %v3935_v10, %v3939_v11  ;;  %v3942_v31 = vld [vmem:[#allocation16 + $0x6c0] sm:$0xff]  ;;  %v6163_v27 = vcombine.high %v3729_v7, %v3733_v8  ;;  %v6162_v34 = vcombine.low %v3729_v7, %v3733_v8  ;;  %v3788_v7 = vld [vmem:[#allocation16 + $0x1f0] sm:$0xff]  ;;  %v3785_v8 = vld [vmem:[#allocation16 + $0x1d8] sm:$0xff] }
 0x95b   :  { %5353 = vmatprep.subr.bf16.mxu1 %v6317_v14  ;;  %5435 = vmatprep.subr.bf16.mxu0 %v6319_v32  ;;  %v3946_v14 = vld [vmem:[#allocation16 + $0x6e0] sm:$0xff]  ;;  %v3943_v32 = vld [vmem:[#allocation16 + $0x6c8] sm:$0xff] }
 0x95c   :  { %v6373_v38 = vcombine.high %v3942_v31, %v3946_v14  ;;  %v6372_v43 = vcombine.low %v3942_v31, %v3946_v14  ;;  %v6374_v44 = vcombine.low %v3943_v32, %v3947_v33  ;;  %v3737_v31 = vld [vmem:[#allocation16 + $0x58] sm:$0xff] }
 0x95d   :  { %v3741_v14 = vld [vmem:[#allocation16 + $0x78] sm:$0xff] }
 0x95e   :  { %5354 = vmatpush1.bf16.msra.mxu1 %v6316_v39  ;;  %5436 = vmatpush1.bf16.msra.mxu0 %v6318_v40  ;;  %v6375_v39 = vcombine.high %v3943_v32, %v3947_v33  ;;  %v3950_v40 = vld [vmem:[#allocation16 + $0x700] sm:$0xff] }
 0x95f   :  { %5355 = vmatprep.subr.bf16.mxu1 %v6325_v19  ;;  %5437 = vmatprep.subr.bf16.mxu0 %v6327_v41  ;;  %v3954_v19 = vld [vmem:[#allocation16 + $0x720] sm:$0xff]  ;;  %v3951_v41 = vld [vmem:[#allocation16 + $0x708] sm:$0xff] }
 0x960   :  { %v6381_v45 = vcombine.high %v3950_v40, %v3954_v19  ;;  %v6383_v46 = vcombine.high %v3951_v41, %v3955_v42  ;;  %v6380_v55 = vcombine.low %v3950_v40, %v3954_v19  ;;  %v6382_v56 = vcombine.low %v3951_v41, %v3955_v42  ;;  %v3749_v40 = vld [vmem:[#allocation16 + $0xb8] sm:$0xff] }
 0x961   :  { %v6170_v41 = vcombine.low %v3737_v31, %v3741_v14 }
 0x962   :  { %5356 = vmatpush1.bf16.msra.mxu1 %v6324_v47  ;;  %5438 = vmatpush1.bf16.msra.mxu0 %v6326_v48  ;;  %v3958_v47 = vld [vmem:[#allocation16 + $0x740] sm:$0xff] }
 0x963   :  { %5357 = vmatprep.subr.bf16.mxu1 %v6333_v49  ;;  %5439 = vmatprep.subr.bf16.mxu0 %v6335_v52  ;;  %v3962_v48 = vld [vmem:[#allocation16 + $0x760] sm:$0xff]  ;;  %v3959_v49 = vld [vmem:[#allocation16 + $0x748] sm:$0xff] }
 0x964   :  { %v3963_v52 = vld [vmem:[#allocation16 + $0x768] sm:$0xff]  ;;  %v6389_v57 = vcombine.high %v3958_v47, %v3962_v48 }
 0x965   :  { %v6391_v58 = vcombine.high %v3959_v49, %v3963_v52  ;;  %v6390_v0 = vcombine.low %v3959_v49, %v3963_v52 }
 0x966   :  { %5358 = vmatpush1.bf16.msra.mxu1 %v6332_v60  ;;  %5440 = vmatpush1.bf16.msra.mxu0 %v6334_v61  ;;  %v3970_v60 = vld [vmem:[#allocation16 + $0x7a0] sm:$0xff]  ;;  %v3967_v61 = vld [vmem:[#allocation16 + $0x788] sm:$0xff] }
 0x967   :  { %5359 = vmatprep.subr.bf16.mxu1 %v6341_v62  ;;  %5441 = vmatprep.subr.bf16.mxu0 %v6343_v63  ;;  %v3971_v62 = vld [vmem:[#allocation16 + $0x7a8] sm:$0xff]  ;;  %v6388_v63 = vcombine.low %v3958_v47, %v3962_v48  ;;  %v6397_v3 = vcombine.high %v3966_v59, %v3970_v60  ;;  %v6396_v20 = vcombine.low %v3966_v59, %v3970_v60  ;;  %v3757_v47 = vld [vmem:[#allocation16 + $0xf8] sm:$0xff] }
 0x968   :  { %v6399_v4 = vcombine.high %v3967_v61, %v3971_v62  ;;  %v6398_v21 = vcombine.low %v3967_v61, %v3971_v62 }
 0x96a   :  { %5360 = vmatpush1.bf16.msra.mxu1 %v6340_v9  ;;  %5442 = vmatpush1.bf16.msra.mxu0 %v6342_v13  ;;  %v7237_v9 = vpop.eup %7236  ;;  %v3978_v13 = vld [vmem:[#allocation16 + $0x7e0] sm:$0xff] }
 0x96b   :  { %5361 = vmatprep.subr.bf16.mxu1 %v6349_v15  ;;  %5443 = vmatprep.subr.bf16.mxu0 %v6351_v17  ;;  %v3975_v15 = vld [vmem:[#allocation16 + $0x7c8] sm:$0xff]  ;;  %v3716_v22 = vmul.f32 %v7237_v9, %v3704_v18  ;;  %v6404_v10 = vcombine.low %v3974_v5, %v3978_v13  ;;  %v3780_v18 = vld [vmem:[#allocation16 + $0x1b0] sm:$0xff] }
 0x96c   :  { %v3979_v17 = vld [vmem:[#allocation16 + $0x7e8] sm:$0xff] }
 0x96d   :  { %v6406_v11 = vcombine.low %v3975_v15, %v3979_v17 }
 0x96e   :  { %5362 = vmatpush1.bf16.msra.mxu1 %v6348_v23  ;;  %5444 = vmatpush1.bf16.msra.mxu0 %v6350_v24  ;;  %v6405_v23 = vcombine.high %v3974_v5, %v3978_v13  ;;  %v6407_v24 = vcombine.high %v3975_v15, %v3979_v17  ;;  %v3776_v17 = vld [vmem:[#allocation16 + $0x190] sm:$0xff] }
 0x96f   :  { %5363 = vmatprep.subr.bf16.mxu1 %v6357_v25  ;;  %5445 = vmatprep.subr.bf16.mxu0 %v6359_v6  ;;  %v3728_v25 = vld [vmem:[#allocation16 + $0x10] sm:$0xff] }
 0x970   :  { %v3732_v6 = vld [vmem:[#allocation16 + $0x30] sm:$0xff] }
 0x971   :  { %v6160_v32 = vcombine.low %v3728_v25, %v3732_v6 }
 0x972   :  { %5364 = vmatpush1.bf16.msra.mxu1 %v6356_v12  ;;  %5446 = vmatpush1.bf16.msra.mxu0 %v6358_v26  ;;  %v3720_v12 = vmul.f32 %v3716_v22, %v8099_v29  ;;  %v6161_v26 = vcombine.high %v3728_v25, %v3732_v6  ;;  %v3748_v29 = vld [vmem:[#allocation16 + $0xb0] sm:$0xff] }
 0x973   :  { %5365 = vmatprep.subr.bf16.mxu1 %v6365_v28  ;;  %5447 = vmatprep.subr.bf16.mxu0 %v6367_v30  ;;  %v3736_v28 = vld [vmem:[#allocation16 + $0x50] sm:$0xff] }
 0x974   :  { %v3740_v30 = vld [vmem:[#allocation16 + $0x70] sm:$0xff]  ;;  %v8104_v33 = vpack.c.bf16 %v3720_v12, %v3720_v12 }
 0x975   :  { %v6168_v19 = vcombine.low %v3736_v28, %v3740_v30  ;;  %v3784_v6 = vld [vmem:[#allocation16 + $0x1d0] sm:$0xff] }
 0x976   :  { %5366 = vmatpush1.bf16.msra.mxu1 %v6364_v35  ;;  %5448 = vmatpush1.bf16.msra.mxu0 %v6366_v36  ;;  %v6169_v35 = vcombine.high %v3736_v28, %v3740_v30  ;;  %v6171_v36 = vcombine.high %v3737_v31, %v3741_v14  ;;  %v3792_v28 = vld [vmem:[#allocation16 + $0x210] sm:$0xff]  ;;  %v3793_v31 = vld [vmem:[#allocation16 + $0x218] sm:$0xff] }
 0x977   :  { %5367 = vmatprep.subr.bf16.mxu1 %v6373_v38  ;;  %5449 = vmatprep.subr.bf16.mxu0 %v6375_v39  ;;  %v3744_v38 = vld [vmem:[#allocation16 + $0x90] sm:$0xff]  ;;  %v3745_v39 = vld [vmem:[#allocation16 + $0x98] sm:$0xff] }
 0x978   :  { %v6177_v42 = vcombine.high %v3744_v38, %v3748_v29  ;;  %v6176_v48 = vcombine.low %v3744_v38, %v3748_v29  ;;  %v6178_v49 = vcombine.low %v3745_v39, %v3749_v40  ;;  %v3796_v30 = vld [vmem:[#allocation16 + $0x230] sm:$0xff]  ;;  %v3797_v14 = vld [vmem:[#allocation16 + $0x238] sm:$0xff] }
 0x979   :  { %v3800_v38 = vld [vmem:[#allocation16 + $0x250] sm:$0xff] }
 0x97a   :  { %5368 = vmatpush1.bf16.msra.mxu1 %v6372_v43  ;;  %5450 = vmatpush1.bf16.msra.mxu0 %v6374_v44  ;;  %v6179_v43 = vcombine.high %v3745_v39, %v3749_v40  ;;  %v3752_v44 = vld [vmem:[#allocation16 + $0xd0] sm:$0xff]  ;;  %v3801_v39 = vld [vmem:[#allocation16 + $0x258] sm:$0xff] }
 0x97b   :  { %5369 = vmatprep.subr.bf16.mxu1 %v6381_v45  ;;  %5451 = vmatprep.subr.bf16.mxu0 %v6383_v46  ;;  %v3756_v45 = vld [vmem:[#allocation16 + $0xf0] sm:$0xff]  ;;  %v3753_v46 = vld [vmem:[#allocation16 + $0xd8] sm:$0xff] }
 0x97c   :  { %v6185_v52 = vcombine.high %v3752_v44, %v3756_v45  ;;  %v6184_v59 = vcombine.low %v3752_v44, %v3756_v45  ;;  %v6186_v60 = vcombine.low %v3753_v46, %v3757_v47  ;;  %v3804_v29 = vld [vmem:[#allocation16 + $0x270] sm:$0xff]  ;;  %v3805_v40 = vld [vmem:[#allocation16 + $0x278] sm:$0xff] }
 0x97d   :  { %v3808_v44 = vld [vmem:[#allocation16 + $0x290] sm:$0xff] }
 0x97e   :  { %5370 = vmatpush1.bf16.msra.mxu1 %v6380_v55  ;;  %5452 = vmatpush1.bf16.msra.mxu0 %v6382_v56  ;;  %v6187_v55 = vcombine.high %v3753_v46, %v3757_v47  ;;  %v3760_v56 = vld [vmem:[#allocation16 + $0x110] sm:$0xff]  ;;  %v3809_v46 = vld [vmem:[#allocation16 + $0x298] sm:$0xff] }
 0x97f   :  { %5371 = vmatprep.subr.bf16.mxu1 %v6389_v57  ;;  %5453 = vmatprep.subr.bf16.mxu0 %v6391_v58  ;;  %v3764_v57 = vld [vmem:[#allocation16 + $0x130] sm:$0xff]  ;;  %v3765_v58 = vld [vmem:[#allocation16 + $0x138] sm:$0xff] }
 0x980   :  { %v6193_v61 = vcombine.high %v3760_v56, %v3764_v57  ;;  %v6192_v5 = vcombine.low %v3760_v56, %v3764_v57  ;;  %v3812_v45 = vld [vmem:[#allocation16 + $0x2b0] sm:$0xff]  ;;  %v3813_v47 = vld [vmem:[#allocation16 + $0x2b8] sm:$0xff] }
 0x981   :  { %v3816_v56 = vld [vmem:[#allocation16 + $0x2d0] sm:$0xff] }
 0x982   :  { %5372 = vmatpush1.bf16.msra.mxu1 %v6388_v63  ;;  %5454 = vmatpush1.bf16.msra.mxu0 %v6390_v0  ;;  %v3768_v63 = vld [vmem:[#allocation16 + $0x150] sm:$0xff] }
 0x983   :  { %5373 = vmatprep.subr.bf16.mxu1 %v6397_v3  ;;  %5455 = vmatprep.subr.bf16.mxu0 %v6399_v4  ;;  %v3772_v0 = vld [vmem:[#allocation16 + $0x170] sm:$0xff]  ;;  %v3769_v3 = vld [vmem:[#allocation16 + $0x158] sm:$0xff] }
 0x984   :  { %v3773_v4 = vld [vmem:[#allocation16 + $0x178] sm:$0xff]  ;;  %v6201_v13 = vcombine.high %v3768_v63, %v3772_v0  ;;  %v6200_v22 = vcombine.low %v3768_v63, %v3772_v0  ;;  %v3820_v57 = vld [vmem:[#allocation16 + $0x2f0] sm:$0xff] }
 0x985   :  { %v6203_v15 = vcombine.high %v3769_v3, %v3773_v4  ;;  %v3824_v63 = vld [vmem:[#allocation16 + $0x310] sm:$0xff] }
 0x986   :  { %5374 = vmatpush1.bf16.msra.mxu1 %v6396_v20  ;;  %5456 = vmatpush1.bf16.msra.mxu0 %v6398_v21  ;;  %v3777_v20 = vld [vmem:[#allocation16 + $0x198] sm:$0xff]  ;;  %v3828_v0 = vld [vmem:[#allocation16 + $0x330] sm:$0xff] }
 0x987   :  { %5375 = vmatprep.subr.bf16.mxu1 %v6405_v23  ;;  %5457 = vmatprep.subr.bf16.mxu0 %v6407_v24  ;;  %v3781_v21 = vld [vmem:[#allocation16 + $0x1b8] sm:$0xff]  ;;  %v6202_v23 = vcombine.low %v3769_v3, %v3773_v4  ;;  %v6209_v24 = vcombine.high %v3776_v17, %v3780_v18 }
 0x988   :  { %v6211_v25 = vcombine.high %v3777_v20, %v3781_v21  ;;  %v6210_v12 = vcombine.low %v3777_v20, %v3781_v21  ;;  %v3825_v3 = vld [vmem:[#allocation16 + $0x318] sm:$0xff] }
 0x989   :  { %v3829_v4 = vld [vmem:[#allocation16 + $0x338] sm:$0xff] }
 0x98a   :  { %5376 = vmatpush1.bf16.msra.mxu1 %v6404_v10  ;;  %5458 = vmatpush1.bf16.msra.mxu0 %v6406_v11  ;;  %v3789_v10 = vld [vmem:[#allocation16 + $0x1f8] sm:$0xff]  ;;  %v6208_v11 = vcombine.low %v3776_v17, %v3780_v18  ;;  %v3832_v17 = vld [vmem:[#allocation16 + $0x350] sm:$0xff] }
 0x98b   :  { %5468 = vmatprep.subr.bf16.mxu1 %v6161_v26  ;;  %5550 = vmatprep.subr.bf16.mxu0 %v6163_v27  ;;  %v6217_v26 = vcombine.high %v3784_v6, %v3788_v7  ;;  %v6219_v27 = vcombine.high %v3785_v8, %v3789_v10  ;;  %v3836_v18 = vld [vmem:[#allocation16 + $0x370] sm:$0xff]  ;;  %v3833_v20 = vld [vmem:[#allocation16 + $0x358] sm:$0xff] }
 0x98c   :  { %v3837_v21 = vld [vmem:[#allocation16 + $0x378] sm:$0xff] }
 0x98d   :  { %5378 = vmatmul.mubr.bf16.vlgmr.msra.gmra.mrb[24].mxu1 %v8104_v33  ;;  %5460 = vmatmul.mubr.bf16.vlgmr.msra.gmra.mrb[12].mxu0 %v8104_v33 }
 0x98e   :  { %5469 = vmatpush1.bf16.msra.mxu1 %v6160_v32  ;;  %5500 = vmatprep.mubr.bf16.mxu1 %v8078_v1  ;;  %v6216_v32 = vcombine.low %v3784_v6, %v3788_v7  ;;  %v3840_v6 = vld [vmem:[#allocation16 + $0x390] sm:$0xff] }
 0x98f   :  { %5551 = vmatpush1.bf16.msra.mxu0 %v6162_v34  ;;  %5582 = vmatprep.mubr.bf16.mxu0 %v8078_v1  ;;  %v3761_v1 = vld [vmem:[#allocation16 + $0x118] sm:$0xff]  ;;  %v6218_v34 = vcombine.low %v3785_v8, %v3789_v10  ;;  %v3844_v7 = vld [vmem:[#allocation16 + $0x3b0] sm:$0xff] }
 0x990   :  { %5470 = vmatprep.subr.bf16.mxu1 %v6169_v35  ;;  %5552 = vmatprep.subr.bf16.mxu0 %v6171_v36  ;;  %v6195_v62 = vcombine.high %v3761_v1, %v3765_v58  ;;  %v6194_v9 = vcombine.low %v3761_v1, %v3765_v58  ;;  %v6225_v35 = vcombine.high %v3792_v28, %v3796_v30  ;;  %v3817_v1 = vld [vmem:[#allocation16 + $0x2d8] sm:$0xff] }
 0x991   :  { %v6227_v36 = vcombine.high %v3793_v31, %v3797_v14  ;;  %v3821_v58 = vld [vmem:[#allocation16 + $0x2f8] sm:$0xff] }
 0x992   :  { %5471 = vmatpush1.bf16.msra.mxu1 %v6168_v19  ;;  %v6224_v19 = vcombine.low %v3792_v28, %v3796_v30  ;;  %v3841_v8 = vld [vmem:[#allocation16 + $0x398] sm:$0xff]  ;;  %v3848_v28 = vld [vmem:[#allocation16 + $0x3d0] sm:$0xff] }
 0x993   :  { %5553 = vmatpush1.bf16.msra.mxu0 %v6170_v41  ;;  %5472 = vmatprep.subr.bf16.mxu1 %v6177_v42  ;;  %v6226_v41 = vcombine.low %v3793_v31, %v3797_v14  ;;  %v6233_v42 = vcombine.high %v3800_v38, %v3804_v29  ;;  %v3845_v10 = vld [vmem:[#allocation16 + $0x3b8] sm:$0xff]  ;;  %v3852_v30 = vld [vmem:[#allocation16 + $0x3f0] sm:$0xff] }
 0x994   :  { %5554 = vmatprep.subr.bf16.mxu0 %v6179_v43  ;;  %v6235_v43 = vcombine.high %v3801_v39, %v3805_v40  ;;  %v3849_v31 = vld [vmem:[#allocation16 + $0x3d8] sm:$0xff] }
 0x995   :  { %v3853_v14 = vld [vmem:[#allocation16 + $0x3f8] sm:$0xff] }
 0x996   :  { %5473 = vmatpush1.bf16.msra.mxu1 %v6176_v48  ;;  %v6232_v48 = vcombine.low %v3800_v38, %v3804_v29  ;;  %v3856_v38 = vld [vmem:[#allocation16 + $0x410] sm:$0xff] }
 0x997   :  { %5555 = vmatpush1.bf16.msra.mxu0 %v6178_v49  ;;  %5474 = vmatprep.subr.bf16.mxu1 %v6185_v52  ;;  %v6234_v49 = vcombine.low %v3801_v39, %v3805_v40  ;;  %v6241_v52 = vcombine.high %v3808_v44, %v3812_v45  ;;  %v3860_v29 = vld [vmem:[#allocation16 + $0x430] sm:$0xff]  ;;  %v3857_v39 = vld [vmem:[#allocation16 + $0x418] sm:$0xff] }
 0x998   :  { %5556 = vmatprep.subr.bf16.mxu0 %v6187_v55  ;;  %v6243_v55 = vcombine.high %v3809_v46, %v3813_v47  ;;  %v3861_v40 = vld [vmem:[#allocation16 + $0x438] sm:$0xff] }
 0x99a   :  { %5475 = vmatpush1.bf16.msra.mxu1 %v6184_v59  ;;  %v6240_v59 = vcombine.low %v3808_v44, %v3812_v45  ;;  %v3864_v44 = vld [vmem:[#allocation16 + $0x450] sm:$0xff] }
 0x99b   :  { %5557 = vmatpush1.bf16.msra.mxu0 %v6186_v60  ;;  %5476 = vmatprep.subr.bf16.mxu1 %v6193_v61  ;;  %v6242_v60 = vcombine.low %v3809_v46, %v3813_v47  ;;  %v6249_v61 = vcombine.high %v3816_v56, %v3820_v57  ;;  %v3868_v45 = vld [vmem:[#allocation16 + $0x470] sm:$0xff]  ;;  %v6288_v46 = vcombine.low %v3856_v38, %v3860_v29  ;;  %v3865_v47 = vld [vmem:[#allocation16 + $0x458] sm:$0xff] }
 0x99c   :  { %5558 = vmatprep.subr.bf16.mxu0 %v6195_v62  ;;  %v6251_v62 = vcombine.high %v3817_v1, %v3821_v58 }
 0x99e   :  { %5477 = vmatpush1.bf16.msra.mxu1 %v6192_v5  ;;  %v6248_v5 = vcombine.low %v3816_v56, %v3820_v57  ;;  %v3876_v56 = vld [vmem:[#allocation16 + $0x4b0] sm:$0xff] }
 0x99f   :  { %5559 = vmatpush1.bf16.msra.mxu0 %v6194_v9  ;;  %5478 = vmatprep.subr.bf16.mxu1 %v6201_v13  ;;  %v6250_v9 = vcombine.low %v3817_v1, %v3821_v58  ;;  %v6257_v13 = vcombine.high %v3824_v63, %v3828_v0  ;;  %v3873_v1 = vld [vmem:[#allocation16 + $0x498] sm:$0xff] }
 0x9a0   :  { %5560 = vmatprep.subr.bf16.mxu0 %v6203_v15  ;;  %v6259_v15 = vcombine.high %v3825_v3, %v3829_v4  ;;  %v3877_v58 = vld [vmem:[#allocation16 + $0x4b8] sm:$0xff] }
 0x9a2   :  { %5479 = vmatpush1.bf16.msra.mxu1 %v6200_v22  ;;  %v6256_v22 = vcombine.low %v3824_v63, %v3828_v0  ;;  %v3880_v63 = vld [vmem:[#allocation16 + $0x4d0] sm:$0xff] }
 0x9a3   :  { %5561 = vmatpush1.bf16.msra.mxu0 %v6202_v23  ;;  %5480 = vmatprep.subr.bf16.mxu1 %v6209_v24  ;;  %v6258_v23 = vcombine.low %v3825_v3, %v3829_v4  ;;  %v6265_v24 = vcombine.high %v3832_v17, %v3836_v18  ;;  %v3884_v0 = vld [vmem:[#allocation16 + $0x4f0] sm:$0xff]  ;;  %v3881_v3 = vld [vmem:[#allocation16 + $0x4d8] sm:$0xff] }
 0x9a4   :  { %5562 = vmatprep.subr.bf16.mxu0 %v6211_v25  ;;  %v6267_v25 = vcombine.high %v3833_v20, %v3837_v21  ;;  %v3885_v4 = vld [vmem:[#allocation16 + $0x4f8] sm:$0xff] }
 0x9a6   :  { %5481 = vmatpush1.bf16.msra.mxu1 %v6208_v11  ;;  %v6264_v11 = vcombine.low %v3832_v17, %v3836_v18  ;;  %v3892_v17 = vld [vmem:[#allocation16 + $0x530] sm:$0xff]  ;;  %v3889_v18 = vld [vmem:[#allocation16 + $0x518] sm:$0xff] }
 0x9a7   :  { %5563 = vmatpush1.bf16.msra.mxu0 %v6210_v12  ;;  %5482 = vmatprep.subr.bf16.mxu1 %v6217_v26  ;;  %v6266_v12 = vcombine.low %v3833_v20, %v3837_v21  ;;  %v6273_v26 = vcombine.high %v3840_v6, %v3844_v7  ;;  %v3893_v20 = vld [vmem:[#allocation16 + $0x538] sm:$0xff]  ;;  %v6314_v21 = vcombine.low %v3881_v3, %v3885_v4 }
 0x9a8   :  { %5564 = vmatprep.subr.bf16.mxu0 %v6219_v27  ;;  %v6275_v27 = vcombine.high %v3841_v8, %v3845_v10 }
 0x9aa   :  { %5483 = vmatpush1.bf16.msra.mxu1 %v6216_v32  ;;  %v6272_v32 = vcombine.low %v3840_v6, %v3844_v7  ;;  %v3897_v6 = vld [vmem:[#allocation16 + $0x558] sm:$0xff] }
 0x9ab   :  { %5565 = vmatpush1.bf16.msra.mxu0 %v6218_v34  ;;  %5484 = vmatprep.subr.bf16.mxu1 %v6225_v35  ;;  %v6274_v34 = vcombine.low %v3841_v8, %v3845_v10  ;;  %v6281_v35 = vcombine.high %v3848_v28, %v3852_v30  ;;  %v3901_v7 = vld [vmem:[#allocation16 + $0x578] sm:$0xff]  ;;  %v6322_v10 = vcombine.low %v3889_v18, %v3893_v20 }
 0x9ac   :  { %5566 = vmatprep.subr.bf16.mxu0 %v6227_v36  ;;  %v6283_v36 = vcombine.high %v3849_v31, %v3853_v14 }
 0x9ae   :  { %5485 = vmatpush1.bf16.msra.mxu1 %v6224_v19  ;;  %v6280_v19 = vcombine.low %v3848_v28, %v3852_v30  ;;  %v3905_v28 = vld [vmem:[#allocation16 + $0x598] sm:$0xff] }
 0x9af   :  { %5567 = vmatpush1.bf16.msra.mxu0 %v6226_v41  ;;  %5486 = vmatprep.subr.bf16.mxu1 %v6233_v42  ;;  %v6282_v41 = vcombine.low %v3849_v31, %v3853_v14  ;;  %v6289_v42 = vcombine.high %v3856_v38, %v3860_v29  ;;  %v3909_v30 = vld [vmem:[#allocation16 + $0x5b8] sm:$0xff]  ;;  %v6330_v14 = vcombine.low %v3897_v6, %v3901_v7 }
 0x9b0   :  { %5568 = vmatprep.subr.bf16.mxu0 %v6235_v43  ;;  %v6291_v43 = vcombine.high %v3857_v39, %v3861_v40  ;;  %v3913_v38 = vld [vmem:[#allocation16 + $0x5d8] sm:$0xff] }
 0x9b1   :  { %v3917_v29 = vld [vmem:[#allocation16 + $0x5f8] sm:$0xff] }
 0x9b2   :  { %5487 = vmatpush1.bf16.msra.mxu1 %v6232_v48  ;;  %v3869_v48 = vld [vmem:[#allocation16 + $0x478] sm:$0xff] }
 0x9b3   :  { %5569 = vmatpush1.bf16.msra.mxu0 %v6234_v49  ;;  %5488 = vmatprep.subr.bf16.mxu1 %v6241_v52  ;;  %v6290_v49 = vcombine.low %v3857_v39, %v3861_v40  ;;  %v6297_v52 = vcombine.high %v3864_v44, %v3868_v45  ;;  %v6299_v57 = vcombine.high %v3865_v47, %v3869_v48 }
 0x9b4   :  { %5570 = vmatprep.subr.bf16.mxu0 %v6243_v55  ;;  %v3872_v55 = vld [vmem:[#allocation16 + $0x490] sm:$0xff]  ;;  %v6338_v40 = vcombine.low %v3905_v28, %v3909_v30 }
 0x9b6   :  { %5489 = vmatpush1.bf16.msra.mxu1 %v6240_v59  ;;  %v6296_v59 = vcombine.low %v3864_v44, %v3868_v45  ;;  %v3921_v44 = vld [vmem:[#allocation16 + $0x618] sm:$0xff] }
 0x9b7   :  { %5571 = vmatpush1.bf16.msra.mxu0 %v6242_v60  ;;  %5490 = vmatprep.subr.bf16.mxu1 %v6249_v61  ;;  %v6298_v60 = vcombine.low %v3865_v47, %v3869_v48  ;;  %v6305_v61 = vcombine.high %v3872_v55, %v3876_v56  ;;  %v3925_v45 = vld [vmem:[#allocation16 + $0x638] sm:$0xff]  ;;  %v6346_v47 = vcombine.low %v3913_v38, %v3917_v29 }
 0x9b8   :  { %5572 = vmatprep.subr.bf16.mxu0 %v6251_v62  ;;  %v6307_v62 = vcombine.high %v3873_v1, %v3877_v58 }
 0x9ba   :  { %5491 = vmatpush1.bf16.msra.mxu1 %v6248_v5  ;;  %v6304_v5 = vcombine.low %v3872_v55, %v3876_v56  ;;  %v3932_v55 = vld [vmem:[#allocation16 + $0x670] sm:$0xff]  ;;  %v3929_v56 = vld [vmem:[#allocation16 + $0x658] sm:$0xff] }
 0x9bb   :  { %5573 = vmatpush1.bf16.msra.mxu0 %v6250_v9  ;;  %5492 = vmatprep.subr.bf16.mxu1 %v6257_v13  ;;  %v6313_v9 = vcombine.high %v3880_v63, %v3884_v0  ;;  %v6315_v13 = vcombine.high %v3881_v3, %v3885_v4 }
 0x9bc   :  { %5574 = vmatprep.subr.bf16.mxu0 %v6259_v15  ;;  %v3888_v15 = vld [vmem:[#allocation16 + $0x510] sm:$0xff] }
 0x9bd   :  { %v6320_v8 = vcombine.low %v3888_v15, %v3892_v17 }
 0x9be   :  { %5493 = vmatpush1.bf16.msra.mxu1 %v6256_v22  ;;  %v6321_v22 = vcombine.high %v3888_v15, %v3892_v17  ;;  %v3945_v15 = vld [vmem:[#allocation16 + $0x6d8] sm:$0xff] }
 0x9bf   :  { %5575 = vmatpush1.bf16.msra.mxu0 %v6258_v23  ;;  %5494 = vmatprep.subr.bf16.mxu1 %v6265_v24  ;;  %v6323_v23 = vcombine.high %v3889_v18, %v3893_v20  ;;  %v3896_v24 = vld [vmem:[#allocation16 + $0x550] sm:$0xff]  ;;  %v3949_v17 = vld [vmem:[#allocation16 + $0x6f8] sm:$0xff] }
 0x9c0   :  { %5576 = vmatprep.subr.bf16.mxu0 %v6267_v25  ;;  %v3900_v25 = vld [vmem:[#allocation16 + $0x570] sm:$0xff] }
 0x9c1   :  { %v6328_v31 = vcombine.low %v3896_v24, %v3900_v25 }
 0x9c2   :  { %5495 = vmatpush1.bf16.msra.mxu1 %v6264_v11  ;;  %v6329_v11 = vcombine.high %v3896_v24, %v3900_v25  ;;  %v3953_v24 = vld [vmem:[#allocation16 + $0x718] sm:$0xff] }
 0x9c3   :  { %5577 = vmatpush1.bf16.msra.mxu0 %v6266_v12  ;;  %5496 = vmatprep.subr.bf16.mxu1 %v6273_v26  ;;  %v6331_v12 = vcombine.high %v3897_v6, %v3901_v7  ;;  %v3904_v26 = vld [vmem:[#allocation16 + $0x590] sm:$0xff]  ;;  %v3957_v25 = vld [vmem:[#allocation16 + $0x738] sm:$0xff]  ;;  %v6378_v7 = vcombine.low %v3945_v15, %v3949_v17 }
 0x9c4   :  { %5578 = vmatprep.subr.bf16.mxu0 %v6275_v27  ;;  %v3908_v27 = vld [vmem:[#allocation16 + $0x5b0] sm:$0xff] }
 0x9c5   :  { %v6336_v39 = vcombine.low %v3904_v26, %v3908_v27 }
 0x9c6   :  { %5497 = vmatpush1.bf16.msra.mxu1 %v6272_v32  ;;  %v6337_v32 = vcombine.high %v3904_v26, %v3908_v27  ;;  %v3961_v26 = vld [vmem:[#allocation16 + $0x758] sm:$0xff] }
 0x9c7   :  { %5579 = vmatpush1.bf16.msra.mxu0 %v6274_v34  ;;  %5498 = vmatprep.subr.bf16.mxu1 %v6281_v35  ;;  %v6339_v34 = vcombine.high %v3905_v28, %v3909_v30  ;;  %v3912_v35 = vld [vmem:[#allocation16 + $0x5d0] sm:$0xff]  ;;  %v3965_v27 = vld [vmem:[#allocation16 + $0x778] sm:$0xff]  ;;  %v6386_v30 = vcombine.low %v3953_v24, %v3957_v25 }
 0x9c8   :  { %5580 = vmatprep.subr.bf16.mxu0 %v6283_v36  ;;  %v3916_v36 = vld [vmem:[#allocation16 + $0x5f0] sm:$0xff] }
 0x9ca   :  { %5499 = vmatpush1.bf16.msra.mxu1 %v6280_v19  ;;  %v6345_v19 = vcombine.high %v3912_v35, %v3916_v36 }
 0x9cb   :  { %5581 = vmatpush1.bf16.msra.mxu0 %v6282_v41  ;;  %5509 = vmatprep.subr.bf16.mxu1 %v6289_v42  ;;  %v6347_v41 = vcombine.high %v3913_v38, %v3917_v29  ;;  %v3920_v42 = vld [vmem:[#allocation16 + $0x610] sm:$0xff]  ;;  %v6394_v29 = vcombine.low %v3961_v26, %v3965_v27 }
 0x9cc   :  { %5591 = vmatprep.subr.bf16.mxu0 %v6291_v43  ;;  %v3924_v43 = vld [vmem:[#allocation16 + $0x630] sm:$0xff] }
 0x9cd   :  { %5501 = vmatmul.mubr.bf16.vlgmr.msra.gmra.mrb[28].mxu1 %v8080_v2  ;;  %v6353_v48 = vcombine.high %v3920_v42, %v3924_v43 }
 0x9ce   :  { %5583 = vmatmul.mubr.bf16.vlgmr.msra.gmra.mrb[16].mxu0 %v8080_v2  ;;  %5510 = vmatpush1.bf16.msra.mxu1 %v6288_v46  ;;  %v6306_v2 = vcombine.low %v3873_v1, %v3877_v58  ;;  %v6344_v46 = vcombine.low %v3912_v35, %v3916_v36  ;;  %v6352_v1 = vcombine.low %v3920_v42, %v3924_v43  ;;  %v3969_v35 = vld [vmem:[#allocation16 + $0x798] sm:$0xff] }
 0x9cf   :  { %5541 = vmatprep.mubr.bf16.mxu1 %v8084_v16  ;;  %5592 = vmatpush1.bf16.msra.mxu0 %v6290_v49  ;;  %v6355_v49 = vcombine.high %v3921_v44, %v3925_v45  ;;  %v6354_v58 = vcombine.low %v3921_v44, %v3925_v45  ;;  %v3973_v36 = vld [vmem:[#allocation16 + $0x7b8] sm:$0xff] }
 0x9d0   :  { %5623 = vmatprep.mubr.bf16.mxu0 %v8084_v16  ;;  %5511 = vmatprep.subr.bf16.mxu1 %v6297_v52  ;;  %v6312_v16 = vcombine.low %v3880_v63, %v3884_v0  ;;  %v3928_v52 = vld [vmem:[#allocation16 + $0x650] sm:$0xff]  ;;  %v3937_v63 = vld [vmem:[#allocation16 + $0x698] sm:$0xff]  ;;  %v6402_v45 = vcombine.low %v3969_v35, %v3973_v36 }
 0x9d1   :  { %5593 = vmatprep.subr.bf16.mxu0 %v6299_v57  ;;  %v3933_v57 = vld [vmem:[#allocation16 + $0x678] sm:$0xff]  ;;  %v6360_v3 = vcombine.low %v3928_v52, %v3932_v55 }
 0x9d2   :  { %5512 = vmatpush1.bf16.msra.mxu1 %v6296_v59  ;;  %v6361_v59 = vcombine.high %v3928_v52, %v3932_v55  ;;  %v3941_v0 = vld [vmem:[#allocation16 + $0x6b8] sm:$0xff]  ;;  %v6362_v4 = vcombine.low %v3929_v56, %v3933_v57  ;;  %v8119_v52 = vld [vmem:[%s8178_s17] sm:$0xff] }
 0x9d3   :  { %5594 = vmatpush1.bf16.msra.mxu0 %v6298_v60  ;;  %5513 = vmatprep.subr.bf16.mxu1 %v6305_v61  ;;  %v6363_v60 = vcombine.high %v3929_v56, %v3933_v57  ;;  %v3936_v61 = vld [vmem:[#allocation16 + $0x690] sm:$0xff]  ;;  %v6370_v20 = vcombine.low %v3937_v63, %v3941_v0  ;;  %v3977_v42 = vld [vmem:[#allocation16 + $0x7d8] sm:$0xff]  ;;  %v3987_v55 = vrot.slane %v8119_v52, %v7890_v51 }
 0x9d4   :  { %5595 = vmatprep.subr.bf16.mxu0 %v6307_v62  ;;  %v3940_v62 = vld [vmem:[#allocation16 + $0x6b0] sm:$0xff]  ;;  %v3981_v43 = vld [vmem:[#allocation16 + $0x7f8] sm:$0xff]  ;;  %v3995_v56 = vrot.slane %v8119_v52, %v7915_v37  ;;  %v3991_v57 = vrot.slane %v8119_v52, %v7895_v53 }
 0x9d5   :  { %v6368_v18 = vcombine.low %v3936_v61, %v3940_v62 }
 0x9d6   :  { %5514 = vmatpush1.bf16.msra.mxu1 %v6304_v5  ;;  %v6369_v5 = vcombine.high %v3936_v61, %v3940_v62 }
 0x9d7   :  { %5596 = vmatpush1.bf16.msra.mxu0 %v6306_v2  ;;  %5515 = vmatprep.subr.bf16.mxu1 %v6313_v9  ;;  %v6371_v2 = vcombine.high %v3937_v63, %v3941_v0  ;;  %v3944_v9 = vld [vmem:[#allocation16 + $0x6d0] sm:$0xff] }
 0x9d8   :  { %5597 = vmatprep.subr.bf16.mxu0 %v6315_v13  ;;  %v3948_v13 = vld [vmem:[#allocation16 + $0x6f0] sm:$0xff] }
 0x9d9   :  { %v6376_v6 = vcombine.low %v3944_v9, %v3948_v13 }
 0x9da   :  { %5516 = vmatpush1.bf16.msra.mxu1 %v6312_v16  ;;  %v6377_v16 = vcombine.high %v3944_v9, %v3948_v13 }
 0x9db   :  { %5598 = vmatpush1.bf16.msra.mxu0 %v6314_v21  ;;  %5517 = vmatprep.subr.bf16.mxu1 %v6321_v22  ;;  %v6379_v21 = vcombine.high %v3945_v15, %v3949_v17  ;;  %v3952_v22 = vld [vmem:[#allocation16 + $0x710] sm:$0xff] }
 0x9dc   :  { %5599 = vmatprep.subr.bf16.mxu0 %v6323_v23  ;;  %v3956_v23 = vld [vmem:[#allocation16 + $0x730] sm:$0xff] }
 0x9dd   :  { %v6384_v28 = vcombine.low %v3952_v22, %v3956_v23 }
 0x9de   :  { %5518 = vmatpush1.bf16.msra.mxu1 %v6320_v8  ;;  %v6385_v8 = vcombine.high %v3952_v22, %v3956_v23 }
 0x9df   :  { %5600 = vmatpush1.bf16.msra.mxu0 %v6322_v10  ;;  %5519 = vmatprep.subr.bf16.mxu1 %v6329_v11  ;;  %v6387_v10 = vcombine.high %v3953_v24, %v3957_v25  ;;  %v3960_v11 = vld [vmem:[#allocation16 + $0x750] sm:$0xff] }
 0x9e0   :  { %5601 = vmatprep.subr.bf16.mxu0 %v6331_v12  ;;  %v3964_v12 = vld [vmem:[#allocation16 + $0x770] sm:$0xff] }
 0x9e1   :  { %v6392_v38 = vcombine.low %v3960_v11, %v3964_v12 }
 0x9e2   :  { %5520 = vmatpush1.bf16.msra.mxu1 %v6328_v31  ;;  %v6393_v31 = vcombine.high %v3960_v11, %v3964_v12 }
 0x9e3   :  { %5602 = vmatpush1.bf16.msra.mxu0 %v6330_v14  ;;  %5521 = vmatprep.subr.bf16.mxu1 %v6337_v32  ;;  %v6395_v14 = vcombine.high %v3961_v26, %v3965_v27  ;;  %v3968_v32 = vld [vmem:[#allocation16 + $0x790] sm:$0xff] }
 0x9e4   :  { %5603 = vmatprep.subr.bf16.mxu0 %v6339_v34  ;;  %v3972_v34 = vld [vmem:[#allocation16 + $0x7b0] sm:$0xff] }
 0x9e5   :  { %v6400_v44 = vcombine.low %v3968_v32, %v3972_v34 }
 0x9e6   :  { %5522 = vmatpush1.bf16.msra.mxu1 %v6336_v39  ;;  %v6401_v39 = vcombine.high %v3968_v32, %v3972_v34 }
 0x9e7   :  { %5604 = vmatpush1.bf16.msra.mxu0 %v6338_v40  ;;  %5523 = vmatprep.subr.bf16.mxu1 %v6345_v19  ;;  %v6403_v40 = vcombine.high %v3969_v35, %v3973_v36  ;;  %v3976_v19 = vld [vmem:[#allocation16 + $0x7d0] sm:$0xff] }
 0x9e8   :  { %5605 = vmatprep.subr.bf16.mxu0 %v6347_v41  ;;  %v3980_v41 = vld [vmem:[#allocation16 + $0x7f0] sm:$0xff] }
 0x9ea   :  { %5524 = vmatpush1.bf16.msra.mxu1 %v6344_v46  ;;  %v6409_v46 = vcombine.high %v3976_v19, %v3980_v41 }
 0x9eb   :  { %5606 = vmatpush1.bf16.msra.mxu0 %v6346_v47  ;;  %5525 = vmatprep.subr.bf16.mxu1 %v6353_v48  ;;  %v6411_v47 = vcombine.high %v3977_v42, %v3981_v43  ;;  %v6408_v48 = vcombine.low %v3976_v19, %v3980_v41 }
 0x9ec   :  { %5607 = vmatprep.subr.bf16.mxu0 %v6355_v49  ;;  %v6410_v49 = vcombine.low %v3977_v42, %v3981_v43 }
 0x9ee   :  { %5526 = vmatpush1.bf16.msra.mxu1 %v6352_v1  ;;  %v3999_v1 = vrot.slane %v8119_v52, %v7898_v54 }
 0x9ef   :  { %5608 = vmatpush1.bf16.msra.mxu0 %v6354_v58  ;;  %5527 = vmatprep.subr.bf16.mxu1 %v6361_v59 }
 0x9f0   :  { %5609 = vmatprep.subr.bf16.mxu0 %v6363_v60 }
 0x9f2   :  { %5528 = vmatpush1.bf16.msra.mxu1 %v6360_v3 }
 0x9f3   :  { %5610 = vmatpush1.bf16.msra.mxu0 %v6362_v4  ;;  %5529 = vmatprep.subr.bf16.mxu1 %v6369_v5 }
 0x9f4   :  { %5611 = vmatprep.subr.bf16.mxu0 %v6371_v2 }
 0x9f6   :  { %5530 = vmatpush1.bf16.msra.mxu1 %v6368_v18 }
 0x9f7   :  { %5612 = vmatpush1.bf16.msra.mxu0 %v6370_v20  ;;  %5531 = vmatprep.subr.bf16.mxu1 %v6377_v16 }
 0x9f8   :  { %5613 = vmatprep.subr.bf16.mxu0 %v6379_v21 }
 0x9fa   :  { %5532 = vmatpush1.bf16.msra.mxu1 %v6376_v6 }
 0x9fb   :  { %5614 = vmatpush1.bf16.msra.mxu0 %v6378_v7  ;;  %5533 = vmatprep.subr.bf16.mxu1 %v6385_v8 }
 0x9fc   :  { %5615 = vmatprep.subr.bf16.mxu0 %v6387_v10 }
 0x9fe   :  { %5534 = vmatpush1.bf16.msra.mxu1 %v6384_v28 }
 0x9ff   :  { %5616 = vmatpush1.bf16.msra.mxu0 %v6386_v30  ;;  %5535 = vmatprep.subr.bf16.mxu1 %v6393_v31 }
 0xa00   :  { %5617 = vmatprep.subr.bf16.mxu0 %v6395_v14 }
 0xa02   :  { %5536 = vmatpush1.bf16.msra.mxu1 %v6392_v38  ;;  %v4002_v38 = vsub.s32 4, %v7887_v50 }
 0xa03   :  { %5618 = vmatpush1.bf16.msra.mxu0 %v6394_v29  ;;  %5537 = vmatprep.subr.bf16.mxu1 %v6401_v39  ;;  %v4010_v29 = vsub.s32 6, %v7887_v50  ;;  %v4006_v39 = vsub.s32 5, %v7887_v50 }
 0xa04   :  { %5619 = vmatprep.subr.bf16.mxu0 %v6403_v40  ;;  %v4014_v40 = vsub.s32 7, %v7887_v50  ;;  %v4003_v19 = vrot.slane %v8119_v52, %v4002_v38 }
 0xa05   :  { %v4011_v41 = vrot.slane %v8119_v52, %v4010_v29  ;;  %v4007_v42 = vrot.slane %v8119_v52, %v4006_v39 }
 0xa06   :  { %5538 = vmatpush1.bf16.msra.mxu1 %v6400_v44  ;;  %v4015_v43 = vrot.slane %v8119_v52, %v4014_v40 }
 0xa07   :  { %5620 = vmatpush1.bf16.msra.mxu0 %v6402_v45  ;;  %5539 = vmatprep.subr.bf16.mxu1 %v6409_v46 }
 0xa08   :  { %5621 = vmatprep.subr.bf16.mxu0 %v6411_v47 }
 0xa0a   :  { %5540 = vmatpush1.bf16.msra.mxu1 %v6408_v48 }
 0xa0b   :  { %5622 = vmatpush1.bf16.msra.mxu0 %v6410_v49 }
 0xa0d   :  { %5542 = vmatmul.mubr.bf16.vlgmr.msra.gmra.mrb[28].mxu1 %v8104_v33 }
 0xa0e   :  { %5624 = vmatmul.mubr.bf16.vlgmr.msra.gmra.mrb[16].mxu0 %v8104_v33 }
 0xa60   :  { %v5379_v58 = vpop.f32.mrb[24].mxu1  ;;  %v5461_v59 = vpop.f32.mrb[12].mxu0 }
 0xa61   :  { %v6480_v33 = vadd.f32 %v5379_v58, %v3987_v55  ;;  %v6482_v60 = vadd.f32 %v5461_v59, %v3995_v56  ;;  %v5381_v61 = vpop.f32.mrb[25].mxu1  ;;  %v5463_v62 = vpop.f32.mrb[13].mxu0 }
 0xa62   :  { %v6481_v63 = vadd.f32 %v5381_v61, %v3991_v57  ;;  %v6483_v0 = vadd.f32 %v5463_v62, %v3999_v1  ;;  %v5383_v3 = vpop.f32.mrb[26].mxu1  ;;  %v5465_v4 = vpop.f32.mrb[14].mxu0 }
 0xa63   :  { %v5632_v51 = vand.u32 2147483647, %v6480_v33  ;;  %v5634_v5 = vand.u32 2147483647, %v6482_v60  ;;  %v5384_v53 = vpop.f32.mrb[27].mxu1  ;;  %v5466_v15 = vpop.f32.mrb[15].mxu0 }
 0xa64   :  { %v5633_v2 = vand.u32 2147483647, %v6481_v63  ;;  %v5635_v37 = vand.u32 2147483647, %v6483_v0  ;;  %vm5664_vm0 = vcmp.ge.f32.partialorder %v6480_v33, 0.0  ;;  %vm5666_vm1 = vcmp.ge.f32.partialorder %v6482_v60, 0.0 }
 0xa65   :  { %v5640_v9 = vsub.f32 0.0, %v5632_v51  ;;  %v5642_v13 = vsub.f32 0.0, %v5634_v5  ;;  %vm5665_vm2 = vcmp.ge.f32.partialorder %v6481_v63, 0.0  ;;  %vm5667_vm3 = vcmp.ge.f32.partialorder %v6483_v0, 0.0 }
 0xa66   :  { %v5641_v17 = vsub.f32 0.0, %v5633_v2  ;;  %v5643_v54 = vsub.f32 0.0, %v5635_v37 }
 0xa67   :  { %v5648_v18 = vmul.f32 1.442695, %v5640_v9  ;;  %v5652_v20 = vmul.f32 1.442695, %v5642_v13 }
 0xa68   :  { %v5650_v16 = vmul.f32 1.442695, %v5641_v17  ;;  %v5654_v21 = vmul.f32 1.442695, %v5643_v54 }
 0xa69   :  { %7238 = vpow2.f32 %v5648_v18 }
 0xa6a   :  { %7240 = vpow2.f32 %v5652_v20 }
 0xa6b   :  { %7242 = vpow2.f32 %v5650_v16 }
 0xa6c   :  { %7244 = vpow2.f32 %v5654_v21 }
 0xa73   :  { %v7239_v22 = vpop.eup %7238 }
 0xa74   :  { %v7241_v23 = vpop.eup %7240  ;;  %v5680_v24 = vadd.f32 1.0, %v7239_v22  ;;  %v5672_v12 = vsel %vm5664_vm0, 1.0, %v7239_v22 }
 0xa75   :  { %v7243_v25 = vpop.eup %7242  ;;  %v5682_v6 = vadd.f32 1.0, %v7241_v23  ;;  %v5674_v28 = vsel %vm5666_vm1, 1.0, %v7241_v23 }
 0xa76   :  { %v7245_v7 = vpop.eup %7244  ;;  %7246 = vrcp.f32 %v5680_v24  ;;  %v5681_v8 = vadd.f32 1.0, %v7243_v25  ;;  %v5673_v14 = vsel %vm5665_vm2, 1.0, %v7243_v25 }
 0xa77   :  { %7248 = vrcp.f32 %v5682_v6  ;;  %v5683_v10 = vadd.f32 1.0, %v7245_v7  ;;  %v5675_v35 = vsel %vm5667_vm3, 1.0, %v7245_v7 }
 0xa78   :  { %7250 = vrcp.f32 %v5681_v8 }
 0xa79   :  { %7252 = vrcp.f32 %v5683_v10 }
 0xa80   :  { %v7247_v11 = vpop.eup %7246 }
 0xa81   :  { %v7249_v26 = vpop.eup %7248  ;;  %v5696_v27 = vmul.f32 %v7247_v11, %v5672_v12 }
 0xa82   :  { %v7251_v30 = vpop.eup %7250  ;;  %v5698_v31 = vmul.f32 %v7249_v26, %v5674_v28 }
 0xa83   :  { %v7253_v32 = vpop.eup %7252  ;;  %5704 = vst [vmem:[%s8194_s27] sm:$0xff] %v5696_v27  ;;  %v5697_v34 = vmul.f32 %v7251_v30, %v5673_v14 }
 0xa84   :  { %5706 = vst [vmem:[%s8194_s27 + $0x10] sm:$0xff] %v5698_v31  ;;  %v5699_v36 = vmul.f32 %v7253_v32, %v5675_v35 }
 0xa85   :  { %5705 = vst [vmem:[%s8194_s27 + $0x8] sm:$0xff] %v5697_v34 }
 0xa86   :  { %5707 = vst [vmem:[%s8194_s27 + $0x18] sm:$0xff] %v5699_v36 }
 0xae0   :  { %v5543_v44 = vpop.f32.mrb[28].mxu1 }
 0xae1   :  { %v6484_v45 = vadd.f32 %v5543_v44, %v4003_v19  ;;  %v5625_v46 = vpop.f32.mrb[16].mxu0  ;;  %v5545_v47 = vpop.f32.mrb[29].mxu1 }
 0xae2   :  { %v6486_v48 = vadd.f32 %v5625_v46, %v4011_v41  ;;  %v6485_v49 = vadd.f32 %v5545_v47, %v4007_v42  ;;  %v5627_v55 = vpop.f32.mrb[17].mxu0  ;;  %v5547_v56 = vpop.f32.mrb[30].mxu1 }
 0xae3   :  { %v5636_v57 = vand.u32 2147483647, %v6484_v45  ;;  %v6487_v1 = vadd.f32 %v5627_v55, %v4015_v43  ;;  %v5629_v58 = vpop.f32.mrb[18].mxu0  ;;  %v5548_v50 = vpop.f32.mrb[31].mxu1  ;;  %vm5668_vm4 = vcmp.ge.f32.partialorder %v6484_v45, 0.0 }
 0xae4   :  { %v5638_v59 = vand.u32 2147483647, %v6486_v48  ;;  %v5637_v33 = vand.u32 2147483647, %v6485_v49  ;;  %v5630_v62 = vpop.f32.mrb[19].mxu0  ;;  %vm5670_vm5 = vcmp.ge.f32.partialorder %v6486_v48, 0.0 }
 0xae5   :  { %v5644_v60 = vsub.f32 0.0, %v5636_v57  ;;  %v5639_v61 = vand.u32 2147483647, %v6487_v1  ;;  %vm5669_vm6 = vcmp.ge.f32.partialorder %v6485_v49, 0.0  ;;  %vm5671_vm7 = vcmp.ge.f32.partialorder %v6487_v1, 0.0 }
 0xae6   :  { %v5646_v63 = vsub.f32 0.0, %v5638_v59  ;;  %v5645_v0 = vsub.f32 0.0, %v5637_v33 }
 0xae7   :  { %v5656_v52 = vmul.f32 1.442695, %v5644_v60  ;;  %v5647_v3 = vsub.f32 0.0, %v5639_v61 }
 0xae8   :  { %v5660_v4 = vmul.f32 1.442695, %v5646_v63  ;;  %v5658_v51 = vmul.f32 1.442695, %v5645_v0 }
 0xae9   :  { %7254 = vpow2.f32 %v5656_v52  ;;  %v5662_v5 = vmul.f32 1.442695, %v5647_v3 }
 0xaea   :  { %7256 = vpow2.f32 %v5660_v4 }
 0xaeb   :  { %7258 = vpow2.f32 %v5658_v51 }
 0xaec   :  { %7260 = vpow2.f32 %v5662_v5 }
 0xaf3   :  { %v7255_v2 = vpop.eup %7254 }
 0xaf4   :  { %v7257_v37 = vpop.eup %7256  ;;  %v5684_v9 = vadd.f32 1.0, %v7255_v2  ;;  %v5676_v20 = vsel %vm5668_vm4, 1.0, %v7255_v2 }
 0xaf5   :  { %v7259_v13 = vpop.eup %7258  ;;  %v5686_v53 = vadd.f32 1.0, %v7257_v37  ;;  %v5678_v22 = vsel %vm5670_vm5, 1.0, %v7257_v37 }
 0xaf6   :  { %v7261_v15 = vpop.eup %7260  ;;  %7262 = vrcp.f32 %v5684_v9  ;;  %v5685_v17 = vadd.f32 1.0, %v7259_v13  ;;  %v5677_v25 = vsel %vm5669_vm6, 1.0, %v7259_v13 }
 0xaf7   :  { %7264 = vrcp.f32 %v5686_v53  ;;  %v5687_v54 = vadd.f32 1.0, %v7261_v15  ;;  %v5679_v8 = vsel %vm5671_vm7, 1.0, %v7261_v15 }
 0xaf8   :  { %7266 = vrcp.f32 %v5685_v17 }
 0xaf9   :  { %7268 = vrcp.f32 %v5687_v54 }
 0xb00   :  { %v7263_v18 = vpop.eup %7262 }
 0xb01   :  { %v7265_v16 = vpop.eup %7264  ;;  %v5700_v21 = vmul.f32 %v7263_v18, %v5676_v20 }
 0xb02   :  { %v7267_v23 = vpop.eup %7266  ;;  %v5702_v24 = vmul.f32 %v7265_v16, %v5678_v22 }
 0xb03   :  { %v7269_v6 = vpop.eup %7268  ;;  %5708 = vst [vmem:[%s8194_s27 + $0x20] sm:$0xff] %v5700_v21  ;;  %v5701_v7 = vmul.f32 %v7267_v23, %v5677_v25 }
 0xb04   :  { %5710 = vst [vmem:[%s8194_s27 + $0x30] sm:$0xff] %v5702_v24  ;;  %v5703_v10 = vmul.f32 %v7269_v6, %v5679_v8 }
 0xb05   :  { %5709 = vst [vmem:[%s8194_s27 + $0x28] sm:$0xff] %v5701_v7 }
 0xb06   :  { %5711 = vst [vmem:[%s8194_s27 + $0x38] sm:$0xff] %v5703_v10 }
 0xb07   :  { %5720 = vsyncpa [#allocation3], 1 }
 0xb08   :  { %5721 = vsyncpa [#allocation5], 1 }
 0xb09   :  { %5722 = vsyncpa [#allocation8], 1 }
 0xb0a   :  { %5723 = vsyncpa [#allocation11], 1 }
 0xb0b   :  { %5724 = vsyncpa [#allocation14], 1 }
 0xb0c   :  { %5725 = vsyncpa [#allocation17], 1 }

</bundles_post_ra>
